<compile_context>
chip_gen: v7x
topology: tpu7x:2x2x1
jax: 0.10.0
libtpu: 0.0.40
codegen_flags: <defaults>
</compile_context>

<pallas_src>
import jax
import jax.numpy as jnp
import numpy as np
from jax.experimental import pallas as pl
from jax.experimental.pallas import tpu as pltpu

L_IN = 88                       # 88 -> pool/2 -> 44 -> pool/2 -> 22 ; 32*22 == fc1 in
L1, L2, L3 = L_IN, L_IN // 2, L_IN // 4
NUM_CLASSES = 5
NC_PAD = 128                    # lane-dense logits width


def _round_up(x, m):
    return ((x + m - 1) // m) * m


def lidar_cnn_kernel(xp_ref, w1_ref, b1_ref, w2_ref, b2_ref,
                     fc1w_ref, fc1b_ref, fc2w_ref, fc2b_ref,
                     out_ref, p1pad_ref):
    TB = out_ref.shape[0]

    # ---- conv1 (3 -> 16, k=3, pad=1): 3 shifted taps, batched over the tile ----
    y1 = jnp.zeros((L1 * TB, 16), jnp.float32)
    for k in range(3):
        xs = xp_ref[pl.ds(k, L1)].reshape(L1 * TB, 3)               # bf16 (L1*TB, 3)
        y1 = y1 + jnp.dot(xs, w1_ref[k], preferred_element_type=jnp.float32)
    y1 = jnp.maximum(y1 + b1_ref[...], 0.0)

    # ---- maxpool1d(2): layout-free reshape + sublane-aligned slice-pair max ----
    y1r = y1.reshape(L2, 2 * TB, 16)                                # rows = l*TB + b
    p1 = jnp.maximum(y1r[:, :TB, :], y1r[:, TB:, :])                # (L2, TB, 16) f32

    # zero halo rows 0 / L2+1 implement conv2's padding=1; stored once as bf16
    p1pad_ref[0] = jnp.zeros((TB, 16), jnp.bfloat16)
    p1pad_ref[L2 + 1] = jnp.zeros((TB, 16), jnp.bfloat16)
    p1pad_ref[pl.ds(1, L2)] = p1.astype(jnp.bfloat16)
    # TODO(synk): Dropout(0.5) omitted -- inference/eval semantics (identity).

    # ---- conv2 (16 -> 32, k=3, pad=1) ----
    y2 = jnp.zeros((L2 * TB, 32), jnp.float32)
    for k in range(3):
        ps = p1pad_ref[pl.ds(k, L2)].reshape(L2 * TB, 16)           # bf16
        y2 = y2 + jnp.dot(ps, w2_ref[k], preferred_element_type=jnp.float32)
    y2 = jnp.maximum(y2 + b2_ref[...], 0.0)

    # ---- maxpool1d(2), same vectorized pattern ----
    y2r = y2.reshape(L3, 2 * TB, 32)
    p2 = jnp.maximum(y2r[:, :TB, :], y2r[:, TB:, :]).astype(jnp.bfloat16)  # (L3, TB, 32)

    # ---- fc1 (704 -> 128): flatten fused into the weight permutation; sum of
    #      per-position MXU matmuls avoids any transpose / unaligned stores ----
    h = jnp.zeros((TB, 128), jnp.float32)
    for j in range(L3):
        h = h + jnp.dot(p2[j], fc1w_ref[j], preferred_element_type=jnp.float32)
    h = jnp.maximum(h + fc1b_ref[...], 0.0)                          # (TB, 128)

    # ---- fc2 (128 -> NC, zero-padded to 128 lanes): lane-dense store ----
    out_ref[...] = jnp.dot(h.astype(jnp.bfloat16), fc2w_ref[...],
                           preferred_element_type=jnp.float32) + fc2b_ref[...]


def lidar_cnn_forward(x_ncl, params):
    """x_ncl: (B, 3, 88) float32 in PyTorch NCL layout -> (B, num_classes)."""
    w1, b1, w2, b2, fc1w, fc1b, fc2w, fc2b = params
    B = x_ncl.shape[0]
    nc = fc2w.shape[0]
    assert nc <= NC_PAD

    TB = min(64, _round_up(B, 16))        # batch tile; multiple of 16 keeps tiling clean
    B_pad = _round_up(B, TB)
    grid = (B_pad // TB,)

    # ---- plain-JAX glue: layout / padding / weight re-arrangement only ----
    x = jnp.transpose(x_ncl.astype(jnp.float32), (2, 0, 1))                  # (88, B, 3)
    xp = jnp.pad(x, ((1, 1), (0, B_pad - B), (0, 0))).astype(jnp.bfloat16)   # (90, B_pad, 3)

    w1t = jnp.transpose(w1, (2, 1, 0)).astype(jnp.bfloat16)                  # (K,Cin,Cout)=(3,3,16)
    w2t = jnp.transpose(w2, (2, 1, 0)).astype(jnp.bfloat16)                  # (3,16,32)
    # torch flatten is channel-major (c*22 + l); kernel contracts per-position:
    # fc1w_perm[j, c, o] = fc1w[o, c*22 + j]
    fc1wp = jnp.transpose(fc1w.reshape(128, 32, L3), (2, 1, 0)).astype(jnp.bfloat16)  # (22,32,128)
    fc2wf = jnp.zeros((128, NC_PAD), jnp.bfloat16).at[:, :nc].set(
        jnp.transpose(fc2w).astype(jnp.bfloat16))                            # (128, 128)
    fc2bf = jnp.zeros((1, NC_PAD), jnp.float32).at[0, :nc].set(fc2b.astype(jnp.float32))
    b1f = b1.reshape(1, 16).astype(jnp.float32)
    b2f = b2.reshape(1, 32).astype(jnp.float32)
    fc1bf = fc1b.reshape(1, 128).astype(jnp.float32)

    def full(a):                        # resident (constant index_map) weight/bias spec
        return pl.BlockSpec(a.shape, lambda i, _nd=a.ndim: (0,) * _nd)

    flops = 2 * B_pad * (L1 * 9 * 16 + L2 * 48 * 32 + 704 * 128 + 128 * 128)
    bytes_accessed = (xp.size * 2
                      + (w1t.size + w2t.size + fc1wp.size + fc2wf.size) * 2
                      + (b1f.size + b2f.size + fc1bf.size + fc2bf.size) * 4
                      + B_pad * NC_PAD * 4)

    out_pad = pl.pallas_call(
        lidar_cnn_kernel,
        out_shape=jax.ShapeDtypeStruct((B_pad, NC_PAD), jnp.float32),
        grid=grid,
        in_specs=[
            pl.BlockSpec((L1 + 2, TB, 3), lambda i: (0, i, 0)),   # batch-tiled input
            full(w1t), full(b1f), full(w2t), full(b2f),
            full(fc1wp), full(fc1bf), full(fc2wf), full(fc2bf),
        ],
        out_specs=pl.BlockSpec((TB, NC_PAD), lambda i: (i, 0)),   # lane-dense logits
        scratch_shapes=[
            pltpu.VMEM((L2 + 2, TB, 16), jnp.bfloat16),           # pool1 out + zero halo
        ],
        compiler_params=pltpu.CompilerParams(dimension_semantics=("parallel",)),
        cost_estimate=pl.CostEstimate(flops=flops, transcendentals=0,
                                      bytes_accessed=bytes_accessed),
    )(xp, w1t, b1f, w2t, b2f, fc1wp, fc1bf, fc2wf, fc2bf)

    return out_pad[:B, :nc]


def lidar_cnn_reference(x_ncl, params):
    """Pure-JAX f32 reference mirroring the PyTorch forward (eval mode)."""
    w1, b1, w2, b2, fc1w, fc1b, fc2w, fc2b = params
    dn = ('NCH', 'OIH', 'NCH')
    y = jax.lax.conv_general_dilated(x_ncl, w1, (1,), [(1, 1)], dimension_numbers=dn)
    y = jax.nn.relu(y + b1[None, :, None])
    y = jnp.max(y.reshape(y.shape[0], y.shape[1], -1, 2), axis=-1)
    y = jax.lax.conv_general_dilated(y, w2, (1,), [(1, 1)], dimension_numbers=dn)
    y = jax.nn.relu(y + b2[None, :, None])
    y = jnp.max(y.reshape(y.shape[0], y.shape[1], -1, 2), axis=-1)
    flat = y.reshape(y.shape[0], -1)                  # (B, 32*22), channel-major
    h = jax.nn.relu(flat @ fc1w.T + fc1b)
    return h @ fc2w.T + fc2b


def init_params(key, num_classes=NUM_CLASSES):
    ks = jax.random.split(key, 8)

    def u(k, shape, fan_in):
        bound = 1.0 / np.sqrt(fan_in)
        return jax.random.uniform(k, shape, jnp.float32, -bound, bound)

    w1 = u(ks[0], (16, 3, 3), 3 * 3)
    b1 = u(ks[1], (16,), 3 * 3)
    w2 = u(ks[2], (32, 16, 3), 16 * 3)
    b2 = u(ks[3], (32,), 16 * 3)
    fc1w = u(ks[4], (128, 32 * 22), 32 * 22)
    fc1b = u(ks[5], (128,), 32 * 22)
    fc2w = u(ks[6], (num_classes, 128), 128)
    fc2b = u(ks[7], (num_classes,), 128)
    return (w1, b1, w2, b2, fc1w, fc1b, fc2w, fc2b)


if __name__ == "__main__":
    key = jax.random.PRNGKey(0)
    k_x, k_p = jax.random.split(key)
    B = 2
    x = jax.random.normal(k_x, (B, 3, L_IN), jnp.float32)   # PyTorch NCL input (B, 3, 88)
    params = init_params(k_p)

    out = jax.jit(lidar_cnn_forward)(x, params)
    out = jax.block_until_ready(out)

    ref = lidar_cnn_reference(x, params)
    np.testing.assert_allclose(np.asarray(out), np.asarray(ref), rtol=2e-2, atol=2e-2)
    print("KERNEL_OK")
</pallas_src>

<mosaic_0001>
module attributes {stable_mosaic.version = 11 : i64} {
  func.func @lidar_cnn_kernel(%arg0: i32, %arg1: memref<90x16x3xbf16, #tpu.memory_space<vmem>>, %arg2: memref<3x3x16xbf16, #tpu.memory_space<vmem>>, %arg3: memref<1x16xf32, #tpu.memory_space<vmem>>, %arg4: memref<3x16x32xbf16, #tpu.memory_space<vmem>>, %arg5: memref<1x32xf32, #tpu.memory_space<vmem>>, %arg6: memref<22x32x128xbf16, #tpu.memory_space<vmem>>, %arg7: memref<1x128xf32, #tpu.memory_space<vmem>>, %arg8: memref<128x128xbf16, #tpu.memory_space<vmem>>, %arg9: memref<1x128xf32, #tpu.memory_space<vmem>>, %arg10: memref<16x128xf32, #tpu.memory_space<vmem>>, %arg11: memref<46x16x16xbf16, #tpu.memory_space<vmem>>) attributes {dimension_semantics = [#tpu.dimension_semantics<parallel>], iteration_bounds = array<i64: 1>, scalar_prefetch = 0 : i64, scratch_operands = 1 : i64, tpu.core_type = #tpu.core_type<tc>, window_params = [{transform_indices = @transform_0, window_bounds = array<i64: 90, 16, 3>}, {pipeline_mode = #tpu.pipeline_mode<synchronous>, transform_indices = @transform_1, window_bounds = array<i64: 3, 3, 16>}, {pipeline_mode = #tpu.pipeline_mode<synchronous>, transform_indices = @transform_2, window_bounds = array<i64: 1, 16>}, {pipeline_mode = #tpu.pipeline_mode<synchronous>, transform_indices = @transform_3, window_bounds = array<i64: 3, 16, 32>}, {pipeline_mode = #tpu.pipeline_mode<synchronous>, transform_indices = @transform_4, window_bounds = array<i64: 1, 32>}, {pipeline_mode = #tpu.pipeline_mode<synchronous>, transform_indices = @transform_5, window_bounds = array<i64: 22, 32, 128>}, {pipeline_mode = #tpu.pipeline_mode<synchronous>, transform_indices = @transform_6, window_bounds = array<i64: 1, 128>}, {pipeline_mode = #tpu.pipeline_mode<synchronous>, transform_indices = @transform_7, window_bounds = array<i64: 128, 128>}, {pipeline_mode = #tpu.pipeline_mode<synchronous>, transform_indices = @transform_8, window_bounds = array<i64: 1, 128>}, {transform_indices = @transform_9, window_bounds = array<i64: 16, 128>}]} {
    %cst = arith.constant 0.000000e+00 : f32
    %0 = vector.broadcast %cst : f32 to vector<1408x16xf32>
    %c0 = arith.constant 0 : index
    %c0_0 = arith.constant 0 : index
    %c0_1 = arith.constant 0 : index
    %1 = vector.load %arg1[%c0, %c0_0, %c0_1] : memref<90x16x3xbf16, #tpu.memory_space<vmem>>, vector<88x16x3xbf16>
    %2 = vector.shape_cast %1 : vector<88x16x3xbf16> to vector<1408x3xbf16>
    %c0_2 = arith.constant 0 : index
    %c0_3 = arith.constant 0 : index
    %c0_4 = arith.constant 0 : index
    %3 = vector.load %arg2[%c0_2, %c0_3, %c0_4] : memref<3x3x16xbf16, #tpu.memory_space<vmem>>, vector<1x3x16xbf16>
    %4 = vector.shape_cast %3 : vector<1x3x16xbf16> to vector<3x16xbf16>
    %cst_5 = arith.constant dense<0.000000e+00> : vector<1408x16xf32>
    %5 = tpu.matmul %2, %4, %cst_5 {dimension_numbers = #tpu.dot_dimension_numbers<[1], [0], [0], [1], [0, 0, 1, 1], [], []>} : vector<1408x3xbf16>, vector<3x16xbf16>, vector<1408x16xf32> -> vector<1408x16xf32>
    %6 = arith.addf %0, %5 : vector<1408x16xf32>
    %c1 = arith.constant 1 : index
    %c0_6 = arith.constant 0 : index
    %c0_7 = arith.constant 0 : index
    %7 = vector.load %arg1[%c1, %c0_6, %c0_7] : memref<90x16x3xbf16, #tpu.memory_space<vmem>>, vector<88x16x3xbf16>
    %8 = vector.shape_cast %7 : vector<88x16x3xbf16> to vector<1408x3xbf16>
    %c1_8 = arith.constant 1 : index
    %c0_9 = arith.constant 0 : index
    %c0_10 = arith.constant 0 : index
    %9 = vector.load %arg2[%c1_8, %c0_9, %c0_10] : memref<3x3x16xbf16, #tpu.memory_space<vmem>>, vector<1x3x16xbf16>
    %10 = vector.shape_cast %9 : vector<1x3x16xbf16> to vector<3x16xbf16>
    %cst_11 = arith.constant dense<0.000000e+00> : vector<1408x16xf32>
    %11 = tpu.matmul %8, %10, %cst_11 {dimension_numbers = #tpu.dot_dimension_numbers<[1], [0], [0], [1], [0, 0, 1, 1], [], []>} : vector<1408x3xbf16>, vector<3x16xbf16>, vector<1408x16xf32> -> vector<1408x16xf32>
    %12 = arith.addf %6, %11 : vector<1408x16xf32>
    %c2 = arith.constant 2 : index
    %c0_12 = arith.constant 0 : index
    %c0_13 = arith.constant 0 : index
    %13 = vector.load %arg1[%c2, %c0_12, %c0_13] : memref<90x16x3xbf16, #tpu.memory_space<vmem>>, vector<88x16x3xbf16>
    %14 = vector.shape_cast %13 : vector<88x16x3xbf16> to vector<1408x3xbf16>
    %c2_14 = arith.constant 2 : index
    %c0_15 = arith.constant 0 : index
    %c0_16 = arith.constant 0 : index
    %15 = vector.load %arg2[%c2_14, %c0_15, %c0_16] : memref<3x3x16xbf16, #tpu.memory_space<vmem>>, vector<1x3x16xbf16>
    %16 = vector.shape_cast %15 : vector<1x3x16xbf16> to vector<3x16xbf16>
    %cst_17 = arith.constant dense<0.000000e+00> : vector<1408x16xf32>
    %17 = tpu.matmul %14, %16, %cst_17 {dimension_numbers = #tpu.dot_dimension_numbers<[1], [0], [0], [1], [0, 0, 1, 1], [], []>} : vector<1408x3xbf16>, vector<3x16xbf16>, vector<1408x16xf32> -> vector<1408x16xf32>
    %18 = arith.addf %12, %17 : vector<1408x16xf32>
    %c0_18 = arith.constant 0 : index
    %c0_19 = arith.constant 0 : index
    %19 = vector.load %arg3[%c0_18, %c0_19] : memref<1x16xf32, #tpu.memory_space<vmem>>, vector<1x16xf32>
    %20 = vector.broadcast %19 : vector<1x16xf32> to vector<1408x16xf32>
    %21 = arith.addf %18, %20 : vector<1408x16xf32>
    %cst_20 = arith.constant 0.000000e+00 : f32
    %22 = vector.broadcast %cst_20 : f32 to vector<1408x16xf32>
    %23 = arith.maximumf %21, %22 : vector<1408x16xf32>
    %24 = vector.shape_cast %23 : vector<1408x16xf32> to vector<44x32x16xf32>
    %25 = vector.extract_strided_slice %24 {offsets = [0, 0, 0], sizes = [44, 16, 16], strides = [1, 1, 1]} : vector<44x32x16xf32> to vector<44x16x16xf32>
    %26 = vector.extract_strided_slice %24 {offsets = [0, 16, 0], sizes = [44, 16, 16], strides = [1, 1, 1]} : vector<44x32x16xf32> to vector<44x16x16xf32>
    %27 = arith.maximumf %25, %26 : vector<44x16x16xf32>
    %cst_21 = arith.constant 0.000000e+00 : bf16
    %28 = vector.broadcast %cst_21 : bf16 to vector<16x16xbf16>
    %c0_22 = arith.constant 0 : index
    %c0_23 = arith.constant 0 : index
    %c0_24 = arith.constant 0 : index
    %29 = vector.load %arg11[%c0_22, %c0_23, %c0_24] : memref<46x16x16xbf16, #tpu.memory_space<vmem>>, vector<1x16x16xbf16>
    %30 = vector.shape_cast %29 : vector<1x16x16xbf16> to vector<16x16xbf16>
    %31 = vector.shape_cast %28 : vector<16x16xbf16> to vector<1x16x16xbf16>
    tpu.vector_store %arg11[%c0_22, %c0_23, %c0_24], %31 {strides = array<i32>} : memref<46x16x16xbf16, #tpu.memory_space<vmem>>, vector<1x16x16xbf16>,
    %cst_25 = arith.constant 0.000000e+00 : bf16
    %32 = vector.broadcast %cst_25 : bf16 to vector<16x16xbf16>
    %c45 = arith.constant 45 : index
    %c0_26 = arith.constant 0 : index
    %c0_27 = arith.constant 0 : index
    %33 = vector.load %arg11[%c45, %c0_26, %c0_27] : memref<46x16x16xbf16, #tpu.memory_space<vmem>>, vector<1x16x16xbf16>
    %34 = vector.shape_cast %33 : vector<1x16x16xbf16> to vector<16x16xbf16>
    %35 = vector.shape_cast %32 : vector<16x16xbf16> to vector<1x16x16xbf16>
    tpu.vector_store %arg11[%c45, %c0_26, %c0_27], %35 {strides = array<i32>} : memref<46x16x16xbf16, #tpu.memory_space<vmem>>, vector<1x16x16xbf16>,
    %36 = arith.truncf %27 : vector<44x16x16xf32> to vector<44x16x16xbf16>
    %c1_28 = arith.constant 1 : index
    %c0_29 = arith.constant 0 : index
    %c0_30 = arith.constant 0 : index
    %37 = vector.load %arg11[%c1_28, %c0_29, %c0_30] : memref<46x16x16xbf16, #tpu.memory_space<vmem>>, vector<44x16x16xbf16>
    tpu.vector_store %arg11[%c1_28, %c0_29, %c0_30], %36 {strides = array<i32>} : memref<46x16x16xbf16, #tpu.memory_space<vmem>>, vector<44x16x16xbf16>,
    %cst_31 = arith.constant 0.000000e+00 : f32
    %38 = vector.broadcast %cst_31 : f32 to vector<704x32xf32>
    %c0_32 = arith.constant 0 : index
    %c0_33 = arith.constant 0 : index
    %c0_34 = arith.constant 0 : index
    %39 = vector.load %arg11[%c0_32, %c0_33, %c0_34] : memref<46x16x16xbf16, #tpu.memory_space<vmem>>, vector<44x16x16xbf16>
    %40 = vector.shape_cast %39 : vector<44x16x16xbf16> to vector<704x16xbf16>
    %c0_35 = arith.constant 0 : index
    %c0_36 = arith.constant 0 : index
    %c0_37 = arith.constant 0 : index
    %41 = vector.load %arg4[%c0_35, %c0_36, %c0_37] : memref<3x16x32xbf16, #tpu.memory_space<vmem>>, vector<1x16x32xbf16>
    %42 = vector.shape_cast %41 : vector<1x16x32xbf16> to vector<16x32xbf16>
    %cst_38 = arith.constant dense<0.000000e+00> : vector<704x32xf32>
    %43 = tpu.matmul %40, %42, %cst_38 {dimension_numbers = #tpu.dot_dimension_numbers<[1], [0], [0], [1], [0, 0, 1, 1], [], []>} : vector<704x16xbf16>, vector<16x32xbf16>, vector<704x32xf32> -> vector<704x32xf32>
    %44 = arith.addf %38, %43 : vector<704x32xf32>
    %c1_39 = arith.constant 1 : index
    %c0_40 = arith.constant 0 : index
    %c0_41 = arith.constant 0 : index
    %45 = vector.load %arg11[%c1_39, %c0_40, %c0_41] : memref<46x16x16xbf16, #tpu.memory_space<vmem>>, vector<44x16x16xbf16>
    %46 = vector.shape_cast %45 : vector<44x16x16xbf16> to vector<704x16xbf16>
    %c1_42 = arith.constant 1 : index
    %c0_43 = arith.constant 0 : index
    %c0_44 = arith.constant 0 : index
    %47 = vector.load %arg4[%c1_42, %c0_43, %c0_44] : memref<3x16x32xbf16, #tpu.memory_space<vmem>>, vector<1x16x32xbf16>
    %48 = vector.shape_cast %47 : vector<1x16x32xbf16> to vector<16x32xbf16>
    %cst_45 = arith.constant dense<0.000000e+00> : vector<704x32xf32>
    %49 = tpu.matmul %46, %48, %cst_45 {dimension_numbers = #tpu.dot_dimension_numbers<[1], [0], [0], [1], [0, 0, 1, 1], [], []>} : vector<704x16xbf16>, vector<16x32xbf16>, vector<704x32xf32> -> vector<704x32xf32>
    %50 = arith.addf %44, %49 : vector<704x32xf32>
    %c2_46 = arith.constant 2 : index
    %c0_47 = arith.constant 0 : index
    %c0_48 = arith.constant 0 : index
    %51 = vector.load %arg11[%c2_46, %c0_47, %c0_48] : memref<46x16x16xbf16, #tpu.memory_space<vmem>>, vector<44x16x16xbf16>
    %52 = vector.shape_cast %51 : vector<44x16x16xbf16> to vector<704x16xbf16>
    %c2_49 = arith.constant 2 : index
    %c0_50 = arith.constant 0 : index
    %c0_51 = arith.constant 0 : index
    %53 = vector.load %arg4[%c2_49, %c0_50, %c0_51] : memref<3x16x32xbf16, #tpu.memory_space<vmem>>, vector<1x16x32xbf16>
    %54 = vector.shape_cast %53 : vector<1x16x32xbf16> to vector<16x32xbf16>
    %cst_52 = arith.constant dense<0.000000e+00> : vector<704x32xf32>
    %55 = tpu.matmul %52, %54, %cst_52 {dimension_numbers = #tpu.dot_dimension_numbers<[1], [0], [0], [1], [0, 0, 1, 1], [], []>} : vector<704x16xbf16>, vector<16x32xbf16>, vector<704x32xf32> -> vector<704x32xf32>
    %56 = arith.addf %50, %55 : vector<704x32xf32>
    %c0_53 = arith.constant 0 : index
    %c0_54 = arith.constant 0 : index
    %57 = vector.load %arg5[%c0_53, %c0_54] : memref<1x32xf32, #tpu.memory_space<vmem>>, vector<1x32xf32>
    %58 = vector.broadcast %57 : vector<1x32xf32> to vector<704x32xf32>
    %59 = arith.addf %56, %58 : vector<704x32xf32>
    %cst_55 = arith.constant 0.000000e+00 : f32
    %60 = vector.broadcast %cst_55 : f32 to vector<704x32xf32>
    %61 = arith.maximumf %59, %60 : vector<704x32xf32>
    %62 = vector.shape_cast %61 : vector<704x32xf32> to vector<22x32x32xf32>
    %63 = vector.extract_strided_slice %62 {offsets = [0, 0, 0], sizes = [22, 16, 32], strides = [1, 1, 1]} : vector<22x32x32xf32> to vector<22x16x32xf32>
    %64 = vector.extract_strided_slice %62 {offsets = [0, 16, 0], sizes = [22, 16, 32], strides = [1, 1, 1]} : vector<22x32x32xf32> to vector<22x16x32xf32>
    %65 = arith.maximumf %63, %64 : vector<22x16x32xf32>
    %66 = arith.truncf %65 : vector<22x16x32xf32> to vector<22x16x32xbf16>
    %cst_56 = arith.constant 0.000000e+00 : f32
    %67 = vector.broadcast %cst_56 : f32 to vector<16x128xf32>
    %68 = vector.extract_strided_slice %66 {offsets = [0, 0, 0], sizes = [1, 16, 32], strides = [1, 1, 1]} : vector<22x16x32xbf16> to vector<1x16x32xbf16>
    %69 = vector.shape_cast %68 : vector<1x16x32xbf16> to vector<16x32xbf16>
    %c0_57 = arith.constant 0 : index
    %c0_58 = arith.constant 0 : index
    %c0_59 = arith.constant 0 : index
    %70 = vector.load %arg6[%c0_57, %c0_58, %c0_59] : memref<22x32x128xbf16, #tpu.memory_space<vmem>>, vector<1x32x128xbf16>
    %71 = vector.shape_cast %70 : vector<1x32x128xbf16> to vector<32x128xbf16>
    %cst_60 = arith.constant dense<0.000000e+00> : vector<16x128xf32>
    %72 = tpu.matmul %69, %71, %cst_60 {dimension_numbers = #tpu.dot_dimension_numbers<[1], [0], [0], [1], [0, 0, 1, 1], [], []>} : vector<16x32xbf16>, vector<32x128xbf16>, vector<16x128xf32> -> vector<16x128xf32>
    %73 = arith.addf %67, %72 : vector<16x128xf32>
    %74 = vector.extract_strided_slice %66 {offsets = [1, 0, 0], sizes = [1, 16, 32], strides = [1, 1, 1]} : vector<22x16x32xbf16> to vector<1x16x32xbf16>
    %75 = vector.shape_cast %74 : vector<1x16x32xbf16> to vector<16x32xbf16>
    %c1_61 = arith.constant 1 : index
    %c0_62 = arith.constant 0 : index
    %c0_63 = arith.constant 0 : index
    %76 = vector.load %arg6[%c1_61, %c0_62, %c0_63] : memref<22x32x128xbf16, #tpu.memory_space<vmem>>, vector<1x32x128xbf16>
    %77 = vector.shape_cast %76 : vector<1x32x128xbf16> to vector<32x128xbf16>
    %cst_64 = arith.constant dense<0.000000e+00> : vector<16x128xf32>
    %78 = tpu.matmul %75, %77, %cst_64 {dimension_numbers = #tpu.dot_dimension_numbers<[1], [0], [0], [1], [0, 0, 1, 1], [], []>} : vector<16x32xbf16>, vector<32x128xbf16>, vector<16x128xf32> -> vector<16x128xf32>
    %79 = arith.addf %73, %78 : vector<16x128xf32>
    %80 = vector.extract_strided_slice %66 {offsets = [2, 0, 0], sizes = [1, 16, 32], strides = [1, 1, 1]} : vector<22x16x32xbf16> to vector<1x16x32xbf16>
    %81 = vector.shape_cast %80 : vector<1x16x32xbf16> to vector<16x32xbf16>
    %c2_65 = arith.constant 2 : index
    %c0_66 = arith.constant 0 : index
    %c0_67 = arith.constant 0 : index
    %82 = vector.load %arg6[%c2_65, %c0_66, %c0_67] : memref<22x32x128xbf16, #tpu.memory_space<vmem>>, vector<1x32x128xbf16>
    %83 = vector.shape_cast %82 : vector<1x32x128xbf16> to vector<32x128xbf16>
    %cst_68 = arith.constant dense<0.000000e+00> : vector<16x128xf32>
    %84 = tpu.matmul %81, %83, %cst_68 {dimension_numbers = #tpu.dot_dimension_numbers<[1], [0], [0], [1], [0, 0, 1, 1], [], []>} : vector<16x32xbf16>, vector<32x128xbf16>, vector<16x128xf32> -> vector<16x128xf32>
    %85 = arith.addf %79, %84 : vector<16x128xf32>
    %86 = vector.extract_strided_slice %66 {offsets = [3, 0, 0], sizes = [1, 16, 32], strides = [1, 1, 1]} : vector<22x16x32xbf16> to vector<1x16x32xbf16>
    %87 = vector.shape_cast %86 : vector<1x16x32xbf16> to vector<16x32xbf16>
    %c3 = arith.constant 3 : index
    %c0_69 = arith.constant 0 : index
    %c0_70 = arith.constant 0 : index
    %88 = vector.load %arg6[%c3, %c0_69, %c0_70] : memref<22x32x128xbf16, #tpu.memory_space<vmem>>, vector<1x32x128xbf16>
    %89 = vector.shape_cast %88 : vector<1x32x128xbf16> to vector<32x128xbf16>
    %cst_71 = arith.constant dense<0.000000e+00> : vector<16x128xf32>
    %90 = tpu.matmul %87, %89, %cst_71 {dimension_numbers = #tpu.dot_dimension_numbers<[1], [0], [0], [1], [0, 0, 1, 1], [], []>} : vector<16x32xbf16>, vector<32x128xbf16>, vector<16x128xf32> -> vector<16x128xf32>
    %91 = arith.addf %85, %90 : vector<16x128xf32>
    %92 = vector.extract_strided_slice %66 {offsets = [4, 0, 0], sizes = [1, 16, 32], strides = [1, 1, 1]} : vector<22x16x32xbf16> to vector<1x16x32xbf16>
    %93 = vector.shape_cast %92 : vector<1x16x32xbf16> to vector<16x32xbf16>
    %c4 = arith.constant 4 : index
    %c0_72 = arith.constant 0 : index
    %c0_73 = arith.constant 0 : index
    %94 = vector.load %arg6[%c4, %c0_72, %c0_73] : memref<22x32x128xbf16, #tpu.memory_space<vmem>>, vector<1x32x128xbf16>
    %95 = vector.shape_cast %94 : vector<1x32x128xbf16> to vector<32x128xbf16>
    %cst_74 = arith.constant dense<0.000000e+00> : vector<16x128xf32>
    %96 = tpu.matmul %93, %95, %cst_74 {dimension_numbers = #tpu.dot_dimension_numbers<[1], [0], [0], [1], [0, 0, 1, 1], [], []>} : vector<16x32xbf16>, vector<32x128xbf16>, vector<16x128xf32> -> vector<16x128xf32>
    %97 = arith.addf %91, %96 : vector<16x128xf32>
    %98 = vector.extract_strided_slice %66 {offsets = [5, 0, 0], sizes = [1, 16, 32], strides = [1, 1, 1]} : vector<22x16x32xbf16> to vector<1x16x32xbf16>
    %99 = vector.shape_cast %98 : vector<1x16x32xbf16> to vector<16x32xbf16>
    %c5 = arith.constant 5 : index
    %c0_75 = arith.constant 0 : index
    %c0_76 = arith.constant 0 : index
    %100 = vector.load %arg6[%c5, %c0_75, %c0_76] : memref<22x32x128xbf16, #tpu.memory_space<vmem>>, vector<1x32x128xbf16>
    %101 = vector.shape_cast %100 : vector<1x32x128xbf16> to vector<32x128xbf16>
    %cst_77 = arith.constant dense<0.000000e+00> : vector<16x128xf32>
    %102 = tpu.matmul %99, %101, %cst_77 {dimension_numbers = #tpu.dot_dimension_numbers<[1], [0], [0], [1], [0, 0, 1, 1], [], []>} : vector<16x32xbf16>, vector<32x128xbf16>, vector<16x128xf32> -> vector<16x128xf32>
    %103 = arith.addf %97, %102 : vector<16x128xf32>
    %104 = vector.extract_strided_slice %66 {offsets = [6, 0, 0], sizes = [1, 16, 32], strides = [1, 1, 1]} : vector<22x16x32xbf16> to vector<1x16x32xbf16>
    %105 = vector.shape_cast %104 : vector<1x16x32xbf16> to vector<16x32xbf16>
    %c6 = arith.constant 6 : index
    %c0_78 = arith.constant 0 : index
    %c0_79 = arith.constant 0 : index
    %106 = vector.load %arg6[%c6, %c0_78, %c0_79] : memref<22x32x128xbf16, #tpu.memory_space<vmem>>, vector<1x32x128xbf16>
    %107 = vector.shape_cast %106 : vector<1x32x128xbf16> to vector<32x128xbf16>
    %cst_80 = arith.constant dense<0.000000e+00> : vector<16x128xf32>
    %108 = tpu.matmul %105, %107, %cst_80 {dimension_numbers = #tpu.dot_dimension_numbers<[1], [0], [0], [1], [0, 0, 1, 1], [], []>} : vector<16x32xbf16>, vector<32x128xbf16>, vector<16x128xf32> -> vector<16x128xf32>
    %109 = arith.addf %103, %108 : vector<16x128xf32>
    %110 = vector.extract_strided_slice %66 {offsets = [7, 0, 0], sizes = [1, 16, 32], strides = [1, 1, 1]} : vector<22x16x32xbf16> to vector<1x16x32xbf16>
    %111 = vector.shape_cast %110 : vector<1x16x32xbf16> to vector<16x32xbf16>
    %c7 = arith.constant 7 : index
    %c0_81 = arith.constant 0 : index
    %c0_82 = arith.constant 0 : index
    %112 = vector.load %arg6[%c7, %c0_81, %c0_82] : memref<22x32x128xbf16, #tpu.memory_space<vmem>>, vector<1x32x128xbf16>
    %113 = vector.shape_cast %112 : vector<1x32x128xbf16> to vector<32x128xbf16>
    %cst_83 = arith.constant dense<0.000000e+00> : vector<16x128xf32>
    %114 = tpu.matmul %111, %113, %cst_83 {dimension_numbers = #tpu.dot_dimension_numbers<[1], [0], [0], [1], [0, 0, 1, 1], [], []>} : vector<16x32xbf16>, vector<32x128xbf16>, vector<16x128xf32> -> vector<16x128xf32>
    %115 = arith.addf %109, %114 : vector<16x128xf32>
    %116 = vector.extract_strided_slice %66 {offsets = [8, 0, 0], sizes = [1, 16, 32], strides = [1, 1, 1]} : vector<22x16x32xbf16> to vector<1x16x32xbf16>
    %117 = vector.shape_cast %116 : vector<1x16x32xbf16> to vector<16x32xbf16>
    %c8 = arith.constant 8 : index
    %c0_84 = arith.constant 0 : index
    %c0_85 = arith.constant 0 : index
    %118 = vector.load %arg6[%c8, %c0_84, %c0_85] : memref<22x32x128xbf16, #tpu.memory_space<vmem>>, vector<1x32x128xbf16>
    %119 = vector.shape_cast %118 : vector<1x32x128xbf16> to vector<32x128xbf16>
    %cst_86 = arith.constant dense<0.000000e+00> : vector<16x128xf32>
    %120 = tpu.matmul %117, %119, %cst_86 {dimension_numbers = #tpu.dot_dimension_numbers<[1], [0], [0], [1], [0, 0, 1, 1], [], []>} : vector<16x32xbf16>, vector<32x128xbf16>, vector<16x128xf32> -> vector<16x128xf32>
    %121 = arith.addf %115, %120 : vector<16x128xf32>
    %122 = vector.extract_strided_slice %66 {offsets = [9, 0, 0], sizes = [1, 16, 32], strides = [1, 1, 1]} : vector<22x16x32xbf16> to vector<1x16x32xbf16>
    %123 = vector.shape_cast %122 : vector<1x16x32xbf16> to vector<16x32xbf16>
    %c9 = arith.constant 9 : index
    %c0_87 = arith.constant 0 : index
    %c0_88 = arith.constant 0 : index
    %124 = vector.load %arg6[%c9, %c0_87, %c0_88] : memref<22x32x128xbf16, #tpu.memory_space<vmem>>, vector<1x32x128xbf16>
    %125 = vector.shape_cast %124 : vector<1x32x128xbf16> to vector<32x128xbf16>
    %cst_89 = arith.constant dense<0.000000e+00> : vector<16x128xf32>
    %126 = tpu.matmul %123, %125, %cst_89 {dimension_numbers = #tpu.dot_dimension_numbers<[1], [0], [0], [1], [0, 0, 1, 1], [], []>} : vector<16x32xbf16>, vector<32x128xbf16>, vector<16x128xf32> -> vector<16x128xf32>
    %127 = arith.addf %121, %126 : vector<16x128xf32>
    %128 = vector.extract_strided_slice %66 {offsets = [10, 0, 0], sizes = [1, 16, 32], strides = [1, 1, 1]} : vector<22x16x32xbf16> to vector<1x16x32xbf16>
    %129 = vector.shape_cast %128 : vector<1x16x32xbf16> to vector<16x32xbf16>
    %c10 = arith.constant 10 : index
    %c0_90 = arith.constant 0 : index
    %c0_91 = arith.constant 0 : index
    %130 = vector.load %arg6[%c10, %c0_90, %c0_91] : memref<22x32x128xbf16, #tpu.memory_space<vmem>>, vector<1x32x128xbf16>
    %131 = vector.shape_cast %130 : vector<1x32x128xbf16> to vector<32x128xbf16>
    %cst_92 = arith.constant dense<0.000000e+00> : vector<16x128xf32>
    %132 = tpu.matmul %129, %131, %cst_92 {dimension_numbers = #tpu.dot_dimension_numbers<[1], [0], [0], [1], [0, 0, 1, 1], [], []>} : vector<16x32xbf16>, vector<32x128xbf16>, vector<16x128xf32> -> vector<16x128xf32>
    %133 = arith.addf %127, %132 : vector<16x128xf32>
    %134 = vector.extract_strided_slice %66 {offsets = [11, 0, 0], sizes = [1, 16, 32], strides = [1, 1, 1]} : vector<22x16x32xbf16> to vector<1x16x32xbf16>
    %135 = vector.shape_cast %134 : vector<1x16x32xbf16> to vector<16x32xbf16>
    %c11 = arith.constant 11 : index
    %c0_93 = arith.constant 0 : index
    %c0_94 = arith.constant 0 : index
    %136 = vector.load %arg6[%c11, %c0_93, %c0_94] : memref<22x32x128xbf16, #tpu.memory_space<vmem>>, vector<1x32x128xbf16>
    %137 = vector.shape_cast %136 : vector<1x32x128xbf16> to vector<32x128xbf16>
    %cst_95 = arith.constant dense<0.000000e+00> : vector<16x128xf32>
    %138 = tpu.matmul %135, %137, %cst_95 {dimension_numbers = #tpu.dot_dimension_numbers<[1], [0], [0], [1], [0, 0, 1, 1], [], []>} : vector<16x32xbf16>, vector<32x128xbf16>, vector<16x128xf32> -> vector<16x128xf32>
    %139 = arith.addf %133, %138 : vector<16x128xf32>
    %140 = vector.extract_strided_slice %66 {offsets = [12, 0, 0], sizes = [1, 16, 32], strides = [1, 1, 1]} : vector<22x16x32xbf16> to vector<1x16x32xbf16>
    %141 = vector.shape_cast %140 : vector<1x16x32xbf16> to vector<16x32xbf16>
    %c12 = arith.constant 12 : index
    %c0_96 = arith.constant 0 : index
    %c0_97 = arith.constant 0 : index
    %142 = vector.load %arg6[%c12, %c0_96, %c0_97] : memref<22x32x128xbf16, #tpu.memory_space<vmem>>, vector<1x32x128xbf16>
    %143 = vector.shape_cast %142 : vector<1x32x128xbf16> to vector<32x128xbf16>
    %cst_98 = arith.constant dense<0.000000e+00> : vector<16x128xf32>
    %144 = tpu.matmul %141, %143, %cst_98 {dimension_numbers = #tpu.dot_dimension_numbers<[1], [0], [0], [1], [0, 0, 1, 1], [], []>} : vector<16x32xbf16>, vector<32x128xbf16>, vector<16x128xf32> -> vector<16x128xf32>
    %145 = arith.addf %139, %144 : vector<16x128xf32>
    %146 = vector.extract_strided_slice %66 {offsets = [13, 0, 0], sizes = [1, 16, 32], strides = [1, 1, 1]} : vector<22x16x32xbf16> to vector<1x16x32xbf16>
    %147 = vector.shape_cast %146 : vector<1x16x32xbf16> to vector<16x32xbf16>
    %c13 = arith.constant 13 : index
    %c0_99 = arith.constant 0 : index
    %c0_100 = arith.constant 0 : index
    %148 = vector.load %arg6[%c13, %c0_99, %c0_100] : memref<22x32x128xbf16, #tpu.memory_space<vmem>>, vector<1x32x128xbf16>
    %149 = vector.shape_cast %148 : vector<1x32x128xbf16> to vector<32x128xbf16>
    %cst_101 = arith.constant dense<0.000000e+00> : vector<16x128xf32>
    %150 = tpu.matmul %147, %149, %cst_101 {dimension_numbers = #tpu.dot_dimension_numbers<[1], [0], [0], [1], [0, 0, 1, 1], [], []>} : vector<16x32xbf16>, vector<32x128xbf16>, vector<16x128xf32> -> vector<16x128xf32>
    %151 = arith.addf %145, %150 : vector<16x128xf32>
    %152 = vector.extract_strided_slice %66 {offsets = [14, 0, 0], sizes = [1, 16, 32], strides = [1, 1, 1]} : vector<22x16x32xbf16> to vector<1x16x32xbf16>
    %153 = vector.shape_cast %152 : vector<1x16x32xbf16> to vector<16x32xbf16>
    %c14 = arith.constant 14 : index
    %c0_102 = arith.constant 0 : index
    %c0_103 = arith.constant 0 : index
    %154 = vector.load %arg6[%c14, %c0_102, %c0_103] : memref<22x32x128xbf16, #tpu.memory_space<vmem>>, vector<1x32x128xbf16>
    %155 = vector.shape_cast %154 : vector<1x32x128xbf16> to vector<32x128xbf16>
    %cst_104 = arith.constant dense<0.000000e+00> : vector<16x128xf32>
    %156 = tpu.matmul %153, %155, %cst_104 {dimension_numbers = #tpu.dot_dimension_numbers<[1], [0], [0], [1], [0, 0, 1, 1], [], []>} : vector<16x32xbf16>, vector<32x128xbf16>, vector<16x128xf32> -> vector<16x128xf32>
    %157 = arith.addf %151, %156 : vector<16x128xf32>
    %158 = vector.extract_strided_slice %66 {offsets = [15, 0, 0], sizes = [1, 16, 32], strides = [1, 1, 1]} : vector<22x16x32xbf16> to vector<1x16x32xbf16>
    %159 = vector.shape_cast %158 : vector<1x16x32xbf16> to vector<16x32xbf16>
    %c15 = arith.constant 15 : index
    %c0_105 = arith.constant 0 : index
    %c0_106 = arith.constant 0 : index
    %160 = vector.load %arg6[%c15, %c0_105, %c0_106] : memref<22x32x128xbf16, #tpu.memory_space<vmem>>, vector<1x32x128xbf16>
    %161 = vector.shape_cast %160 : vector<1x32x128xbf16> to vector<32x128xbf16>
    %cst_107 = arith.constant dense<0.000000e+00> : vector<16x128xf32>
    %162 = tpu.matmul %159, %161, %cst_107 {dimension_numbers = #tpu.dot_dimension_numbers<[1], [0], [0], [1], [0, 0, 1, 1], [], []>} : vector<16x32xbf16>, vector<32x128xbf16>, vector<16x128xf32> -> vector<16x128xf32>
    %163 = arith.addf %157, %162 : vector<16x128xf32>
    %164 = vector.extract_strided_slice %66 {offsets = [16, 0, 0], sizes = [1, 16, 32], strides = [1, 1, 1]} : vector<22x16x32xbf16> to vector<1x16x32xbf16>
    %165 = vector.shape_cast %164 : vector<1x16x32xbf16> to vector<16x32xbf16>
    %c16 = arith.constant 16 : index
    %c0_108 = arith.constant 0 : index
    %c0_109 = arith.constant 0 : index
    %166 = vector.load %arg6[%c16, %c0_108, %c0_109] : memref<22x32x128xbf16, #tpu.memory_space<vmem>>, vector<1x32x128xbf16>
    %167 = vector.shape_cast %166 : vector<1x32x128xbf16> to vector<32x128xbf16>
    %cst_110 = arith.constant dense<0.000000e+00> : vector<16x128xf32>
    %168 = tpu.matmul %165, %167, %cst_110 {dimension_numbers = #tpu.dot_dimension_numbers<[1], [0], [0], [1], [0, 0, 1, 1], [], []>} : vector<16x32xbf16>, vector<32x128xbf16>, vector<16x128xf32> -> vector<16x128xf32>
    %169 = arith.addf %163, %168 : vector<16x128xf32>
    %170 = vector.extract_strided_slice %66 {offsets = [17, 0, 0], sizes = [1, 16, 32], strides = [1, 1, 1]} : vector<22x16x32xbf16> to vector<1x16x32xbf16>
    %171 = vector.shape_cast %170 : vector<1x16x32xbf16> to vector<16x32xbf16>
    %c17 = arith.constant 17 : index
    %c0_111 = arith.constant 0 : index
    %c0_112 = arith.constant 0 : index
    %172 = vector.load %arg6[%c17, %c0_111, %c0_112] : memref<22x32x128xbf16, #tpu.memory_space<vmem>>, vector<1x32x128xbf16>
    %173 = vector.shape_cast %172 : vector<1x32x128xbf16> to vector<32x128xbf16>
    %cst_113 = arith.constant dense<0.000000e+00> : vector<16x128xf32>
    %174 = tpu.matmul %171, %173, %cst_113 {dimension_numbers = #tpu.dot_dimension_numbers<[1], [0], [0], [1], [0, 0, 1, 1], [], []>} : vector<16x32xbf16>, vector<32x128xbf16>, vector<16x128xf32> -> vector<16x128xf32>
    %175 = arith.addf %169, %174 : vector<16x128xf32>
    %176 = vector.extract_strided_slice %66 {offsets = [18, 0, 0], sizes = [1, 16, 32], strides = [1, 1, 1]} : vector<22x16x32xbf16> to vector<1x16x32xbf16>
    %177 = vector.shape_cast %176 : vector<1x16x32xbf16> to vector<16x32xbf16>
    %c18 = arith.constant 18 : index
    %c0_114 = arith.constant 0 : index
    %c0_115 = arith.constant 0 : index
    %178 = vector.load %arg6[%c18, %c0_114, %c0_115] : memref<22x32x128xbf16, #tpu.memory_space<vmem>>, vector<1x32x128xbf16>
    %179 = vector.shape_cast %178 : vector<1x32x128xbf16> to vector<32x128xbf16>
    %cst_116 = arith.constant dense<0.000000e+00> : vector<16x128xf32>
    %180 = tpu.matmul %177, %179, %cst_116 {dimension_numbers = #tpu.dot_dimension_numbers<[1], [0], [0], [1], [0, 0, 1, 1], [], []>} : vector<16x32xbf16>, vector<32x128xbf16>, vector<16x128xf32> -> vector<16x128xf32>
    %181 = arith.addf %175, %180 : vector<16x128xf32>
    %182 = vector.extract_strided_slice %66 {offsets = [19, 0, 0], sizes = [1, 16, 32], strides = [1, 1, 1]} : vector<22x16x32xbf16> to vector<1x16x32xbf16>
    %183 = vector.shape_cast %182 : vector<1x16x32xbf16> to vector<16x32xbf16>
    %c19 = arith.constant 19 : index
    %c0_117 = arith.constant 0 : index
    %c0_118 = arith.constant 0 : index
    %184 = vector.load %arg6[%c19, %c0_117, %c0_118] : memref<22x32x128xbf16, #tpu.memory_space<vmem>>, vector<1x32x128xbf16>
    %185 = vector.shape_cast %184 : vector<1x32x128xbf16> to vector<32x128xbf16>
    %cst_119 = arith.constant dense<0.000000e+00> : vector<16x128xf32>
    %186 = tpu.matmul %183, %185, %cst_119 {dimension_numbers = #tpu.dot_dimension_numbers<[1], [0], [0], [1], [0, 0, 1, 1], [], []>} : vector<16x32xbf16>, vector<32x128xbf16>, vector<16x128xf32> -> vector<16x128xf32>
    %187 = arith.addf %181, %186 : vector<16x128xf32>
    %188 = vector.extract_strided_slice %66 {offsets = [20, 0, 0], sizes = [1, 16, 32], strides = [1, 1, 1]} : vector<22x16x32xbf16> to vector<1x16x32xbf16>
    %189 = vector.shape_cast %188 : vector<1x16x32xbf16> to vector<16x32xbf16>
    %c20 = arith.constant 20 : index
    %c0_120 = arith.constant 0 : index
    %c0_121 = arith.constant 0 : index
    %190 = vector.load %arg6[%c20, %c0_120, %c0_121] : memref<22x32x128xbf16, #tpu.memory_space<vmem>>, vector<1x32x128xbf16>
    %191 = vector.shape_cast %190 : vector<1x32x128xbf16> to vector<32x128xbf16>
    %cst_122 = arith.constant dense<0.000000e+00> : vector<16x128xf32>
    %192 = tpu.matmul %189, %191, %cst_122 {dimension_numbers = #tpu.dot_dimension_numbers<[1], [0], [0], [1], [0, 0, 1, 1], [], []>} : vector<16x32xbf16>, vector<32x128xbf16>, vector<16x128xf32> -> vector<16x128xf32>
    %193 = arith.addf %187, %192 : vector<16x128xf32>
    %194 = vector.extract_strided_slice %66 {offsets = [21, 0, 0], sizes = [1, 16, 32], strides = [1, 1, 1]} : vector<22x16x32xbf16> to vector<1x16x32xbf16>
    %195 = vector.shape_cast %194 : vector<1x16x32xbf16> to vector<16x32xbf16>
    %c21 = arith.constant 21 : index
    %c0_123 = arith.constant 0 : index
    %c0_124 = arith.constant 0 : index
    %196 = vector.load %arg6[%c21, %c0_123, %c0_124] : memref<22x32x128xbf16, #tpu.memory_space<vmem>>, vector<1x32x128xbf16>
    %197 = vector.shape_cast %196 : vector<1x32x128xbf16> to vector<32x128xbf16>
    %cst_125 = arith.constant dense<0.000000e+00> : vector<16x128xf32>
    %198 = tpu.matmul %195, %197, %cst_125 {dimension_numbers = #tpu.dot_dimension_numbers<[1], [0], [0], [1], [0, 0, 1, 1], [], []>} : vector<16x32xbf16>, vector<32x128xbf16>, vector<16x128xf32> -> vector<16x128xf32>
    %199 = arith.addf %193, %198 : vector<16x128xf32>
    %c0_126 = arith.constant 0 : index
    %c0_127 = arith.constant 0 : index
    %200 = vector.load %arg7[%c0_126, %c0_127] : memref<1x128xf32, #tpu.memory_space<vmem>>, vector<1x128xf32>
    %201 = vector.broadcast %200 : vector<1x128xf32> to vector<16x128xf32>
    %202 = arith.addf %199, %201 : vector<16x128xf32>
    %cst_128 = arith.constant 0.000000e+00 : f32
    %203 = vector.broadcast %cst_128 : f32 to vector<16x128xf32>
    %204 = arith.maximumf %202, %203 : vector<16x128xf32>
    %205 = arith.truncf %204 : vector<16x128xf32> to vector<16x128xbf16>
    %c0_129 = arith.constant 0 : index
    %c0_130 = arith.constant 0 : index
    %206 = vector.load %arg8[%c0_129, %c0_130] : memref<128x128xbf16, #tpu.memory_space<vmem>>, vector<128x128xbf16>
    %cst_131 = arith.constant dense<0.000000e+00> : vector<16x128xf32>
    %207 = tpu.matmul %205, %206, %cst_131 {dimension_numbers = #tpu.dot_dimension_numbers<[1], [0], [0], [1], [0, 0, 1, 1], [], []>} : vector<16x128xbf16>, vector<128x128xbf16>, vector<16x128xf32> -> vector<16x128xf32>
    %c0_132 = arith.constant 0 : index
    %c0_133 = arith.constant 0 : index
    %208 = vector.load %arg9[%c0_132, %c0_133] : memref<1x128xf32, #tpu.memory_space<vmem>>, vector<1x128xf32>
    %209 = vector.broadcast %208 : vector<1x128xf32> to vector<16x128xf32>
    %210 = arith.addf %207, %209 : vector<16x128xf32>
    %c0_134 = arith.constant 0 : index
    %c0_135 = arith.constant 0 : index
    %211 = vector.load %arg10[%c0_134, %c0_135] : memref<16x128xf32, #tpu.memory_space<vmem>>, vector<16x128xf32>
    tpu.vector_store %arg10[%c0_134, %c0_135], %210 {strides = array<i32>} : memref<16x128xf32, #tpu.memory_space<vmem>>, vector<16x128xf32>,
    return
  }
  func.func @transform_0(%arg0: i32) -> (i32, i32, i32) {
    %c0_i32 = arith.constant 0 : i32
    %c0_i32_0 = arith.constant 0 : i32
    %c0_i32_1 = arith.constant 0 : i32
    return %c0_i32, %arg0, %c0_i32_0 : i32, i32, i32
  }
  func.func @transform_1(%arg0: i32) -> (i32, i32, i32) {
    %c0_i32 = arith.constant 0 : i32
    %c0_i32_0 = arith.constant 0 : i32
    %c0_i32_1 = arith.constant 0 : i32
    %c0_i32_2 = arith.constant 0 : i32
    return %c0_i32, %c0_i32_0, %c0_i32_1 : i32, i32, i32
  }
  func.func @transform_2(%arg0: i32) -> (i32, i32) {
    %c0_i32 = arith.constant 0 : i32
    %c0_i32_0 = arith.constant 0 : i32
    %c0_i32_1 = arith.constant 0 : i32
    return %c0_i32, %c0_i32_0 : i32, i32
  }
  func.func @transform_3(%arg0: i32) -> (i32, i32, i32) {
    %c0_i32 = arith.constant 0 : i32
    %c0_i32_0 = arith.constant 0 : i32
    %c0_i32_1 = arith.constant 0 : i32
    %c0_i32_2 = arith.constant 0 : i32
    return %c0_i32, %c0_i32_0, %c0_i32_1 : i32, i32, i32
  }
  func.func @transform_4(%arg0: i32) -> (i32, i32) {
    %c0_i32 = arith.constant 0 : i32
    %c0_i32_0 = arith.constant 0 : i32
    %c0_i32_1 = arith.constant 0 : i32
    return %c0_i32, %c0_i32_0 : i32, i32
  }
  func.func @transform_5(%arg0: i32) -> (i32, i32, i32) {
    %c0_i32 = arith.constant 0 : i32
    %c0_i32_0 = arith.constant 0 : i32
    %c0_i32_1 = arith.constant 0 : i32
    %c0_i32_2 = arith.constant 0 : i32
    return %c0_i32, %c0_i32_0, %c0_i32_1 : i32, i32, i32
  }
  func.func @transform_6(%arg0: i32) -> (i32, i32) {
    %c0_i32 = arith.constant 0 : i32
    %c0_i32_0 = arith.constant 0 : i32
    %c0_i32_1 = arith.constant 0 : i32
    return %c0_i32, %c0_i32_0 : i32, i32
  }
  func.func @transform_7(%arg0: i32) -> (i32, i32) {
    %c0_i32 = arith.constant 0 : i32
    %c0_i32_0 = arith.constant 0 : i32
    %c0_i32_1 = arith.constant 0 : i32
    return %c0_i32, %c0_i32_0 : i32, i32
  }
  func.func @transform_8(%arg0: i32) -> (i32, i32) {
    %c0_i32 = arith.constant 0 : i32
    %c0_i32_0 = arith.constant 0 : i32
    %c0_i32_1 = arith.constant 0 : i32
    return %c0_i32, %c0_i32_0 : i32, i32
  }
  func.func @transform_9(%arg0: i32) -> (i32, i32) {
    %c0_i32 = arith.constant 0 : i32
    %c0_i32_0 = arith.constant 0 : i32
    return %arg0, %c0_i32 : i32, i32
  }
}

</mosaic_0001>

<bundles_post_ra>
// kernel: lidar_cnn_forward.1
= control target key start
LH: loop header
LB: loop body
LE: loop exit
PB: predicated region body
PF: predicated region fallthrough
CT: control target
= control target key end

     0   :  { %vm1094_vm0 = vcmask 1040384   ;;  %vm1095_vm1 = vcmask 1041408   ;;  %vm829_vm2 = vcmask 23552   ;;  %v12694_v1 = vmov 65535   ;;  %s14958_s1 = inlined_call_operand.vmem [shape: bf16[3,3,16], index: 1, kind: input, shape index: {}]   ;;  %s14959_s0 = inlined_call_operand.vmem [shape: bf16[90,16,3], index: 0, kind: input, shape index: {}]   ;;  %s14960_s3 = inlined_call_operand.vmem [shape: bf16[3,16,32], index: 3, kind: input, shape index: {}]   ;;  %s14961_s2 = inlined_call_operand.vmem [shape: f32[1,16], index: 2, kind: input, shape index: {}]   ;;  %s14962_s5 = inlined_call_operand.vmem [shape: bf16[22,32,128], index: 5, kind: input, shape index: {}]   ;;  %s14963_s4 = inlined_call_operand.vmem [shape: f32[1,32], index: 4, kind: input, shape index: {}]   ;;  %s14964_s7 = inlined_call_operand.vmem [shape: bf16[128,128], index: 7, kind: input, shape index: {}]   ;;  %s14965_s6 = inlined_call_operand.vmem [shape: f32[1,128], index: 6, kind: input, shape index: {}]   ;;  %s14966_s8 = inlined_call_operand.vmem [shape: f32[1,128], index: 8, kind: input, shape index: {}]   ;;  %s14967_s9 = inlined_call_operand.vmem [shape: f32[16,128], index: 9, kind: output, shape index: {}]  }
   0x1   :  { %v9356_v0 = vld [vmem:[%s14958_s1 + $0x2] sm:$0x3]  ;;  %v1096_v2 = vsel %vm1094_vm0, 4294967295, %v12694_v1  ;;  %v12374_v3 = vld [vmem:[%s14959_s0 + $0x8] sm:$0xff]   ;;  %v209_v6 = vld [vmem:[%s14958_s1] sm:$0x3] }
   0x2   :  { %v1097_v4 = vsel %vm1095_vm1, %v1096_v2, 0  ;;  %10842 = vmatprep.mubr.msk.bf16.mxu0 %vm829_vm2, %v12374_v3  ;;  %v12375_v8 = vld [vmem:[%s14959_s0 + $0x10] sm:$0xff]   ;;  %v12376_v9 = vld [vmem:[%s14959_s0 + $0x18] sm:$0xff]   ;;  %v12377_v10 = vld [vmem:[%s14959_s0 + $0x20] sm:$0xff]   ;;  %vm5528_vm3 = vcmask 130048   ;;  %vm12697_vm4 = vmmov 0  }
   0x3   :  { %v1099_v5 = vand.u32 %v9356_v0, %v1097_v4  ;;  %v2543_v7 = vand.u32 %v1097_v4, %v209_v6  ;;  %v12378_v11 = vld [vmem:[%s14959_s0 + $0x28] sm:$0xff]   ;;  %v12379_v12 = vld [vmem:[%s14959_s0 + $0x30] sm:$0xff]   ;;  %v12380_v13 = vld [vmem:[%s14959_s0 + $0x38] sm:$0xff]   ;;  %vm7689_vm5 = vcmask 261120  }
   0x4   :  { %v12381_v14 = vld [vmem:[%s14959_s0 + $0x40] sm:$0xff]   ;;  %v12382_v15 = vld [vmem:[%s14959_s0 + $0x48] sm:$0xff]   ;;  %v12383_v16 = vld [vmem:[%s14959_s0 + $0x50] sm:$0xff]  }
   0x5   :  { %10840 = vmatprep.subr.bf16.mxu0 %v1099_v5  ;;  %11840 = vmatprep.subr.bf16.mxu1 %v1099_v5  ;;  %v12384_v17 = vld [vmem:[%s14959_s0 + $0x58] sm:$0xff]   ;;  %v12385_v18 = vld [vmem:[%s14959_s0 + $0x60] sm:$0xff]   ;;  %v12386_v19 = vld [vmem:[%s14959_s0 + $0x68] sm:$0xff]  }
   0x6   :  { %10841 = vmatpush3.bf16.msra.mxu0 %v1099_v5  ;;  %11841 = vmatpush3.bf16.msra.mxu1 %v1099_v5  ;;  %v12387_v20 = vld [vmem:[%s14959_s0 + $0x70] sm:$0xff]   ;;  %v12388_v21 = vld [vmem:[%s14959_s0 + $0x78] sm:$0xff]   ;;  %v12389_v22 = vld [vmem:[%s14959_s0 + $0x80] sm:$0xff]  }
   0x7   :  { %11018 = vmatprep.subr.bf16.mxu0 %v2543_v7  ;;  %v12390_v23 = vld [vmem:[%s14959_s0 + $0x88] sm:$0xff]   ;;  %v12391_v24 = vld [vmem:[%s14959_s0 + $0x90] sm:$0xff]   ;;  %v12392_v25 = vld [vmem:[%s14959_s0 + $0x98] sm:$0xff]  }
   0x8   :  { %v9885_v26 = vld [vmem:[%s14958_s1 + $0x4] sm:$0x3]  ;;  %v12394_v29 = vld [vmem:[%s14959_s0 + $0xa8] sm:$0xff]   ;;  %v12395_v30 = vld [vmem:[%s14959_s0 + $0xb0] sm:$0xff]  }
   0x9   :  { %10843 = vmatmul.mubr.msk.bf16.vlgmr.msra.gmra.mrb[0].mxu0 %vm829_vm2, %v12375_v8  ;;  %v12833_v27 = vand.u32 %v9885_v26, %v1097_v4  ;;  %v12393_v28 = vld [vmem:[%s14959_s0 + $0xa0] sm:$0xff]   ;;  %v12396_v31 = vld [vmem:[%s14959_s0 + $0xb8] sm:$0xff]   ;;  %v12398_v33 = vld [vmem:[%s14959_s0 + $0xc8] sm:$0xff]  }
   0xa   :  { %11019 = vmatpush3.bf16.msra.mxu0 %v2543_v7  ;;  %10846 = vmatprep.mubr.msk.bf16.mxu0 %vm829_vm2, %v12376_v9  ;;  %v12397_v32 = vld [vmem:[%s14959_s0 + $0xc0] sm:$0xff]   ;;  %v12399_v34 = vld [vmem:[%s14959_s0 + $0xd0] sm:$0xff]   ;;  %v12400_v35 = vld [vmem:[%s14959_s0 + $0xd8] sm:$0xff]  }
   0xb   :  { %11196 = vmatprep.subr.bf16.mxu0 %v12833_v27  ;;  %v12401_v36 = vld [vmem:[%s14959_s0 + $0xe0] sm:$0xff]   ;;  %v12402_v37 = vld [vmem:[%s14959_s0 + $0xe8] sm:$0xff]   ;;  %v12403_v38 = vld [vmem:[%s14959_s0 + $0xf0] sm:$0xff]  }
   0xc   :  { %v12404_v39 = vld [vmem:[%s14959_s0 + $0xf8] sm:$0xff]   ;;  %v12405_v40 = vld [vmem:[%s14959_s0 + $0x100] sm:$0xff]   ;;  %v12406_v41 = vld [vmem:[%s14959_s0 + $0x108] sm:$0xff]  }
   0xd   :  { %v12407_v42 = vld [vmem:[%s14959_s0 + $0x110] sm:$0xff]   ;;  %v12408_v43 = vld [vmem:[%s14959_s0 + $0x118] sm:$0xff]   ;;  %v12409_v44 = vld [vmem:[%s14959_s0 + $0x120] sm:$0xff]  }
   0xe   :  { %v12410_v45 = vld [vmem:[%s14959_s0 + $0x128] sm:$0xff]   ;;  %v12411_v46 = vld [vmem:[%s14959_s0 + $0x130] sm:$0xff]   ;;  %v12412_v47 = vld [vmem:[%s14959_s0 + $0x138] sm:$0xff]  }
   0xf   :  { %v12413_v48 = vld [vmem:[%s14959_s0 + $0x140] sm:$0xff]   ;;  %v12414_v49 = vld [vmem:[%s14959_s0 + $0x148] sm:$0xff]   ;;  %v12415_v50 = vld [vmem:[%s14959_s0 + $0x150] sm:$0xff]  }
  0x10   :  { %v12416_v51 = vld [vmem:[%s14959_s0 + $0x158] sm:$0xff]   ;;  %v12417_v52 = vld [vmem:[%s14959_s0 + $0x160] sm:$0xff]   ;;  %v12418_v53 = vld [vmem:[%s14959_s0 + $0x168] sm:$0xff]  }
  0x11   :  { %10847 = vmatmul.mubr.msk.bf16.gmra.mrb[4].mxu0 %vm829_vm2, %v12377_v10  ;;  %v12419_v54 = vld [vmem:[%s14959_s0 + $0x170] sm:$0xff]   ;;  %v12420_v55 = vld [vmem:[%s14959_s0 + $0x178] sm:$0xff]   ;;  %v12421_v56 = vld [vmem:[%s14959_s0 + $0x180] sm:$0xff]  }
  0x12   :  { %10850 = vmatprep.mubr.msk.bf16.mxu0 %vm829_vm2, %v12378_v11  ;;  %v12422_v57 = vld [vmem:[%s14959_s0] sm:$0xff]   ;;  %v12423_v58 = vld [vmem:[%s14959_s0 + $0x8] sm:$0xff]   ;;  %v12424_v59 = vld [vmem:[%s14959_s0 + $0x10] sm:$0xff]  }
  0x13   :  { %v12425_v60 = vld [vmem:[%s14959_s0 + $0x18] sm:$0xff]   ;;  %v12426_v61 = vld [vmem:[%s14959_s0 + $0x20] sm:$0xff]   ;;  %v12427_v62 = vld [vmem:[%s14959_s0 + $0x28] sm:$0xff]  }
  0x14   :  { %v12428_v63 = vld [vmem:[%s14959_s0 + $0x30] sm:$0xff]   ;;  %v12429_v0 = vld [vmem:[%s14959_s0 + $0x38] sm:$0xff]   ;;  %v12430_v1 = vld [vmem:[%s14959_s0 + $0x40] sm:$0xff]  }
  0x15   :  { %v12431_v2 = vld [vmem:[%s14959_s0 + $0x48] sm:$0xff]   ;;  %v12432_v3 = vld [vmem:[%s14959_s0 + $0x50] sm:$0xff]   ;;  %v12433_v4 = vld [vmem:[%s14959_s0 + $0x58] sm:$0xff]  }
  0x16   :  { %v12434_v5 = vld [vmem:[%s14959_s0 + $0x60] sm:$0xff]   ;;  %v12435_v6 = vld [vmem:[%s14959_s0 + $0x68] sm:$0xff]   ;;  %v12436_v7 = vld [vmem:[%s14959_s0 + $0x70] sm:$0xff]  }
  0x17   :  { %v12437_v8 = vld [vmem:[%s14959_s0 + $0x78] sm:$0xff]   ;;  %v12438_v9 = vld [vmem:[%s14959_s0 + $0x80] sm:$0xff]   ;;  %v12439_v10 = vld [vmem:[%s14959_s0 + $0x88] sm:$0xff]  }
  0x18   :  { %v12440_v11 = vld [vmem:[%s14959_s0 + $0x90] sm:$0xff]   ;;  %v12455_v26 = vld [vmem:[%s14959_s0 + $0x108] sm:$0xff]  }
  0x19   :  { %10851 = vmatmul.mubr.msk.bf16.gmra.mrb[8].mxu0 %vm829_vm2, %v12379_v12  ;;  %v12441_v12 = vld [vmem:[%s14959_s0 + $0x98] sm:$0xff]  }
  0x1a   :  { %10854 = vmatprep.mubr.msk.bf16.mxu0 %vm829_vm2, %v12380_v13  ;;  %v12442_v13 = vld [vmem:[%s14959_s0 + $0xa0] sm:$0xff]  }
  0x21   :  { %10855 = vmatmul.mubr.msk.bf16.gmra.mrb[12].mxu0 %vm829_vm2, %v12381_v14  ;;  %v12443_v14 = vld [vmem:[%s14959_s0 + $0xa8] sm:$0xff]  }
  0x22   :  { %10858 = vmatprep.mubr.msk.bf16.mxu0 %vm829_vm2, %v12382_v15  ;;  %v12444_v15 = vld [vmem:[%s14959_s0 + $0xb0] sm:$0xff]  }
  0x29   :  { %10859 = vmatmul.mubr.msk.bf16.gmra.mrb[16].mxu0 %vm829_vm2, %v12383_v16  ;;  %v12445_v16 = vld [vmem:[%s14959_s0 + $0xb8] sm:$0xff]  }
  0x2a   :  { %10862 = vmatprep.mubr.msk.bf16.mxu0 %vm829_vm2, %v12384_v17  ;;  %v12446_v17 = vld [vmem:[%s14959_s0 + $0xc0] sm:$0xff]  }
  0x31   :  { %10863 = vmatmul.mubr.msk.bf16.gmra.mrb[20].mxu0 %vm829_vm2, %v12385_v18  ;;  %v12447_v18 = vld [vmem:[%s14959_s0 + $0xc8] sm:$0xff]  }
  0x32   :  { %10866 = vmatprep.mubr.msk.bf16.mxu0 %vm829_vm2, %v12386_v19  ;;  %v12448_v19 = vld [vmem:[%s14959_s0 + $0xd0] sm:$0xff]  }
  0x39   :  { %10867 = vmatmul.mubr.msk.bf16.gmra.mrb[24].mxu0 %vm829_vm2, %v12387_v20  ;;  %v12449_v20 = vld [vmem:[%s14959_s0 + $0xd8] sm:$0xff]  }
  0x3a   :  { %10870 = vmatprep.mubr.msk.bf16.mxu0 %vm829_vm2, %v12388_v21  ;;  %v12450_v21 = vld [vmem:[%s14959_s0 + $0xe0] sm:$0xff]  }
  0x41   :  { %10871 = vmatmul.mubr.msk.bf16.gmra.mrb[28].mxu0 %vm829_vm2, %v12389_v22  ;;  %v12451_v22 = vld [vmem:[%s14959_s0 + $0xe8] sm:$0xff]  }
  0x42   :  { %10874 = vmatprep.mubr.msk.bf16.mxu0 %vm829_vm2, %v12390_v23  ;;  %v12452_v23 = vld [vmem:[%s14959_s0 + $0xf0] sm:$0xff]  }
  0x49   :  { %10875 = vmatmul.mubr.msk.bf16.gmra.mrb[32].mxu0 %vm829_vm2, %v12391_v24  ;;  %v12453_v24 = vld [vmem:[%s14959_s0 + $0xf8] sm:$0xff]  }
  0x4a   :  { %10878 = vmatprep.mubr.msk.bf16.mxu0 %vm829_vm2, %v12392_v25  ;;  %v12454_v25 = vld [vmem:[%s14959_s0 + $0x100] sm:$0xff]  }
  0x51   :  { %10879 = vmatmul.mubr.msk.bf16.gmra.mrb[36].mxu0 %vm829_vm2, %v12393_v28  ;;  %v12457_v28 = vld [vmem:[%s14959_s0 + $0x118] sm:$0xff]  }
  0x52   :  { %10882 = vmatprep.mubr.msk.bf16.mxu0 %vm829_vm2, %v12394_v29  ;;  %v12458_v29 = vld [vmem:[%s14959_s0 + $0x120] sm:$0xff]  }
  0x59   :  { %10883 = vmatmul.mubr.msk.bf16.gmra.mrb[40].mxu0 %vm829_vm2, %v12395_v30  ;;  %v12459_v30 = vld [vmem:[%s14959_s0 + $0x128] sm:$0xff]  }
  0x5a   :  { %10886 = vmatprep.mubr.msk.bf16.mxu0 %vm829_vm2, %v12396_v31  ;;  %v12460_v31 = vld [vmem:[%s14959_s0 + $0x130] sm:$0xff]  }
  0x61   :  { %10887 = vmatmul.mubr.msk.bf16.gmra.mrb[44].mxu0 %vm829_vm2, %v12397_v32  ;;  %v12461_v32 = vld [vmem:[%s14959_s0 + $0x138] sm:$0xff]  }
  0x62   :  { %10890 = vmatprep.mubr.msk.bf16.mxu0 %vm829_vm2, %v12398_v33  ;;  %v12462_v33 = vld [vmem:[%s14959_s0 + $0x140] sm:$0xff]  }
  0x69   :  { %10891 = vmatmul.mubr.msk.bf16.gmra.mrb[48].mxu0 %vm829_vm2, %v12399_v34  ;;  %v12463_v34 = vld [vmem:[%s14959_s0 + $0x148] sm:$0xff]  }
  0x6a   :  { %10894 = vmatprep.mubr.msk.bf16.mxu0 %vm829_vm2, %v12400_v35  ;;  %v12464_v35 = vld [vmem:[%s14959_s0 + $0x150] sm:$0xff]  }
  0x71   :  { %10895 = vmatmul.mubr.msk.bf16.gmra.mrb[52].mxu0 %vm829_vm2, %v12401_v36  ;;  %v12465_v36 = vld [vmem:[%s14959_s0 + $0x158] sm:$0xff]  }
  0x72   :  { %10898 = vmatprep.mubr.msk.bf16.mxu0 %vm829_vm2, %v12402_v37  ;;  %v12466_v37 = vld [vmem:[%s14959_s0 + $0x160] sm:$0xff]  }
  0x79   :  { %10899 = vmatmul.mubr.msk.bf16.gmra.mrb[56].mxu0 %vm829_vm2, %v12403_v38  ;;  %v12467_v38 = vld [vmem:[%s14959_s0 + $0x168] sm:$0xff]  }
  0x7a   :  { %10902 = vmatprep.mubr.msk.bf16.mxu0 %vm829_vm2, %v12404_v39  ;;  %v12468_v39 = vld [vmem:[%s14959_s0 + $0x170] sm:$0xff]  }
  0x81   :  { %10903 = vmatmul.mubr.msk.bf16.gmra.mrb[60].mxu0 %vm829_vm2, %v12405_v40  ;;  %v12469_v40 = vld [vmem:[%s14959_s0 + $0x178] sm:$0xff]  }
  0x82   :  { %10906 = vmatprep.mubr.msk.bf16.mxu0 %vm829_vm2, %v12406_v41  ;;  %v12470_v41 = vld [vmem:[%s14959_s0 + $0x180] sm:$0xff]  }
  0x89   :  { %10907 = vmatmul.mubr.msk.bf16.gmra.mrb[64].mxu0 %vm829_vm2, %v12407_v42  ;;  %v12471_v42 = vld [vmem:[%s14959_s0 + $0x188] sm:$0xff]  }
  0x8a   :  { %10910 = vmatprep.mubr.msk.bf16.mxu0 %vm829_vm2, %v12408_v43  ;;  %v12472_v43 = vld [vmem:[%s14959_s0 + $0x190] sm:$0xff]  }
  0x91   :  { %10911 = vmatmul.mubr.msk.bf16.gmra.mrb[68].mxu0 %vm829_vm2, %v12409_v44  ;;  %v12473_v44 = vld [vmem:[%s14959_s0 + $0x198] sm:$0xff]  }
  0x92   :  { %10914 = vmatprep.mubr.msk.bf16.mxu0 %vm829_vm2, %v12410_v45  ;;  %v12474_v45 = vld [vmem:[%s14959_s0 + $0x1a0] sm:$0xff]  }
  0x99   :  { %10915 = vmatmul.mubr.msk.bf16.gmra.mrb[72].mxu0 %vm829_vm2, %v12411_v46  ;;  %v12475_v46 = vld [vmem:[%s14959_s0 + $0x1a8] sm:$0xff]  }
  0x9a   :  { %10918 = vmatprep.mubr.msk.bf16.mxu0 %vm829_vm2, %v12412_v47  ;;  %v12476_v47 = vld [vmem:[%s14959_s0 + $0x1b0] sm:$0xff]  }
  0xa1   :  { %10919 = vmatmul.mubr.msk.bf16.gmra.mrb[76].mxu0 %vm829_vm2, %v12413_v48  ;;  %v12477_v48 = vld [vmem:[%s14959_s0 + $0x1b8] sm:$0xff]  }
  0xa2   :  { %10922 = vmatprep.mubr.msk.bf16.mxu0 %vm829_vm2, %v12414_v49  ;;  %v12478_v49 = vld [vmem:[%s14959_s0 + $0x1c0] sm:$0xff]  }
  0xa9   :  { %10923 = vmatmul.mubr.msk.bf16.gmra.mrb[80].mxu0 %vm829_vm2, %v12415_v50  ;;  %v12479_v50 = vld [vmem:[%s14959_s0 + $0x1c8] sm:$0xff]  }
  0xaa   :  { %10926 = vmatprep.mubr.msk.bf16.mxu0 %vm829_vm2, %v12416_v51  ;;  %v12480_v51 = vld [vmem:[%s14959_s0 + $0x1d0] sm:$0xff]  }
  0xb1   :  { %10927 = vmatmul.mubr.msk.bf16.gmra.mrb[84].mxu0 %vm829_vm2, %v12417_v52  ;;  %v12481_v52 = vld [vmem:[%s14959_s0 + $0x1d8] sm:$0xff]  }
  0xb2   :  { %10930 = vmatprep.mubr.msk.bf16.mxu0 %vm829_vm2, %v12418_v53  ;;  %v12482_v53 = vld [vmem:[%s14959_s0 + $0x1e0] sm:$0xff]  }
  0xb9   :  { %10931 = vmatmul.mubr.msk.bf16.gmra.mrb[88].mxu0 %vm829_vm2, %v12419_v54  ;;  %v12483_v54 = vld [vmem:[%s14959_s0 + $0x1e8] sm:$0xff]  }
  0xba   :  { %10934 = vmatprep.mubr.msk.bf16.mxu0 %vm829_vm2, %v12420_v55  ;;  %v12484_v55 = vld [vmem:[%s14959_s0 + $0x1f0] sm:$0xff]  }
  0xc1   :  { %10935 = vmatmul.mubr.msk.bf16.gmra.mrb[92].mxu0 %vm829_vm2, %v12421_v56  ;;  %v12485_v56 = vld [vmem:[%s14959_s0 + $0x1f8] sm:$0xff]  }
  0xc2   :  { %11020 = vmatprep.mubr.msk.bf16.mxu0 %vm829_vm2, %v12422_v57  ;;  %v12486_v57 = vld [vmem:[%s14959_s0 + $0x200] sm:$0xff]  }
  0xc9   :  { %11021 = vmatmul.mubr.msk.bf16.vlgmr.msra.gmra.mrb[0].mxu0 %vm829_vm2, %v12423_v58  ;;  %v12487_v58 = vld [vmem:[%s14959_s0 + $0x208] sm:$0xff]  }
  0xca   :  { %11197 = vmatpush3.bf16.msra.mxu0 %v12833_v27  ;;  %11024 = vmatprep.mubr.msk.bf16.mxu0 %vm829_vm2, %v12424_v59  ;;  %v12456_v27 = vld [vmem:[%s14959_s0 + $0x110] sm:$0xff]  }
  0xcb   :  { %v12488_v59 = vld [vmem:[%s14959_s0 + $0x210] sm:$0xff]  }
  0xd1   :  { %11025 = vmatmul.mubr.msk.bf16.gmra.mrb[4].mxu0 %vm829_vm2, %v12425_v60  ;;  %v12489_v60 = vld [vmem:[%s14959_s0 + $0x218] sm:$0xff]  }
  0xd2   :  { %11028 = vmatprep.mubr.msk.bf16.mxu0 %vm829_vm2, %v12426_v61  ;;  %v12490_v61 = vld [vmem:[%s14959_s0 + $0x220] sm:$0xff]  }
  0xd9   :  { %11029 = vmatmul.mubr.msk.bf16.gmra.mrb[8].mxu0 %vm829_vm2, %v12427_v62  ;;  %v12491_v62 = vld [vmem:[%s14959_s0 + $0x228] sm:$0xff]  }
  0xda   :  { %11032 = vmatprep.mubr.msk.bf16.mxu0 %vm829_vm2, %v12428_v63  ;;  %v12492_v63 = vld [vmem:[%s14959_s0 + $0x230] sm:$0xff]  }
  0xe1   :  { %11033 = vmatmul.mubr.msk.bf16.gmra.mrb[12].mxu0 %vm829_vm2, %v12429_v0  ;;  %v12493_v0 = vld [vmem:[%s14959_s0 + $0x238] sm:$0xff]  }
  0xe2   :  { %11036 = vmatprep.mubr.msk.bf16.mxu0 %vm829_vm2, %v12430_v1  ;;  %v12494_v1 = vld [vmem:[%s14959_s0 + $0x240] sm:$0xff]  }
  0xe9   :  { %11037 = vmatmul.mubr.msk.bf16.gmra.mrb[16].mxu0 %vm829_vm2, %v12431_v2  ;;  %v12495_v2 = vld [vmem:[%s14959_s0 + $0x248] sm:$0xff]  }
  0xea   :  { %11040 = vmatprep.mubr.msk.bf16.mxu0 %vm829_vm2, %v12432_v3  ;;  %v12496_v3 = vld [vmem:[%s14959_s0 + $0x250] sm:$0xff]  }
  0xf1   :  { %11041 = vmatmul.mubr.msk.bf16.gmra.mrb[20].mxu0 %vm829_vm2, %v12433_v4  ;;  %v12497_v4 = vld [vmem:[%s14959_s0 + $0x258] sm:$0xff]  }
  0xf2   :  { %11044 = vmatprep.mubr.msk.bf16.mxu0 %vm829_vm2, %v12434_v5  ;;  %v12498_v5 = vld [vmem:[%s14959_s0 + $0x260] sm:$0xff]  }
  0xf9   :  { %11045 = vmatmul.mubr.msk.bf16.gmra.mrb[24].mxu0 %vm829_vm2, %v12435_v6  ;;  %v12530_v6 = vld [vmem:[%s14959_s0 + $0x188] sm:$0xff]  }
  0xfa   :  { %11048 = vmatprep.mubr.msk.bf16.mxu0 %vm829_vm2, %v12436_v7  ;;  %v12531_v7 = vld [vmem:[%s14959_s0 + $0x190] sm:$0xff]   ;;  %10938 = vmatprep.mubr.msk.bf16.mxu1 %vm829_vm2, %v12530_v6  ;;  %v12594_v6 = vld [vmem:[%s14959_s0 + $0x288] sm:$0xff]  }
  0xfb   :  { %10939 = vmatmul.mubr.msk.bf16.vlgmr.msra.gmra.mrb[0].mxu1 %vm829_vm2, %v12531_v7  ;;  %v12595_v7 = vld [vmem:[%s14959_s0 + $0x290] sm:$0xff]  }
 0x101   :  { %11049 = vmatmul.mubr.msk.bf16.gmra.mrb[28].mxu0 %vm829_vm2, %v12437_v8  ;;  %v12499_v8 = vld [vmem:[%s14959_s0 + $0x268] sm:$0xff]  }
 0x102   :  { %11052 = vmatprep.mubr.msk.bf16.mxu0 %vm829_vm2, %v12438_v9  ;;  %v12500_v9 = vld [vmem:[%s14959_s0 + $0x270] sm:$0xff]  }
 0x109   :  { %11053 = vmatmul.mubr.msk.bf16.gmra.mrb[32].mxu0 %vm829_vm2, %v12439_v10  ;;  %v12534_v10 = vld [vmem:[%s14959_s0 + $0x198] sm:$0xff]  }
 0x10a   :  { %11056 = vmatprep.mubr.msk.bf16.mxu0 %vm829_vm2, %v12440_v11  ;;  %v12535_v11 = vld [vmem:[%s14959_s0 + $0x1a0] sm:$0xff]   ;;  %10942 = vmatprep.mubr.msk.bf16.mxu1 %vm829_vm2, %v12534_v10  ;;  %v12598_v10 = vld [vmem:[%s14959_s0 + $0x298] sm:$0xff]  }
 0x10b   :  { %10943 = vmatmul.mubr.msk.bf16.gmra.mrb[4].mxu1 %vm829_vm2, %v12535_v11  ;;  %v12537_v11 = vld [vmem:[%s14959_s0 + $0xc8] sm:$0xff]  }
 0x111   :  { %11057 = vmatmul.mubr.msk.bf16.gmra.mrb[36].mxu0 %vm829_vm2, %v12441_v12  ;;  %v12501_v12 = vld [vmem:[%s14959_s0 + $0x278] sm:$0xff]  }
 0x112   :  { %11060 = vmatprep.mubr.msk.bf16.mxu0 %vm829_vm2, %v12442_v13  ;;  %v12502_v13 = vld [vmem:[%s14959_s0 + $0x280] sm:$0xff]  }
 0x119   :  { %11061 = vmatmul.mubr.msk.bf16.gmra.mrb[40].mxu0 %vm829_vm2, %v12443_v14  ;;  %v12538_v14 = vld [vmem:[%s14959_s0 + $0x1a8] sm:$0xff]  }
 0x11a   :  { %11064 = vmatprep.mubr.msk.bf16.mxu0 %vm829_vm2, %v12444_v15  ;;  %v12539_v15 = vld [vmem:[%s14959_s0 + $0x1b0] sm:$0xff]   ;;  %10946 = vmatprep.mubr.msk.bf16.mxu1 %vm829_vm2, %v12538_v14  ;;  %v12602_v14 = vld [vmem:[%s14959_s0 + $0x2a8] sm:$0xff]  }
 0x11b   :  { %10947 = vmatmul.mubr.msk.bf16.gmra.mrb[8].mxu1 %vm829_vm2, %v12539_v15  ;;  %v12541_v15 = vld [vmem:[%s14959_s0 + $0xd8] sm:$0xff]  }
 0x121   :  { %11065 = vmatmul.mubr.msk.bf16.gmra.mrb[44].mxu0 %vm829_vm2, %v12445_v16  ;;  %v12503_v16 = vld [vmem:[%s14959_s0 + $0x288] sm:$0xff]  }
 0x122   :  { %11068 = vmatprep.mubr.msk.bf16.mxu0 %vm829_vm2, %v12446_v17  ;;  %v12504_v17 = vld [vmem:[%s14959_s0 + $0x290] sm:$0xff]  }
 0x129   :  { %11069 = vmatmul.mubr.msk.bf16.gmra.mrb[48].mxu0 %vm829_vm2, %v12447_v18  ;;  %v12542_v18 = vld [vmem:[%s14959_s0 + $0x1b8] sm:$0xff]  }
 0x12a   :  { %11072 = vmatprep.mubr.msk.bf16.mxu0 %vm829_vm2, %v12448_v19  ;;  %v12543_v19 = vld [vmem:[%s14959_s0 + $0x1c0] sm:$0xff]   ;;  %10950 = vmatprep.mubr.msk.bf16.mxu1 %vm829_vm2, %v12542_v18  ;;  %v12606_v18 = vld [vmem:[%s14959_s0 + $0x2b8] sm:$0xff]  }
 0x12b   :  { %10951 = vmatmul.mubr.msk.bf16.gmra.mrb[12].mxu1 %vm829_vm2, %v12543_v19  ;;  %v12545_v19 = vld [vmem:[%s14959_s0 + $0xe8] sm:$0xff]  }
 0x131   :  { %11073 = vmatmul.mubr.msk.bf16.gmra.mrb[52].mxu0 %vm829_vm2, %v12449_v20  ;;  %v12505_v20 = vld [vmem:[%s14959_s0 + $0x298] sm:$0xff]  }
 0x132   :  { %11076 = vmatprep.mubr.msk.bf16.mxu0 %vm829_vm2, %v12450_v21  ;;  %v12506_v21 = vld [vmem:[%s14959_s0 + $0x2a0] sm:$0xff]  }
 0x139   :  { %11077 = vmatmul.mubr.msk.bf16.gmra.mrb[56].mxu0 %vm829_vm2, %v12451_v22  ;;  %v12546_v22 = vld [vmem:[%s14959_s0 + $0x1c8] sm:$0xff]  }
 0x13a   :  { %11080 = vmatprep.mubr.msk.bf16.mxu0 %vm829_vm2, %v12452_v23  ;;  %v12547_v23 = vld [vmem:[%s14959_s0 + $0x1d0] sm:$0xff]   ;;  %10954 = vmatprep.mubr.msk.bf16.mxu1 %vm829_vm2, %v12546_v22  ;;  %v12610_v22 = vld [vmem:[%s14960_s3 + $0x8] sm:$0xff]  }
 0x13b   :  { %10955 = vmatmul.mubr.msk.bf16.gmra.mrb[16].mxu1 %vm829_vm2, %v12547_v23  ;;  %11374 = vmatprep.subr.bf16.mxu1 %v12610_v22  ;;  %v12549_v23 = vld [vmem:[%s14959_s0 + $0xf8] sm:$0xff]  }
 0x13c   :  { %11375 = vmatpush3.bf16.msra.mxu1 %v12610_v22  ;;  %v12609_v22 = vld [vmem:[%s14959_s0 + $0x1e8] sm:$0xff]  }
 0x141   :  { %11081 = vmatmul.mubr.msk.bf16.gmra.mrb[60].mxu0 %vm829_vm2, %v12453_v24  ;;  %v12507_v24 = vld [vmem:[%s14959_s0 + $0x2a8] sm:$0xff]  }
 0x142   :  { %11084 = vmatprep.mubr.msk.bf16.mxu0 %vm829_vm2, %v12454_v25  ;;  %v12508_v25 = vld [vmem:[%s14959_s0 + $0x2b0] sm:$0xff]  }
 0x149   :  { %11085 = vmatmul.mubr.msk.bf16.gmra.mrb[64].mxu0 %vm829_vm2, %v12455_v26  ;;  %v12550_v26 = vld [vmem:[%s14959_s0 + $0x1d8] sm:$0xff]  }
 0x14a   :  { %11088 = vmatprep.mubr.msk.bf16.mxu0 %vm829_vm2, %v12456_v27  ;;  %v12551_v27 = vld [vmem:[%s14959_s0 + $0x1e0] sm:$0xff]   ;;  %10958 = vmatprep.mubr.msk.bf16.mxu1 %vm829_vm2, %v12550_v26  ;;  %v12556_v26 = vld [vmem:[%s14959_s0 + $0x110] sm:$0xff]  }
 0x14b   :  { %10959 = vmatmul.mubr.msk.bf16.gmra.mrb[20].mxu1 %vm829_vm2, %v12551_v27  ;;  %v12557_v27 = vld [vmem:[%s14959_s0 + $0x118] sm:$0xff]  }
 0x151   :  { %11089 = vmatmul.mubr.msk.bf16.gmra.mrb[68].mxu0 %vm829_vm2, %v12457_v28  ;;  %v12509_v28 = vld [vmem:[%s14959_s0 + $0x2b8] sm:$0xff]  }
 0x152   :  { %11092 = vmatprep.mubr.msk.bf16.mxu0 %vm829_vm2, %v12458_v29  ;;  %v12510_v29 = vld [vmem:[%s14959_s0 + $0x10] sm:$0xff]  }
 0x159   :  { %11093 = vmatmul.mubr.msk.bf16.gmra.mrb[72].mxu0 %vm829_vm2, %v12459_v30  ;;  %v12554_v30 = vld [vmem:[%s14959_s0 + $0x1e8] sm:$0xff]  }
 0x15a   :  { %11096 = vmatprep.mubr.msk.bf16.mxu0 %vm829_vm2, %v12460_v31  ;;  %v12555_v31 = vld [vmem:[%s14959_s0 + $0x1f0] sm:$0xff]   ;;  %10962 = vmatprep.mubr.msk.bf16.mxu1 %vm829_vm2, %v12554_v30 }
 0x15b   :  { %10963 = vmatmul.mubr.msk.bf16.gmra.mrb[24].mxu1 %vm829_vm2, %v12555_v31  ;;  %v12564_v30 = vld [vmem:[%s14959_s0 + $0x130] sm:$0xff]   ;;  %v12565_v31 = vld [vmem:[%s14959_s0 + $0x138] sm:$0xff]  }
 0x161   :  { %11097 = vmatmul.mubr.msk.bf16.gmra.mrb[76].mxu0 %vm829_vm2, %v12461_v32  ;;  %v12511_v32 = vld [vmem:[%s14959_s0 + $0x18] sm:$0xff]  }
 0x162   :  { %11100 = vmatprep.mubr.msk.bf16.mxu0 %vm829_vm2, %v12462_v33  ;;  %v12512_v33 = vld [vmem:[%s14959_s0 + $0x20] sm:$0xff]  }
 0x169   :  { %11101 = vmatmul.mubr.msk.bf16.gmra.mrb[80].mxu0 %vm829_vm2, %v12463_v34  ;;  %v12558_v34 = vld [vmem:[%s14959_s0 + $0x1f8] sm:$0xff]  }
 0x16a   :  { %11104 = vmatprep.mubr.msk.bf16.mxu0 %vm829_vm2, %v12464_v35  ;;  %v12559_v35 = vld [vmem:[%s14959_s0 + $0x200] sm:$0xff]   ;;  %10966 = vmatprep.mubr.msk.bf16.mxu1 %vm829_vm2, %v12558_v34  ;;  %v12572_v34 = vld [vmem:[%s14959_s0 + $0x150] sm:$0xff]  }
 0x16b   :  { %10967 = vmatmul.mubr.msk.bf16.gmra.mrb[28].mxu1 %vm829_vm2, %v12559_v35  ;;  %v12573_v35 = vld [vmem:[%s14959_s0 + $0x158] sm:$0xff]  }
 0x171   :  { %11105 = vmatmul.mubr.msk.bf16.gmra.mrb[84].mxu0 %vm829_vm2, %v12465_v36  ;;  %v12513_v36 = vld [vmem:[%s14959_s0 + $0x28] sm:$0xff]  }
 0x172   :  { %11108 = vmatprep.mubr.msk.bf16.mxu0 %vm829_vm2, %v12466_v37  ;;  %v12514_v37 = vld [vmem:[%s14959_s0 + $0x30] sm:$0xff]  }
 0x179   :  { %11109 = vmatmul.mubr.msk.bf16.gmra.mrb[88].mxu0 %vm829_vm2, %v12467_v38  ;;  %v12562_v38 = vld [vmem:[%s14959_s0 + $0x208] sm:$0xff]  }
 0x17a   :  { %11112 = vmatprep.mubr.msk.bf16.mxu0 %vm829_vm2, %v12468_v39  ;;  %v12563_v39 = vld [vmem:[%s14959_s0 + $0x210] sm:$0xff]   ;;  %10970 = vmatprep.mubr.msk.bf16.mxu1 %vm829_vm2, %v12562_v38 }
 0x17b   :  { %10971 = vmatmul.mubr.msk.bf16.gmra.mrb[32].mxu1 %vm829_vm2, %v12563_v39  ;;  %v12580_v38 = vld [vmem:[%s14959_s0 + $0x170] sm:$0xff]   ;;  %v12581_v39 = vld [vmem:[%s14959_s0 + $0x178] sm:$0xff]  }
 0x181   :  { %11113 = vmatmul.mubr.msk.bf16.gmra.mrb[92].mxu0 %vm829_vm2, %v12469_v40  ;;  %v12515_v40 = vld [vmem:[%s14959_s0 + $0x38] sm:$0xff]  }
 0x182   :  { %11116 = vmatprep.mubr.msk.bf16.mxu0 %vm829_vm2, %v12470_v41  ;;  %v12516_v41 = vld [vmem:[%s14959_s0 + $0x40] sm:$0xff]  }
 0x189   :  { %11117 = vmatmul.mubr.msk.bf16.gmra.mrb[96].mxu0 %vm829_vm2, %v12471_v42  ;;  %v12566_v42 = vld [vmem:[%s14959_s0 + $0x218] sm:$0xff]  }
 0x18a   :  { %11120 = vmatprep.mubr.msk.bf16.mxu0 %vm829_vm2, %v12472_v43  ;;  %v12567_v43 = vld [vmem:[%s14959_s0 + $0x220] sm:$0xff]   ;;  %10974 = vmatprep.mubr.msk.bf16.mxu1 %vm829_vm2, %v12566_v42  ;;  %v12588_v42 = vld [vmem:[%s14959_s0 + $0x190] sm:$0xff]  }
 0x18b   :  { %10975 = vmatmul.mubr.msk.bf16.gmra.mrb[36].mxu1 %vm829_vm2, %v12567_v43  ;;  %v12589_v43 = vld [vmem:[%s14959_s0 + $0x198] sm:$0xff]  }
 0x191   :  { %11121 = vmatmul.mubr.msk.bf16.gmra.mrb[100].mxu0 %vm829_vm2, %v12473_v44  ;;  %v12517_v44 = vld [vmem:[%s14959_s0 + $0x48] sm:$0xff]  }
 0x192   :  { %11124 = vmatprep.mubr.msk.bf16.mxu0 %vm829_vm2, %v12474_v45  ;;  %v12518_v45 = vld [vmem:[%s14959_s0 + $0x50] sm:$0xff]  }
 0x199   :  { %11125 = vmatmul.mubr.msk.bf16.gmra.mrb[104].mxu0 %vm829_vm2, %v12475_v46  ;;  %v12570_v46 = vld [vmem:[%s14959_s0 + $0x228] sm:$0xff]  }
 0x19a   :  { %11128 = vmatprep.mubr.msk.bf16.mxu0 %vm829_vm2, %v12476_v47  ;;  %v12571_v47 = vld [vmem:[%s14959_s0 + $0x230] sm:$0xff]   ;;  %10978 = vmatprep.mubr.msk.bf16.mxu1 %vm829_vm2, %v12570_v46 }
 0x19b   :  { %10979 = vmatmul.mubr.msk.bf16.gmra.mrb[40].mxu1 %vm829_vm2, %v12571_v47  ;;  %v12596_v46 = vld [vmem:[%s14959_s0 + $0x1b0] sm:$0xff]   ;;  %v12597_v47 = vld [vmem:[%s14959_s0 + $0x1b8] sm:$0xff]  }
 0x1a1   :  { %11129 = vmatmul.mubr.msk.bf16.gmra.mrb[108].mxu0 %vm829_vm2, %v12477_v48  ;;  %v12519_v48 = vld [vmem:[%s14959_s0 + $0x58] sm:$0xff]  }
 0x1a2   :  { %11132 = vmatprep.mubr.msk.bf16.mxu0 %vm829_vm2, %v12478_v49  ;;  %v12520_v49 = vld [vmem:[%s14959_s0 + $0x60] sm:$0xff]  }
 0x1a9   :  { %11133 = vmatmul.mubr.msk.bf16.gmra.mrb[112].mxu0 %vm829_vm2, %v12479_v50  ;;  %v12574_v50 = vld [vmem:[%s14959_s0 + $0x238] sm:$0xff]  }
 0x1aa   :  { %11136 = vmatprep.mubr.msk.bf16.mxu0 %vm829_vm2, %v12480_v51  ;;  %v12575_v51 = vld [vmem:[%s14959_s0 + $0x240] sm:$0xff]   ;;  %10982 = vmatprep.mubr.msk.bf16.mxu1 %vm829_vm2, %v12574_v50 }
 0x1ab   :  { %10983 = vmatmul.mubr.msk.bf16.gmra.mrb[44].mxu1 %vm829_vm2, %v12575_v51 }
 0x1b1   :  { %11137 = vmatmul.mubr.msk.bf16.gmra.mrb[116].mxu0 %vm829_vm2, %v12481_v52  ;;  %v12521_v52 = vld [vmem:[%s14959_s0 + $0x68] sm:$0xff]  }
 0x1b2   :  { %11140 = vmatprep.mubr.msk.bf16.mxu0 %vm829_vm2, %v12482_v53  ;;  %v12522_v53 = vld [vmem:[%s14959_s0 + $0x70] sm:$0xff]  }
 0x1b9   :  { %11141 = vmatmul.mubr.msk.bf16.gmra.mrb[120].mxu0 %vm829_vm2, %v12483_v54  ;;  %v12578_v54 = vld [vmem:[%s14959_s0 + $0x248] sm:$0xff]  }
 0x1ba   :  { %11144 = vmatprep.mubr.msk.bf16.mxu0 %vm829_vm2, %v12484_v55  ;;  %v12579_v55 = vld [vmem:[%s14959_s0 + $0x250] sm:$0xff]   ;;  %10986 = vmatprep.mubr.msk.bf16.mxu1 %vm829_vm2, %v12578_v54 }
 0x1bb   :  { %10987 = vmatmul.mubr.msk.bf16.gmra.mrb[48].mxu1 %vm829_vm2, %v12579_v55 }
 0x1c1   :  { %11145 = vmatmul.mubr.msk.bf16.gmra.mrb[124].mxu0 %vm829_vm2, %v12485_v56  ;;  %v12523_v56 = vld [vmem:[%s14959_s0 + $0x78] sm:$0xff]  }
 0x1c2   :  { %11148 = vmatprep.mubr.msk.bf16.mxu0 %vm829_vm2, %v12486_v57  ;;  %v12524_v57 = vld [vmem:[%s14959_s0 + $0x80] sm:$0xff]  }
 0x1c9   :  { %11149 = vmatmul.mubr.msk.bf16.gmra.mrb[128].mxu0 %vm829_vm2, %v12487_v58  ;;  %v12582_v58 = vld [vmem:[%s14959_s0 + $0x258] sm:$0xff]  }
 0x1ca   :  { %11152 = vmatprep.mubr.msk.bf16.mxu0 %vm829_vm2, %v12488_v59  ;;  %v12583_v59 = vld [vmem:[%s14959_s0 + $0x260] sm:$0xff]   ;;  %10990 = vmatprep.mubr.msk.bf16.mxu1 %vm829_vm2, %v12582_v58 }
 0x1cb   :  { %10991 = vmatmul.mubr.msk.bf16.gmra.mrb[52].mxu1 %vm829_vm2, %v12583_v59 }
 0x1d1   :  { %11153 = vmatmul.mubr.msk.bf16.gmra.mrb[132].mxu0 %vm829_vm2, %v12489_v60  ;;  %v12525_v60 = vld [vmem:[%s14959_s0 + $0x88] sm:$0xff]  }
 0x1d2   :  { %11156 = vmatprep.mubr.msk.bf16.mxu0 %vm829_vm2, %v12490_v61  ;;  %v12526_v61 = vld [vmem:[%s14959_s0 + $0x90] sm:$0xff]  }
 0x1d9   :  { %11157 = vmatmul.mubr.msk.bf16.gmra.mrb[136].mxu0 %vm829_vm2, %v12491_v62  ;;  %v12586_v62 = vld [vmem:[%s14959_s0 + $0x268] sm:$0xff]  }
 0x1da   :  { %11160 = vmatprep.mubr.msk.bf16.mxu0 %vm829_vm2, %v12492_v63  ;;  %v12587_v63 = vld [vmem:[%s14959_s0 + $0x270] sm:$0xff]   ;;  %10994 = vmatprep.mubr.msk.bf16.mxu1 %vm829_vm2, %v12586_v62 }
 0x1db   :  { %10995 = vmatmul.mubr.msk.bf16.gmra.mrb[56].mxu1 %vm829_vm2, %v12587_v63 }
 0x1e1   :  { %11161 = vmatmul.mubr.msk.bf16.gmra.mrb[140].mxu0 %vm829_vm2, %v12493_v0  ;;  %v12527_v0 = vld [vmem:[%s14959_s0 + $0x98] sm:$0xff]  }
 0x1e2   :  { %11164 = vmatprep.mubr.msk.bf16.mxu0 %vm829_vm2, %v12494_v1  ;;  %v12528_v1 = vld [vmem:[%s14959_s0 + $0xa0] sm:$0xff]  }
 0x1e9   :  { %11165 = vmatmul.mubr.msk.bf16.gmra.mrb[144].mxu0 %vm829_vm2, %v12495_v2  ;;  %v12590_v2 = vld [vmem:[%s14959_s0 + $0x278] sm:$0xff]  }
 0x1ea   :  { %11168 = vmatprep.mubr.msk.bf16.mxu0 %vm829_vm2, %v12496_v3  ;;  %v12591_v3 = vld [vmem:[%s14959_s0 + $0x280] sm:$0xff]   ;;  %10998 = vmatprep.mubr.msk.bf16.mxu1 %vm829_vm2, %v12590_v2 }
 0x1eb   :  { %10999 = vmatmul.mubr.msk.bf16.gmra.mrb[60].mxu1 %vm829_vm2, %v12591_v3 }
 0x1ec   :  { %11002 = vmatprep.mubr.msk.bf16.mxu1 %vm829_vm2, %v12594_v6 }
 0x1f1   :  { %11169 = vmatmul.mubr.msk.bf16.gmra.mrb[148].mxu0 %vm829_vm2, %v12497_v4  ;;  %v12529_v4 = vld [vmem:[%s14959_s0 + $0xa8] sm:$0xff]  }
 0x1f2   :  { %11172 = vmatprep.mubr.msk.bf16.mxu0 %vm829_vm2, %v12498_v5  ;;  %v12532_v5 = vld [vmem:[%s14959_s0 + $0xb0] sm:$0xff]  }
 0x1f3   :  { %11003 = vmatmul.mubr.msk.bf16.gmra.mrb[64].mxu1 %vm829_vm2, %v12595_v7 }
 0x1f4   :  { %11006 = vmatprep.mubr.msk.bf16.mxu1 %vm829_vm2, %v12598_v10 }
 0x1f9   :  { %11173 = vmatmul.mubr.msk.bf16.gmra.mrb[152].mxu0 %vm829_vm2, %v12499_v8  ;;  %v12533_v8 = vld [vmem:[%s14959_s0 + $0xb8] sm:$0xff]  }
 0x1fa   :  { %11176 = vmatprep.mubr.msk.bf16.mxu0 %vm829_vm2, %v12500_v9  ;;  %v12536_v9 = vld [vmem:[%s14959_s0 + $0xc0] sm:$0xff]  }
 0x201   :  { %11177 = vmatmul.mubr.msk.bf16.gmra.mrb[156].mxu0 %vm829_vm2, %v12501_v12  ;;  %v12599_v12 = vld [vmem:[%s14959_s0 + $0x2a0] sm:$0xff]  }
 0x202   :  { %11180 = vmatprep.mubr.msk.bf16.mxu0 %vm829_vm2, %v12502_v13  ;;  %v12540_v13 = vld [vmem:[%s14959_s0 + $0xd0] sm:$0xff]   ;;  %11007 = vmatmul.mubr.msk.bf16.gmra.mrb[68].mxu1 %vm829_vm2, %v12599_v12 }
 0x203   :  { %11010 = vmatprep.mubr.msk.bf16.mxu1 %vm829_vm2, %v12602_v14 }
 0x209   :  { %11181 = vmatmul.mubr.msk.bf16.gmra.mrb[160].mxu0 %vm829_vm2, %v12503_v16  ;;  %v12603_v16 = vld [vmem:[%s14959_s0 + $0x2b0] sm:$0xff]  }
 0x20a   :  { %11184 = vmatprep.mubr.msk.bf16.mxu0 %vm829_vm2, %v12504_v17  ;;  %v12544_v17 = vld [vmem:[%s14959_s0 + $0xe0] sm:$0xff]   ;;  %11011 = vmatmul.mubr.msk.bf16.gmra.mrb[72].mxu1 %vm829_vm2, %v12603_v16 }
 0x20b   :  { %11014 = vmatprep.mubr.msk.bf16.mxu1 %vm829_vm2, %v12606_v18 }
 0x211   :  { %11185 = vmatmul.mubr.msk.bf16.gmra.mrb[164].mxu0 %vm829_vm2, %v12505_v20  ;;  %v12607_v20 = vld [vmem:[%s14959_s0 + $0x2c0] sm:$0xff]  }
 0x212   :  { %11188 = vmatprep.mubr.msk.bf16.mxu0 %vm829_vm2, %v12506_v21  ;;  %v12548_v21 = vld [vmem:[%s14959_s0 + $0xf0] sm:$0xff]   ;;  %11015 = vmatmul.mubr.msk.bf16.gmra.mrb[76].mxu1 %vm829_vm2, %v12607_v20 }
 0x219   :  { %11189 = vmatmul.mubr.msk.bf16.gmra.mrb[168].mxu0 %vm829_vm2, %v12507_v24  ;;  %v12552_v24 = vld [vmem:[%s14959_s0 + $0x100] sm:$0xff]  }
 0x21a   :  { %11192 = vmatprep.mubr.msk.bf16.mxu0 %vm829_vm2, %v12508_v25  ;;  %v12553_v25 = vld [vmem:[%s14959_s0 + $0x108] sm:$0xff]  }
 0x221   :  { %11193 = vmatmul.mubr.msk.bf16.gmra.mrb[172].mxu0 %vm829_vm2, %v12509_v28  ;;  %v12560_v28 = vld [vmem:[%s14959_s0 + $0x120] sm:$0xff]  }
 0x222   :  { %11198 = vmatprep.mubr.msk.bf16.mxu0 %vm829_vm2, %v12510_v29  ;;  %v12561_v29 = vld [vmem:[%s14959_s0 + $0x128] sm:$0xff]  }
 0x229   :  { %11199 = vmatmul.mubr.msk.bf16.vlgmr.msra.gmra.mrb[0].mxu0 %vm829_vm2, %v12511_v32  ;;  %v12568_v32 = vld [vmem:[%s14959_s0 + $0x140] sm:$0xff]  }
 0x22a   :  { %11202 = vmatprep.mubr.msk.bf16.mxu0 %vm829_vm2, %v12512_v33  ;;  %v12569_v33 = vld [vmem:[%s14959_s0 + $0x148] sm:$0xff]  }
 0x231   :  { %11203 = vmatmul.mubr.msk.bf16.gmra.mrb[4].mxu0 %vm829_vm2, %v12513_v36  ;;  %v12576_v36 = vld [vmem:[%s14959_s0 + $0x160] sm:$0xff]  }
 0x232   :  { %11206 = vmatprep.mubr.msk.bf16.mxu0 %vm829_vm2, %v12514_v37  ;;  %v12577_v37 = vld [vmem:[%s14959_s0 + $0x168] sm:$0xff]  }
 0x239   :  { %11207 = vmatmul.mubr.msk.bf16.gmra.mrb[8].mxu0 %vm829_vm2, %v12515_v40  ;;  %v12584_v40 = vld [vmem:[%s14959_s0 + $0x180] sm:$0xff]  }
 0x23a   :  { %11210 = vmatprep.mubr.msk.bf16.mxu0 %vm829_vm2, %v12516_v41  ;;  %v12585_v41 = vld [vmem:[%s14959_s0 + $0x188] sm:$0xff]  }
 0x241   :  { %11211 = vmatmul.mubr.msk.bf16.gmra.mrb[12].mxu0 %vm829_vm2, %v12517_v44  ;;  %v12592_v44 = vld [vmem:[%s14959_s0 + $0x1a0] sm:$0xff]  }
 0x242   :  { %11214 = vmatprep.mubr.msk.bf16.mxu0 %vm829_vm2, %v12518_v45  ;;  %v12593_v45 = vld [vmem:[%s14959_s0 + $0x1a8] sm:$0xff]  }
 0x249   :  { %11215 = vmatmul.mubr.msk.bf16.gmra.mrb[16].mxu0 %vm829_vm2, %v12519_v48  ;;  %v12600_v48 = vld [vmem:[%s14959_s0 + $0x1c0] sm:$0xff]  }
 0x24a   :  { %11218 = vmatprep.mubr.msk.bf16.mxu0 %vm829_vm2, %v12520_v49  ;;  %v13690_v49 = vld [vmem:[%s14961_s2] ss:$0 sm:$0xff] }
 0x251   :  { %11219 = vmatmul.mubr.msk.bf16.gmra.mrb[20].mxu0 %vm829_vm2, %v12521_v52 }
 0x252   :  { %11222 = vmatprep.mubr.msk.bf16.mxu0 %vm829_vm2, %v12522_v53  ;;  %v12601_v53 = vld [vmem:[%s14959_s0 + $0x1c8] sm:$0xff]  }
 0x259   :  { %11223 = vmatmul.mubr.msk.bf16.gmra.mrb[24].mxu0 %vm829_vm2, %v12523_v56  ;;  %v12604_v56 = vld [vmem:[%s14959_s0 + $0x1d0] sm:$0xff]  }
 0x25a   :  { %11226 = vmatprep.mubr.msk.bf16.mxu0 %vm829_vm2, %v12524_v57 }
 0x261   :  { %11227 = vmatmul.mubr.msk.bf16.gmra.mrb[28].mxu0 %vm829_vm2, %v12525_v60 }
 0x262   :  { %11230 = vmatprep.mubr.msk.bf16.mxu0 %vm829_vm2, %v12526_v61 }
 0x269   :  { %11231 = vmatmul.mubr.msk.bf16.gmra.mrb[32].mxu0 %vm829_vm2, %v12527_v0 }
 0x26a   :  { %11234 = vmatprep.mubr.msk.bf16.mxu0 %vm829_vm2, %v12528_v1 }
 0x271   :  { %11235 = vmatmul.mubr.msk.bf16.gmra.mrb[36].mxu0 %vm829_vm2, %v12529_v4 }
 0x272   :  { %11238 = vmatprep.mubr.msk.bf16.mxu0 %vm829_vm2, %v12532_v5  ;;  %v12605_v5 = vld [vmem:[%s14959_s0 + $0x1d8] sm:$0xff]  }
 0x279   :  { %11239 = vmatmul.mubr.msk.bf16.gmra.mrb[40].mxu0 %vm829_vm2, %v12533_v8 }
 0x27a   :  { %11242 = vmatprep.mubr.msk.bf16.mxu0 %vm829_vm2, %v12536_v9  ;;  %v12608_v9 = vld [vmem:[%s14959_s0 + $0x1e0] sm:$0xff]  }
 0x281   :  { %11243 = vmatmul.mubr.msk.bf16.gmra.mrb[44].mxu0 %vm829_vm2, %v12537_v11 }
 0x282   :  { %11246 = vmatprep.mubr.msk.bf16.mxu0 %vm829_vm2, %v12540_v13 }
 0x289   :  { %11247 = vmatmul.mubr.msk.bf16.gmra.mrb[48].mxu0 %vm829_vm2, %v12541_v15 }
 0x28a   :  { %11250 = vmatprep.mubr.msk.bf16.mxu0 %vm829_vm2, %v12544_v17 }
 0x291   :  { %11251 = vmatmul.mubr.msk.bf16.gmra.mrb[52].mxu0 %vm829_vm2, %v12545_v19 }
 0x292   :  { %11254 = vmatprep.mubr.msk.bf16.mxu0 %vm829_vm2, %v12548_v21 }
 0x299   :  { %11255 = vmatmul.mubr.msk.bf16.gmra.mrb[56].mxu0 %vm829_vm2, %v12549_v23 }
 0x29a   :  { %11258 = vmatprep.mubr.msk.bf16.mxu0 %vm829_vm2, %v12552_v24 }
 0x2a1   :  { %11259 = vmatmul.mubr.msk.bf16.gmra.mrb[60].mxu0 %vm829_vm2, %v12553_v25 }
 0x2a2   :  { %11262 = vmatprep.mubr.msk.bf16.mxu0 %vm829_vm2, %v12556_v26  ;;  %v12611_v26 = vld [vmem:[%s14959_s0 + $0x1f0] sm:$0xff]  }
 0x2a9   :  { %11263 = vmatmul.mubr.msk.bf16.gmra.mrb[64].mxu0 %vm829_vm2, %v12557_v27 }
 0x2aa   :  { %11266 = vmatprep.mubr.msk.bf16.mxu0 %vm829_vm2, %v12560_v28 }
 0x2b1   :  { %11267 = vmatmul.mubr.msk.bf16.gmra.mrb[68].mxu0 %vm829_vm2, %v12561_v29 }
 0x2b2   :  { %11270 = vmatprep.mubr.msk.bf16.mxu0 %vm829_vm2, %v12564_v30 }
 0x2b9   :  { %11271 = vmatmul.mubr.msk.bf16.gmra.mrb[72].mxu0 %vm829_vm2, %v12565_v31 }
 0x2ba   :  { %11274 = vmatprep.mubr.msk.bf16.mxu0 %vm829_vm2, %v12568_v32 }
 0x2c1   :  { %11275 = vmatmul.mubr.msk.bf16.gmra.mrb[76].mxu0 %vm829_vm2, %v12569_v33 }
 0x2c2   :  { %11278 = vmatprep.mubr.msk.bf16.mxu0 %vm829_vm2, %v12572_v34 }
 0x2c9   :  { %11279 = vmatmul.mubr.msk.bf16.gmra.mrb[80].mxu0 %vm829_vm2, %v12573_v35 }
 0x2ca   :  { %11282 = vmatprep.mubr.msk.bf16.mxu0 %vm829_vm2, %v12576_v36 }
 0x2d1   :  { %11283 = vmatmul.mubr.msk.bf16.gmra.mrb[84].mxu0 %vm829_vm2, %v12577_v37 }
 0x2d2   :  { %11286 = vmatprep.mubr.msk.bf16.mxu0 %vm829_vm2, %v12580_v38 }
 0x2d9   :  { %11287 = vmatmul.mubr.msk.bf16.gmra.mrb[88].mxu0 %vm829_vm2, %v12581_v39 }
 0x2da   :  { %11290 = vmatprep.mubr.msk.bf16.mxu0 %vm829_vm2, %v12584_v40  ;;  %v12612_v40 = vld [vmem:[%s14959_s0 + $0x1f8] sm:$0xff]  }
 0x2e1   :  { %11291 = vmatmul.mubr.msk.bf16.gmra.mrb[92].mxu0 %vm829_vm2, %v12585_v41 }
 0x2e2   :  { %11294 = vmatprep.mubr.msk.bf16.mxu0 %vm829_vm2, %v12588_v42 }
 0x2e9   :  { %11295 = vmatmul.mubr.msk.bf16.gmra.mrb[96].mxu0 %vm829_vm2, %v12589_v43 }
 0x2ea   :  { %11298 = vmatprep.mubr.msk.bf16.mxu0 %vm829_vm2, %v12592_v44  ;;  %v12613_v44 = vld [vmem:[%s14959_s0 + $0x200] sm:$0xff]  }
 0x2f1   :  { %11299 = vmatmul.mubr.msk.bf16.gmra.mrb[100].mxu0 %vm829_vm2, %v12593_v45 }
 0x2f2   :  { %11302 = vmatprep.mubr.msk.bf16.mxu0 %vm829_vm2, %v12596_v46 }
 0x2f9   :  { %11303 = vmatmul.mubr.msk.bf16.gmra.mrb[104].mxu0 %vm829_vm2, %v12597_v47 }
 0x2fa   :  { %11306 = vmatprep.mubr.msk.bf16.mxu0 %vm829_vm2, %v12600_v48 }
 0x2fc   :  { %v11200_v50 = vpop.f32.mrb[0].mxu0 }
 0x2fd   :  { %v5090_v51 = vadd.f32 %v11200_v50, %v13690_v49  ;;  %v4202_v52 = vpop.f32.mrb[1].mxu0 }
 0x2fe   :  { %v5088_v54 = vadd.f32 %v13690_v49, %v4202_v52  ;;  %v11201_v55 = vpop.f32.mrb[2].mxu0 }
 0x2ff   :  { %v5266_v57 = vmax.f32 %v5090_v51, 0.0  ;;  %v5091_v58 = vadd.f32 %v11201_v55, %v13690_v49  ;;  %v4205_v59 = vpop.f32.mrb[3].mxu0 }
 0x300   :  { %v5264_v60 = vmax.f32 %v5088_v54, 0.0  ;;  %v5089_v61 = vadd.f32 %v13690_v49, %v4205_v59  ;;  %v12614_v59 = vld [vmem:[%s14959_s0 + $0x208] sm:$0xff]  }
 0x301   :  { %v5267_v62 = vmax.f32 %v5091_v58, 0.0  ;;  %11307 = vmatmul.mubr.msk.bf16.gmra.mrb[108].mxu0 %vm829_vm2, %v12601_v53 }
 0x302   :  { %v5440_v63 = vmax.f32 %v5264_v60, %v5266_v57  ;;  %v5265_v0 = vmax.f32 %v5089_v61, 0.0  ;;  %11310 = vmatprep.mubr.msk.bf16.mxu0 %vm829_vm2, %v12604_v56 }
 0x304   :  { %v5441_v1 = vmax.f32 %v5265_v0, %v5267_v62  ;;  %v11204_v2 = vpop.f32.mrb[4].mxu0 }
 0x305   :  { %v5094_v3 = vadd.f32 %v11204_v2, %v13690_v49  ;;  %v4218_v4 = vpop.f32.mrb[5].mxu0 }
 0x306   :  { %v5532_v6 = vpack.c.bf16 %v5441_v1, %v5440_v63  ;;  %v5092_v7 = vadd.f32 %v13690_v49, %v4218_v4  ;;  %v11205_v8 = vpop.f32.mrb[6].mxu0  ;;  %v12615_v63 = vld [vmem:[%s14959_s0 + $0x210] sm:$0xff]  }
 0x307   :  { %v5270_v10 = vmax.f32 %v5094_v3, 0.0  ;;  %v5095_v11 = vadd.f32 %v11205_v8, %v13690_v49  ;;  %v4221_v12 = vpop.f32.mrb[7].mxu0 }
 0x308   :  { %5577 = vst.msk [vmem:[#allocation2 + $0x8] sm:$0xff] %vm5528_vm3, %v5532_v6  ;;  %v5268_v13 = vmax.f32 %v5092_v7, 0.0  ;;  %v5093_v14 = vadd.f32 %v13690_v49, %v4221_v12 }
 0x309   :  { %v5271_v15 = vmax.f32 %v5095_v11, 0.0  ;;  %11311 = vmatmul.mubr.msk.bf16.gmra.mrb[112].mxu0 %vm829_vm2, %v12605_v5 }
 0x30a   :  { %v5442_v16 = vmax.f32 %v5268_v13, %v5270_v10  ;;  %v5269_v17 = vmax.f32 %v5093_v14, 0.0  ;;  %11314 = vmatprep.mubr.msk.bf16.mxu0 %vm829_vm2, %v12608_v9  ;;  %v12616_v13 = vld [vmem:[%s14959_s0 + $0x218] sm:$0xff]  }
 0x30c   :  { %v5443_v18 = vmax.f32 %v5269_v17, %v5271_v15  ;;  %v11208_v19 = vpop.f32.mrb[8].mxu0  ;;  %v12617_v17 = vld [vmem:[%s14959_s0 + $0x220] sm:$0xff]  }
 0x30d   :  { %v5098_v20 = vadd.f32 %v11208_v19, %v13690_v49  ;;  %v4234_v21 = vpop.f32.mrb[9].mxu0 }
 0x30e   :  { %v5533_v23 = vpack.c.bf16 %v5443_v18, %v5442_v16  ;;  %v5096_v24 = vadd.f32 %v13690_v49, %v4234_v21  ;;  %v11209_v25 = vpop.f32.mrb[10].mxu0 }
 0x30f   :  { %v5274_v27 = vmax.f32 %v5098_v20, 0.0  ;;  %v5099_v28 = vadd.f32 %v11209_v25, %v13690_v49  ;;  %v4237_v29 = vpop.f32.mrb[11].mxu0  ;;  %v5667_v30 = vld [vmem:[#allocation2 + $0x8] sm:$0xff] }
 0x310   :  { %5578 = vst.msk [vmem:[#allocation2 + $0x10] sm:$0xff] %vm5528_vm3, %v5533_v23  ;;  %v5272_v31 = vmax.f32 %v5096_v24, 0.0  ;;  %v5097_v32 = vadd.f32 %v13690_v49, %v4237_v29  ;;  %11376 = vmatprep.mubr.msk.bf16.mxu1 %vm5528_vm3, %v5667_v30 }
 0x311   :  { %v5275_v33 = vmax.f32 %v5099_v28, 0.0  ;;  %11315 = vmatmul.mubr.msk.bf16.gmra.mrb[116].mxu0 %vm829_vm2, %v12609_v22 }
 0x312   :  { %v5444_v34 = vmax.f32 %v5272_v31, %v5274_v27  ;;  %v5273_v35 = vmax.f32 %v5097_v32, 0.0  ;;  %11318 = vmatprep.mubr.msk.bf16.mxu0 %vm829_vm2, %v12611_v26  ;;  %v12618_v31 = vld [vmem:[%s14959_s0 + $0x228] sm:$0xff]  }
 0x314   :  { %v5445_v36 = vmax.f32 %v5273_v35, %v5275_v33  ;;  %v11212_v37 = vpop.f32.mrb[12].mxu0  ;;  %v12619_v35 = vld [vmem:[%s14959_s0 + $0x230] sm:$0xff]  }
 0x315   :  { %v5102_v38 = vadd.f32 %v11212_v37, %v13690_v49  ;;  %v4250_v39 = vpop.f32.mrb[13].mxu0 }
 0x316   :  { %v5534_v41 = vpack.c.bf16 %v5445_v36, %v5444_v34  ;;  %v5100_v42 = vadd.f32 %v13690_v49, %v4250_v39  ;;  %v11213_v43 = vpop.f32.mrb[14].mxu0 }
 0x317   :  { %v5278_v45 = vmax.f32 %v5102_v38, 0.0  ;;  %v5103_v46 = vadd.f32 %v11213_v43, %v13690_v49  ;;  %v4253_v47 = vpop.f32.mrb[15].mxu0  ;;  %v5668_v48 = vld [vmem:[#allocation2 + $0x10] sm:$0xff] }
 0x318   :  { %5579 = vst.msk [vmem:[#allocation2 + $0x18] sm:$0xff] %vm5528_vm3, %v5534_v41  ;;  %v5276_v50 = vmax.f32 %v5100_v42, 0.0  ;;  %v5101_v51 = vadd.f32 %v13690_v49, %v4253_v47  ;;  %11377 = vmatmul.mubr.msk.bf16.vlgmr.msra.gmra.mrb[80].mxu1 %vm5528_vm3, %v5668_v48 }
 0x319   :  { %v5279_v52 = vmax.f32 %v5103_v46, 0.0  ;;  %11319 = vmatmul.mubr.msk.bf16.gmra.mrb[120].mxu0 %vm829_vm2, %v12612_v40 }
 0x31a   :  { %v5446_v53 = vmax.f32 %v5276_v50, %v5278_v45  ;;  %v5277_v54 = vmax.f32 %v5101_v51, 0.0  ;;  %11322 = vmatprep.mubr.msk.bf16.mxu0 %vm829_vm2, %v12613_v44  ;;  %v12620_v50 = vld [vmem:[%s14959_s0 + $0x238] sm:$0xff]  }
 0x31c   :  { %v5447_v55 = vmax.f32 %v5277_v54, %v5279_v52  ;;  %v11216_v56 = vpop.f32.mrb[16].mxu0  ;;  %v12621_v54 = vld [vmem:[%s14959_s0 + $0x240] sm:$0xff]  }
 0x31d   :  { %v5106_v57 = vadd.f32 %v11216_v56, %v13690_v49  ;;  %v4266_v58 = vpop.f32.mrb[17].mxu0 }
 0x31e   :  { %v5535_v60 = vpack.c.bf16 %v5447_v55, %v5446_v53  ;;  %v5104_v61 = vadd.f32 %v13690_v49, %v4266_v58  ;;  %v11217_v62 = vpop.f32.mrb[18].mxu0 }
 0x31f   :  { %v5282_v0 = vmax.f32 %v5106_v57, 0.0  ;;  %v5107_v1 = vadd.f32 %v11217_v62, %v13690_v49  ;;  %v4269_v2 = vpop.f32.mrb[19].mxu0  ;;  %v5669_v3 = vld [vmem:[#allocation2 + $0x18] sm:$0xff]  ;;  %v13801_v62 = vpop.f32.mrb[0].mxu1 }
 0x320   :  { %5580 = vst.msk [vmem:[#allocation2 + $0x20] sm:$0xff] %vm5528_vm3, %v5535_v60  ;;  %v5280_v4 = vmax.f32 %v5104_v61, 0.0  ;;  %v5105_v5 = vadd.f32 %v13690_v49, %v4269_v2  ;;  %11380 = vmatprep.mubr.msk.bf16.mxu1 %vm5528_vm3, %v5669_v3 }
 0x321   :  { %v5283_v6 = vmax.f32 %v5107_v1, 0.0  ;;  %11323 = vmatmul.mubr.msk.bf16.gmra.mrb[124].mxu0 %vm829_vm2, %v12614_v59  ;;  %v13804_v1 = vpop.f32.mrb[1].mxu1 }
 0x322   :  { %v5448_v7 = vmax.f32 %v5280_v4, %v5282_v0  ;;  %v5281_v8 = vmax.f32 %v5105_v5, 0.0  ;;  %11326 = vmatprep.mubr.msk.bf16.mxu0 %vm829_vm2, %v12615_v63  ;;  %v13806_v2 = vpop.f32.mrb[2].mxu1 }
 0x323   :  { %v13808_v5 = vpop.f32.mrb[3].mxu1 }
 0x324   :  { %v5449_v9 = vmax.f32 %v5281_v8, %v5283_v6  ;;  %v11220_v10 = vpop.f32.mrb[20].mxu0  ;;  %v12622_v8 = vld [vmem:[%s14959_s0 + $0x248] sm:$0xff]  }
 0x325   :  { %v5110_v11 = vadd.f32 %v11220_v10, %v13690_v49  ;;  %v4282_v12 = vpop.f32.mrb[21].mxu0 }
 0x326   :  { %v5536_v14 = vpack.c.bf16 %v5449_v9, %v5448_v7  ;;  %v5108_v15 = vadd.f32 %v13690_v49, %v4282_v12  ;;  %v11221_v16 = vpop.f32.mrb[22].mxu0  ;;  %v12623_v12 = vld [vmem:[%s14959_s0 + $0x250] sm:$0xff]  }
 0x327   :  { %v5286_v18 = vmax.f32 %v5110_v11, 0.0  ;;  %v5111_v19 = vadd.f32 %v11221_v16, %v13690_v49  ;;  %v4285_v20 = vpop.f32.mrb[23].mxu0  ;;  %v5670_v21 = vld [vmem:[#allocation2 + $0x20] sm:$0xff] }
 0x328   :  { %5581 = vst.msk [vmem:[#allocation2 + $0x28] sm:$0xff] %vm5528_vm3, %v5536_v14  ;;  %v5284_v22 = vmax.f32 %v5108_v15, 0.0  ;;  %v5109_v23 = vadd.f32 %v13690_v49, %v4285_v20  ;;  %11381 = vmatmul.mubr.msk.bf16.gmra.mrb[84].mxu1 %vm5528_vm3, %v5670_v21  ;;  %v13823_v20 = vpop.f32.mrb[4].mxu1 }
 0x329   :  { %v5287_v24 = vmax.f32 %v5111_v19, 0.0  ;;  %11327 = vmatmul.mubr.msk.bf16.gmra.mrb[128].mxu0 %vm829_vm2, %v12616_v13 }
 0x32a   :  { %v5450_v25 = vmax.f32 %v5284_v22, %v5286_v18  ;;  %v5285_v26 = vmax.f32 %v5109_v23, 0.0  ;;  %11330 = vmatprep.mubr.msk.bf16.mxu0 %vm829_vm2, %v12617_v17  ;;  %v13826_v23 = vpop.f32.mrb[5].mxu1 }
 0x32c   :  { %v5451_v27 = vmax.f32 %v5285_v26, %v5287_v24  ;;  %v11224_v28 = vpop.f32.mrb[24].mxu0  ;;  %v13828_v24 = vpop.f32.mrb[6].mxu1 }
 0x32d   :  { %v5114_v29 = vadd.f32 %v11224_v28, %v13690_v49  ;;  %v4298_v30 = vpop.f32.mrb[25].mxu0 }
 0x32e   :  { %v5537_v32 = vpack.c.bf16 %v5451_v27, %v5450_v25  ;;  %v5112_v33 = vadd.f32 %v13690_v49, %v4298_v30  ;;  %v11225_v34 = vpop.f32.mrb[26].mxu0  ;;  %v13830_v27 = vpop.f32.mrb[7].mxu1  ;;  %v12624_v30 = vld [vmem:[%s14959_s0 + $0x258] sm:$0xff]  }
 0x32f   :  { %v5290_v36 = vmax.f32 %v5114_v29, 0.0  ;;  %v5115_v37 = vadd.f32 %v11225_v34, %v13690_v49  ;;  %v4301_v38 = vpop.f32.mrb[27].mxu0  ;;  %v5671_v39 = vld [vmem:[#allocation2 + $0x28] sm:$0xff]  ;;  %v12625_v34 = vld [vmem:[%s14959_s0 + $0x260] sm:$0xff]  }
 0x330   :  { %5582 = vst.msk [vmem:[#allocation2 + $0x30] sm:$0xff] %vm5528_vm3, %v5537_v32  ;;  %v5288_v40 = vmax.f32 %v5112_v33, 0.0  ;;  %v5113_v41 = vadd.f32 %v13690_v49, %v4301_v38  ;;  %11384 = vmatprep.mubr.msk.bf16.mxu1 %vm5528_vm3, %v5671_v39 }
 0x331   :  { %v5291_v42 = vmax.f32 %v5115_v37, 0.0  ;;  %11331 = vmatmul.mubr.msk.bf16.gmra.mrb[132].mxu0 %vm829_vm2, %v12618_v31 }
 0x332   :  { %v5452_v43 = vmax.f32 %v5288_v40, %v5290_v36  ;;  %v5289_v44 = vmax.f32 %v5113_v41, 0.0  ;;  %11334 = vmatprep.mubr.msk.bf16.mxu0 %vm829_vm2, %v12619_v35 }
 0x334   :  { %v5453_v45 = vmax.f32 %v5289_v44, %v5291_v42  ;;  %v11228_v46 = vpop.f32.mrb[28].mxu0  ;;  %v13845_v42 = vpop.f32.mrb[8].mxu1 }
 0x335   :  { %v5118_v47 = vadd.f32 %v11228_v46, %v13690_v49  ;;  %v4314_v48 = vpop.f32.mrb[29].mxu0  ;;  %v13851_v46 = vpop.f32.mrb[9].mxu1 }
 0x336   :  { %v5538_v51 = vpack.c.bf16 %v5453_v45, %v5452_v43  ;;  %v5116_v52 = vadd.f32 %v13690_v49, %v4314_v48  ;;  %v11229_v53 = vpop.f32.mrb[30].mxu0  ;;  %v12639_v45 = vld [vmem:[%s14960_s3] sm:$0xff]  }
 0x337   :  { %v5294_v55 = vmax.f32 %v5118_v47, 0.0  ;;  %v5119_v56 = vadd.f32 %v11229_v53, %v13690_v49  ;;  %v4317_v57 = vpop.f32.mrb[31].mxu0  ;;  %v5672_v58 = vld [vmem:[#allocation2 + $0x30] sm:$0xff]  ;;  %v13853_v47 = vpop.f32.mrb[10].mxu1  ;;  %11464 = vmatprep.subr.bf16.mxu1 %v12639_v45 }
 0x338   :  { %5583 = vst.msk [vmem:[#allocation2 + $0x38] sm:$0xff] %vm5528_vm3, %v5538_v51  ;;  %v5292_v59 = vmax.f32 %v5116_v52, 0.0  ;;  %v5117_v60 = vadd.f32 %v13690_v49, %v4317_v57  ;;  %11385 = vmatmul.mubr.msk.bf16.gmra.mrb[88].mxu1 %vm5528_vm3, %v5672_v58  ;;  %v13855_v51 = vpop.f32.mrb[11].mxu1  ;;  %v12627_v58 = vld [vmem:[%s14959_s0 + $0x270] sm:$0xff]  }
 0x339   :  { %v5295_v61 = vmax.f32 %v5119_v56, 0.0  ;;  %11335 = vmatmul.mubr.msk.bf16.gmra.mrb[136].mxu0 %vm829_vm2, %v12620_v50  ;;  %11465 = vmatpush3.bf16.msra.mxu1 %v12639_v45 }
 0x33a   :  { %v5454_v63 = vmax.f32 %v5292_v59, %v5294_v55  ;;  %v5293_v0 = vmax.f32 %v5117_v60, 0.0  ;;  %11338 = vmatprep.mubr.msk.bf16.mxu0 %vm829_vm2, %v12621_v54  ;;  %v12626_v54 = vld [vmem:[%s14959_s0 + $0x268] sm:$0xff]  }
 0x33c   :  { %v5455_v3 = vmax.f32 %v5293_v0, %v5295_v61  ;;  %v11232_v4 = vpop.f32.mrb[32].mxu0 }
 0x33d   :  { %v5122_v6 = vadd.f32 %v11232_v4, %v13690_v49  ;;  %v4330_v7 = vpop.f32.mrb[33].mxu0 }
 0x33e   :  { %v5539_v9 = vpack.c.bf16 %v5455_v3, %v5454_v63  ;;  %v5120_v10 = vadd.f32 %v13690_v49, %v4330_v7  ;;  %v11233_v11 = vpop.f32.mrb[34].mxu0 }
 0x33f   :  { %v5298_v13 = vmax.f32 %v5122_v6, 0.0  ;;  %v5123_v14 = vadd.f32 %v11233_v11, %v13690_v49  ;;  %v4333_v15 = vpop.f32.mrb[35].mxu0  ;;  %v5673_v16 = vld [vmem:[#allocation2 + $0x38] sm:$0xff]  ;;  %v13870_v6 = vpop.f32.mrb[12].mxu1 }
 0x340   :  { %5584 = vst.msk [vmem:[#allocation2 + $0x40] sm:$0xff] %vm5528_vm3, %v5539_v9  ;;  %v5296_v17 = vmax.f32 %v5120_v10, 0.0  ;;  %v5121_v18 = vadd.f32 %v13690_v49, %v4333_v15  ;;  %11388 = vmatprep.mubr.msk.bf16.mxu1 %vm5528_vm3, %v5673_v16  ;;  %v13873_v9 = vpop.f32.mrb[13].mxu1  ;;  %v12628_v16 = vld [vmem:[%s14959_s0 + $0x278] sm:$0xff]  }
 0x341   :  { %v5299_v19 = vmax.f32 %v5123_v14, 0.0  ;;  %11339 = vmatmul.mubr.msk.bf16.gmra.mrb[140].mxu0 %vm829_vm2, %v12622_v8  ;;  %v13875_v10 = vpop.f32.mrb[14].mxu1 }
 0x342   :  { %v5456_v21 = vmax.f32 %v5296_v17, %v5298_v13  ;;  %v5297_v22 = vmax.f32 %v5121_v18, 0.0  ;;  %11342 = vmatprep.mubr.msk.bf16.mxu0 %vm829_vm2, %v12623_v12  ;;  %v13877_v13 = vpop.f32.mrb[15].mxu1 }
 0x344   :  { %v5457_v25 = vmax.f32 %v5297_v22, %v5299_v19  ;;  %v11236_v26 = vpop.f32.mrb[36].mxu0 }
 0x345   :  { %v5126_v28 = vadd.f32 %v11236_v26, %v13690_v49  ;;  %v4346_v29 = vpop.f32.mrb[37].mxu0 }
 0x346   :  { %v5540_v31 = vpack.c.bf16 %v5457_v25, %v5456_v21  ;;  %v5124_v32 = vadd.f32 %v13690_v49, %v4346_v29  ;;  %v11237_v33 = vpop.f32.mrb[38].mxu0  ;;  %v12629_v21 = vld [vmem:[%s14959_s0 + $0x280] sm:$0xff]  }
 0x347   :  { %v5302_v35 = vmax.f32 %v5126_v28, 0.0  ;;  %v5127_v36 = vadd.f32 %v11237_v33, %v13690_v49  ;;  %v4349_v37 = vpop.f32.mrb[39].mxu0  ;;  %v5674_v38 = vld [vmem:[#allocation2 + $0x40] sm:$0xff] }
 0x348   :  { %5585 = vst.msk [vmem:[#allocation2 + $0x48] sm:$0xff] %vm5528_vm3, %v5540_v31  ;;  %v5300_v39 = vmax.f32 %v5124_v32, 0.0  ;;  %v5125_v40 = vadd.f32 %v13690_v49, %v4349_v37  ;;  %11389 = vmatmul.mubr.msk.bf16.gmra.mrb[92].mxu1 %vm5528_vm3, %v5674_v38  ;;  %v13892_v32 = vpop.f32.mrb[16].mxu1 }
 0x349   :  { %v5303_v41 = vmax.f32 %v5127_v36, 0.0  ;;  %11343 = vmatmul.mubr.msk.bf16.gmra.mrb[144].mxu0 %vm829_vm2, %v12624_v30 }
 0x34a   :  { %v5458_v43 = vmax.f32 %v5300_v39, %v5302_v35  ;;  %v5301_v44 = vmax.f32 %v5125_v40, 0.0  ;;  %11346 = vmatprep.mubr.msk.bf16.mxu0 %vm829_vm2, %v12625_v34  ;;  %v13895_v35 = vpop.f32.mrb[17].mxu1 }
 0x34b   :  { %v13897_v36 = vpop.f32.mrb[18].mxu1 }
 0x34c   :  { %v5459_v48 = vmax.f32 %v5301_v44, %v5303_v41  ;;  %v11240_v50 = vpop.f32.mrb[40].mxu0  ;;  %v13899_v39 = vpop.f32.mrb[19].mxu1 }
 0x34d   :  { %v5130_v52 = vadd.f32 %v11240_v50, %v13690_v49  ;;  %v4362_v53 = vpop.f32.mrb[41].mxu0  ;;  %v12631_v50 = vld [vmem:[%s14959_s0 + $0x290] sm:$0xff]  }
 0x34e   :  { %v5541_v55 = vpack.c.bf16 %v5459_v48, %v5458_v43  ;;  %v5128_v56 = vadd.f32 %v13690_v49, %v4362_v53  ;;  %v11241_v57 = vpop.f32.mrb[42].mxu0  ;;  %v12630_v43 = vld [vmem:[%s14959_s0 + $0x288] sm:$0xff]  }
 0x34f   :  { %v5306_v59 = vmax.f32 %v5130_v52, 0.0  ;;  %v5131_v60 = vadd.f32 %v11241_v57, %v13690_v49  ;;  %v4365_v61 = vpop.f32.mrb[43].mxu0  ;;  %v5675_v63 = vld [vmem:[#allocation2 + $0x48] sm:$0xff] }
 0x350   :  { %5586 = vst.msk [vmem:[#allocation2 + $0x50] sm:$0xff] %vm5528_vm3, %v5541_v55  ;;  %v5304_v0 = vmax.f32 %v5128_v56, 0.0  ;;  %v5129_v3 = vadd.f32 %v13690_v49, %v4365_v61  ;;  %11392 = vmatprep.mubr.msk.bf16.mxu1 %vm5528_vm3, %v5675_v63 }
 0x351   :  { %v5307_v4 = vmax.f32 %v5131_v60, 0.0  ;;  %11347 = vmatmul.mubr.msk.bf16.gmra.mrb[148].mxu0 %vm829_vm2, %v12626_v54 }
 0x352   :  { %v5460_v7 = vmax.f32 %v5304_v0, %v5306_v59  ;;  %v5305_v8 = vmax.f32 %v5129_v3, 0.0  ;;  %11350 = vmatprep.mubr.msk.bf16.mxu0 %vm829_vm2, %v12627_v58  ;;  %v13914_v59 = vpop.f32.mrb[20].mxu1 }
 0x353   :  { %v13917_v63 = vpop.f32.mrb[21].mxu1 }
 0x354   :  { %v5461_v11 = vmax.f32 %v5305_v8, %v5307_v4  ;;  %v11244_v12 = vpop.f32.mrb[44].mxu0  ;;  %v13919_v0 = vpop.f32.mrb[22].mxu1 }
 0x355   :  { %v5134_v14 = vadd.f32 %v11244_v12, %v13690_v49  ;;  %v4378_v15 = vpop.f32.mrb[45].mxu0  ;;  %v12632_v12 = vld [vmem:[%s14959_s0 + $0x298] sm:$0xff]  }
 0x356   :  { %v5542_v17 = vpack.c.bf16 %v5461_v11, %v5460_v7  ;;  %v5132_v18 = vadd.f32 %v13690_v49, %v4378_v15  ;;  %v11245_v19 = vpop.f32.mrb[46].mxu0  ;;  %v13921_v7 = vpop.f32.mrb[23].mxu1 }
 0x357   :  { %v5310_v22 = vmax.f32 %v5134_v14, 0.0  ;;  %v5135_v25 = vadd.f32 %v11245_v19, %v13690_v49  ;;  %v4381_v26 = vpop.f32.mrb[47].mxu0  ;;  %v5676_v28 = vld [vmem:[#allocation2 + $0x50] sm:$0xff] }
 0x358   :  { %5587 = vst.msk [vmem:[#allocation2 + $0x58] sm:$0xff] %vm5528_vm3, %v5542_v17  ;;  %v5308_v29 = vmax.f32 %v5132_v18, 0.0  ;;  %v5133_v30 = vadd.f32 %v13690_v49, %v4381_v26  ;;  %11393 = vmatmul.mubr.msk.bf16.gmra.mrb[96].mxu1 %vm5528_vm3, %v5676_v28  ;;  %v12633_v17 = vld [vmem:[%s14959_s0 + $0x2a0] sm:$0xff]  }
 0x359   :  { %v5311_v31 = vmax.f32 %v5135_v25, 0.0  ;;  %11351 = vmatmul.mubr.msk.bf16.gmra.mrb[152].mxu0 %vm829_vm2, %v12628_v16 }
 0x35a   :  { %v5462_v33 = vmax.f32 %v5308_v29, %v5310_v22  ;;  %v5309_v34 = vmax.f32 %v5133_v30, 0.0  ;;  %11354 = vmatprep.mubr.msk.bf16.mxu0 %vm829_vm2, %v12629_v21  ;;  %v13936_v29 = vpop.f32.mrb[24].mxu1 }
 0x35c   :  { %v5463_v37 = vmax.f32 %v5309_v34, %v5311_v31  ;;  %v11248_v38 = vpop.f32.mrb[48].mxu0 }
 0x35d   :  { %v5138_v40 = vadd.f32 %v11248_v38, %v13690_v49  ;;  %v4394_v41 = vpop.f32.mrb[49].mxu0 }
 0x35e   :  { %v5543_v44 = vpack.c.bf16 %v5463_v37, %v5462_v33  ;;  %v5136_v45 = vadd.f32 %v13690_v49, %v4394_v41  ;;  %v11249_v48 = vpop.f32.mrb[50].mxu0  ;;  %v13939_v33 = vpop.f32.mrb[25].mxu1 }
 0x35f   :  { %v5314_v52 = vmax.f32 %v5138_v40, 0.0  ;;  %v5139_v53 = vadd.f32 %v11249_v48, %v13690_v49  ;;  %v4397_v54 = vpop.f32.mrb[51].mxu0  ;;  %v5677_v55 = vld [vmem:[#allocation2 + $0x58] sm:$0xff]  ;;  %v13941_v34 = vpop.f32.mrb[26].mxu1 }
 0x360   :  { %5588 = vst.msk [vmem:[#allocation2 + $0x60] sm:$0xff] %vm5528_vm3, %v5543_v44  ;;  %v5312_v56 = vmax.f32 %v5136_v45, 0.0  ;;  %v5137_v57 = vadd.f32 %v13690_v49, %v4397_v54  ;;  %11396 = vmatprep.mubr.msk.bf16.mxu1 %vm5528_vm3, %v5677_v55  ;;  %v13943_v40 = vpop.f32.mrb[27].mxu1  ;;  %v12634_v44 = vld [vmem:[%s14959_s0 + $0x2a8] sm:$0xff]  }
 0x361   :  { %v5315_v58 = vmax.f32 %v5139_v53, 0.0  ;;  %11355 = vmatmul.mubr.msk.bf16.gmra.mrb[156].mxu0 %vm829_vm2, %v12630_v43 }
 0x362   :  { %v5464_v60 = vmax.f32 %v5312_v56, %v5314_v52  ;;  %v5313_v61 = vmax.f32 %v5137_v57, 0.0  ;;  %11358 = vmatprep.mubr.msk.bf16.mxu0 %vm829_vm2, %v12631_v50  ;;  %v12635_v52 = vld [vmem:[%s14959_s0 + $0x2b0] sm:$0xff]  }
 0x364   :  { %v5465_v3 = vmax.f32 %v5313_v61, %v5315_v58  ;;  %v11252_v4 = vpop.f32.mrb[52].mxu0  ;;  %v13958_v61 = vpop.f32.mrb[28].mxu1 }
 0x365   :  { %v5142_v8 = vadd.f32 %v11252_v4, %v13690_v49  ;;  %v4410_v11 = vpop.f32.mrb[53].mxu0 }
 0x366   :  { %v5544_v14 = vpack.c.bf16 %v5465_v3, %v5464_v60  ;;  %v5140_v15 = vadd.f32 %v13690_v49, %v4410_v11  ;;  %v11253_v16 = vpop.f32.mrb[54].mxu0 }
 0x367   :  { %v5318_v18 = vmax.f32 %v5142_v8, 0.0  ;;  %v5143_v19 = vadd.f32 %v11253_v16, %v13690_v49  ;;  %v4413_v21 = vpop.f32.mrb[55].mxu0  ;;  %v5678_v22 = vld [vmem:[#allocation2 + $0x60] sm:$0xff]  ;;  %v13961_v8 = vpop.f32.mrb[29].mxu1 }
 0x368   :  { %5589 = vst.msk [vmem:[#allocation2 + $0x68] sm:$0xff] %vm5528_vm3, %v5544_v14  ;;  %v5316_v25 = vmax.f32 %v5140_v15, 0.0  ;;  %v5141_v26 = vadd.f32 %v13690_v49, %v4413_v21  ;;  %11397 = vmatmul.mubr.msk.bf16.gmra.mrb[100].mxu1 %vm5528_vm3, %v5678_v22  ;;  %v13963_v11 = vpop.f32.mrb[30].mxu1 }
 0x369   :  { %v5319_v28 = vmax.f32 %v5143_v19, 0.0  ;;  %11359 = vmatmul.mubr.msk.bf16.gmra.mrb[160].mxu0 %vm829_vm2, %v12632_v12  ;;  %v13965_v15 = vpop.f32.mrb[31].mxu1 }
 0x36a   :  { %v5466_v30 = vmax.f32 %v5316_v25, %v5318_v18  ;;  %v5317_v31 = vmax.f32 %v5141_v26, 0.0  ;;  %11362 = vmatprep.mubr.msk.bf16.mxu0 %vm829_vm2, %v12633_v17  ;;  %v12636_v18 = vld [vmem:[%s14959_s0 + $0x2b8] sm:$0xff]   ;;  %v12637_v25 = vld [vmem:[%s14959_s0 + $0x2c0] sm:$0xff]  }
 0x36c   :  { %v5467_v37 = vmax.f32 %v5317_v31, %v5319_v28  ;;  %v11256_v38 = vpop.f32.mrb[56].mxu0 }
 0x36d   :  { %v5146_v41 = vadd.f32 %v11256_v38, %v13690_v49  ;;  %v4426_v43 = vpop.f32.mrb[57].mxu0 }
 0x36e   :  { %v5545_v45 = vpack.c.bf16 %v5467_v37, %v5466_v30  ;;  %v5144_v48 = vadd.f32 %v13690_v49, %v4426_v43  ;;  %v11257_v50 = vpop.f32.mrb[58].mxu0  ;;  %v13980_v43 = vpop.f32.mrb[32].mxu1 }
 0x36f   :  { %v5322_v53 = vmax.f32 %v5146_v41, 0.0  ;;  %v5147_v54 = vadd.f32 %v11257_v50, %v13690_v49  ;;  %v4429_v55 = vpop.f32.mrb[59].mxu0  ;;  %v5679_v56 = vld [vmem:[#allocation2 + $0x68] sm:$0xff] }
 0x370   :  { %5590 = vst.msk [vmem:[#allocation2 + $0x70] sm:$0xff] %vm5528_vm3, %v5545_v45  ;;  %v5320_v57 = vmax.f32 %v5144_v48, 0.0  ;;  %v5145_v58 = vadd.f32 %v13690_v49, %v4429_v55  ;;  %11400 = vmatprep.mubr.msk.bf16.mxu1 %vm5528_vm3, %v5679_v56  ;;  %v13983_v48 = vpop.f32.mrb[33].mxu1 }
 0x371   :  { %v5323_v60 = vmax.f32 %v5147_v54, 0.0  ;;  %11363 = vmatmul.mubr.msk.bf16.gmra.mrb[164].mxu0 %vm829_vm2, %v12634_v44  ;;  %v13985_v50 = vpop.f32.mrb[34].mxu1 }
 0x372   :  { %v5468_v3 = vmax.f32 %v5320_v57, %v5322_v53  ;;  %v5321_v4 = vmax.f32 %v5145_v58, 0.0  ;;  %11366 = vmatprep.mubr.msk.bf16.mxu0 %vm829_vm2, %v12635_v52  ;;  %v13987_v54 = vpop.f32.mrb[35].mxu1  ;;  %v12638_v57 = vld [vmem:[%s14959_s0 + $0x2c8] sm:$0xff]  }
 0x374   :  { %v5469_v12 = vmax.f32 %v5321_v4, %v5323_v60  ;;  %v11260_v14 = vpop.f32.mrb[60].mxu0 }
 0x375   :  { %v5150_v16 = vadd.f32 %v11260_v14, %v13690_v49  ;;  %v4442_v17 = vpop.f32.mrb[61].mxu0 }
 0x376   :  { %v5546_v19 = vpack.c.bf16 %v5469_v12, %v5468_v3  ;;  %v5148_v21 = vadd.f32 %v13690_v49, %v4442_v17  ;;  %v11261_v22 = vpop.f32.mrb[62].mxu0 }
 0x377   :  { %v5326_v26 = vmax.f32 %v5150_v16, 0.0  ;;  %v5151_v28 = vadd.f32 %v11261_v22, %v13690_v49  ;;  %v4445_v30 = vpop.f32.mrb[63].mxu0  ;;  %v5680_v31 = vld [vmem:[#allocation2 + $0x70] sm:$0xff] }
 0x378   :  { %5591 = vst.msk [vmem:[#allocation2 + $0x78] sm:$0xff] %vm5528_vm3, %v5546_v19  ;;  %v5324_v37 = vmax.f32 %v5148_v21, 0.0  ;;  %v5149_v38 = vadd.f32 %v13690_v49, %v4445_v30  ;;  %11401 = vmatmul.mubr.msk.bf16.gmra.mrb[104].mxu1 %vm5528_vm3, %v5680_v31  ;;  %v13999_v21 = vpop.f32.mrb[36].mxu1 }
 0x379   :  { %v5327_v41 = vmax.f32 %v5151_v28, 0.0  ;;  %11367 = vmatmul.mubr.msk.bf16.gmra.mrb[168].mxu0 %vm829_vm2, %v12636_v18 }
 0x37a   :  { %v5470_v44 = vmax.f32 %v5324_v37, %v5326_v26  ;;  %v5325_v45 = vmax.f32 %v5149_v38, 0.0  ;;  %11370 = vmatprep.mubr.msk.bf16.mxu0 %vm829_vm2, %v12637_v25  ;;  %v14001_v26 = vpop.f32.mrb[37].mxu1 }
 0x37b   :  { %v14003_v28 = vpop.f32.mrb[38].mxu1 }
 0x37c   :  { %v5471_v52 = vmax.f32 %v5325_v45, %v5327_v41  ;;  %v11264_v53 = vpop.f32.mrb[64].mxu0  ;;  %v14005_v37 = vpop.f32.mrb[39].mxu1 }
 0x37d   :  { %v5154_v55 = vadd.f32 %v11264_v53, %v13690_v49  ;;  %v4458_v56 = vpop.f32.mrb[65].mxu0 }
 0x37e   :  { %v5547_v58 = vpack.c.bf16 %v5471_v52, %v5470_v44  ;;  %v5152_v60 = vadd.f32 %v13690_v49, %v4458_v56  ;;  %v11265_v3 = vpop.f32.mrb[66].mxu0 }
 0x37f   :  { %v5330_v4 = vmax.f32 %v5154_v55, 0.0  ;;  %v5155_v12 = vadd.f32 %v11265_v3, %v13690_v49  ;;  %v4461_v14 = vpop.f32.mrb[67].mxu0  ;;  %v5681_v16 = vld [vmem:[#allocation2 + $0x78] sm:$0xff] }
 0x380   :  { %5592 = vst.msk [vmem:[#allocation2 + $0x80] sm:$0xff] %vm5528_vm3, %v5547_v58  ;;  %v5328_v17 = vmax.f32 %v5152_v60, 0.0  ;;  %v5153_v18 = vadd.f32 %v13690_v49, %v4461_v14  ;;  %11404 = vmatprep.mubr.msk.bf16.mxu1 %vm5528_vm3, %v5681_v16 }
 0x381   :  { %v5331_v19 = vmax.f32 %v5155_v12, 0.0  ;;  %11371 = vmatmul.mubr.msk.bf16.gmra.mrb[172].mxu0 %vm829_vm2, %v12638_v57 }
 0x382   :  { %v5472_v22 = vmax.f32 %v5328_v17, %v5330_v4  ;;  %v5329_v25 = vmax.f32 %v5153_v18, 0.0  ;;  %v14013_v4 = vpop.f32.mrb[40].mxu1 }
 0x383   :  { %v14015_v16 = vpop.f32.mrb[41].mxu1 }
 0x384   :  { %v5473_v30 = vmax.f32 %v5329_v25, %v5331_v19  ;;  %v11268_v31 = vpop.f32.mrb[68].mxu0  ;;  %v14017_v17 = vpop.f32.mrb[42].mxu1 }
 0x385   :  { %v5158_v38 = vadd.f32 %v11268_v31, %v13690_v49  ;;  %v4474_v41 = vpop.f32.mrb[69].mxu0 }
 0x386   :  { %v5548_v44 = vpack.c.bf16 %v5473_v30, %v5472_v22  ;;  %v5156_v45 = vadd.f32 %v13690_v49, %v4474_v41  ;;  %v11269_v52 = vpop.f32.mrb[70].mxu0  ;;  %v14019_v22 = vpop.f32.mrb[43].mxu1 }
 0x387   :  { %v5334_v53 = vmax.f32 %v5158_v38, 0.0  ;;  %v5159_v55 = vadd.f32 %v11269_v52, %v13690_v49  ;;  %v4477_v56 = vpop.f32.mrb[71].mxu0  ;;  %v5682_v57 = vld [vmem:[#allocation2 + $0x80] sm:$0xff] }
 0x388   :  { %5593 = vst.msk [vmem:[#allocation2 + $0x88] sm:$0xff] %vm5528_vm3, %v5548_v44  ;;  %v5332_v58 = vmax.f32 %v5156_v45, 0.0  ;;  %v5157_v60 = vadd.f32 %v13690_v49, %v4477_v56  ;;  %11405 = vmatmul.mubr.msk.bf16.gmra.mrb[108].mxu1 %vm5528_vm3, %v5682_v57 }
 0x389   :  { %v5335_v3 = vmax.f32 %v5159_v55, 0.0 }
 0x38a   :  { %v5474_v12 = vmax.f32 %v5332_v58, %v5334_v53  ;;  %v5333_v14 = vmax.f32 %v5157_v60, 0.0  ;;  %v14027_v58 = vpop.f32.mrb[44].mxu1 }
 0x38c   :  { %v5475_v18 = vmax.f32 %v5333_v14, %v5335_v3  ;;  %v11272_v19 = vpop.f32.mrb[72].mxu0 }
 0x38d   :  { %v5162_v25 = vadd.f32 %v11272_v19, %v13690_v49  ;;  %v4490_v30 = vpop.f32.mrb[73].mxu0 }
 0x38e   :  { %v5549_v31 = vpack.c.bf16 %v5475_v18, %v5474_v12  ;;  %v5160_v38 = vadd.f32 %v13690_v49, %v4490_v30  ;;  %v11273_v41 = vpop.f32.mrb[74].mxu0  ;;  %v14029_v12 = vpop.f32.mrb[45].mxu1 }
 0x38f   :  { %v5338_v44 = vmax.f32 %v5162_v25, 0.0  ;;  %v5163_v45 = vadd.f32 %v11273_v41, %v13690_v49  ;;  %v4493_v52 = vpop.f32.mrb[75].mxu0  ;;  %v5683_v53 = vld [vmem:[#allocation2 + $0x88] sm:$0xff]  ;;  %14969 = vst [vmem:[#allocation3_spill] sm:$0xff] %v14029_v12  ;;  %v14031_v14 = vpop.f32.mrb[46].mxu1 }
 0x390   :  { %5594 = vst.msk [vmem:[#allocation2 + $0x90] sm:$0xff] %vm5528_vm3, %v5549_v31  ;;  %v5336_v55 = vmax.f32 %v5160_v38, 0.0  ;;  %v5161_v56 = vadd.f32 %v13690_v49, %v4493_v52  ;;  %11408 = vmatprep.mubr.msk.bf16.mxu1 %vm5528_vm3, %v5683_v53  ;;  %14970 = vst [vmem:[#allocation4_spill] sm:$0xff] %v14031_v14  ;;  %v14033_v25 = vpop.f32.mrb[47].mxu1 }
 0x391   :  { %v5339_v57 = vmax.f32 %v5163_v45, 0.0  ;;  %14971 = vst [vmem:[#allocation5_spill] sm:$0xff] %v14033_v25  ;;  %v14041_v25 = vpop.f32.mrb[48].mxu1 }
 0x392   :  { %v5476_v60 = vmax.f32 %v5336_v55, %v5338_v44  ;;  %v5337_v3 = vmax.f32 %v5161_v56, 0.0  ;;  %14972 = vst [vmem:[#allocation6_spill] sm:$0xff] %v14041_v25 }
 0x394   :  { %v5477_v18 = vmax.f32 %v5337_v3, %v5339_v57  ;;  %v11276_v19 = vpop.f32.mrb[76].mxu0 }
 0x395   :  { %v5166_v30 = vadd.f32 %v11276_v19, %v13690_v49  ;;  %v4506_v31 = vpop.f32.mrb[77].mxu0 }
 0x396   :  { %v5550_v38 = vpack.c.bf16 %v5477_v18, %v5476_v60  ;;  %v5164_v41 = vadd.f32 %v13690_v49, %v4506_v31  ;;  %v11277_v52 = vpop.f32.mrb[78].mxu0  ;;  %v14043_v18 = vpop.f32.mrb[49].mxu1 }
 0x397   :  { %v5342_v45 = vmax.f32 %v5166_v30, 0.0  ;;  %v5167_v53 = vadd.f32 %v11277_v52, %v13690_v49  ;;  %v4509_v44 = vpop.f32.mrb[79].mxu0  ;;  %v5684_v55 = vld [vmem:[#allocation2 + $0x90] sm:$0xff]  ;;  %14973 = vst [vmem:[#allocation7_spill] sm:$0xff] %v14043_v18  ;;  %v14045_v31 = vpop.f32.mrb[50].mxu1 }
 0x398   :  { %5595 = vst.msk [vmem:[#allocation2 + $0x98] sm:$0xff] %vm5528_vm3, %v5550_v38  ;;  %v5340_v56 = vmax.f32 %v5164_v41, 0.0  ;;  %v5165_v57 = vadd.f32 %v13690_v49, %v4509_v44  ;;  %11409 = vmatmul.mubr.msk.bf16.gmra.mrb[112].mxu1 %vm5528_vm3, %v5684_v55  ;;  %14974 = vst [vmem:[#allocation8_spill] sm:$0xff] %v14045_v31  ;;  %v14047_v14 = vpop.f32.mrb[51].mxu1 }
 0x399   :  { %v5343_v3 = vmax.f32 %v5167_v53, 0.0  ;;  %14975 = vst [vmem:[#allocation9_spill] sm:$0xff] %v14047_v14  ;;  %v14055_v14 = vpop.f32.mrb[52].mxu1 }
 0x39a   :  { %v5478_v19 = vmax.f32 %v5340_v56, %v5342_v45  ;;  %v5341_v60 = vmax.f32 %v5165_v57, 0.0  ;;  %14976 = vst [vmem:[#allocation10_spill] sm:$0xff] %v14055_v14 }
 0x39c   :  { %v5479_v30 = vmax.f32 %v5341_v60, %v5343_v3  ;;  %v11280_v52 = vpop.f32.mrb[80].mxu0 }
 0x39d   :  { %v5170_v38 = vadd.f32 %v11280_v52, %v13690_v49  ;;  %v4522_v41 = vpop.f32.mrb[81].mxu0 }
 0x39e   :  { %v5551_v12 = vpack.c.bf16 %v5479_v30, %v5478_v19  ;;  %v5168_v44 = vadd.f32 %v13690_v49, %v4522_v41  ;;  %v11281_v55 = vpop.f32.mrb[82].mxu0  ;;  %v14057_v30 = vpop.f32.mrb[53].mxu1 }
 0x39f   :  { %v5346_v53 = vmax.f32 %v5170_v38, 0.0  ;;  %v5171_v25 = vadd.f32 %v11281_v55, %v13690_v49  ;;  %v4525_v45 = vpop.f32.mrb[83].mxu0  ;;  %v5685_v56 = vld [vmem:[#allocation2 + $0x98] sm:$0xff]  ;;  %14977 = vst [vmem:[#allocation11_spill] sm:$0xff] %v14057_v30  ;;  %v14059_v41 = vpop.f32.mrb[54].mxu1 }
 0x3a0   :  { %5596 = vst.msk [vmem:[#allocation2 + $0xa0] sm:$0xff] %vm5528_vm3, %v5551_v12  ;;  %v5344_v57 = vmax.f32 %v5168_v44, 0.0  ;;  %v5169_v3 = vadd.f32 %v13690_v49, %v4525_v45  ;;  %11412 = vmatprep.mubr.msk.bf16.mxu1 %vm5528_vm3, %v5685_v56  ;;  %14978 = vst [vmem:[#allocation12_spill] sm:$0xff] %v14059_v41  ;;  %v14061_v31 = vpop.f32.mrb[55].mxu1 }
 0x3a1   :  { %v5347_v60 = vmax.f32 %v5171_v25, 0.0  ;;  %14979 = vst [vmem:[#allocation13_spill] sm:$0xff] %v14061_v31 }
 0x3a2   :  { %v5480_v52 = vmax.f32 %v5344_v57, %v5346_v53  ;;  %v5345_v19 = vmax.f32 %v5169_v3, 0.0 }
 0x3a4   :  { %v5481_v38 = vmax.f32 %v5345_v19, %v5347_v60  ;;  %v11284_v55 = vpop.f32.mrb[84].mxu0  ;;  %v14070_v60 = vld [vmem:[%s14961_s2] ss:$0 sm:$0xff] }
 0x3a5   :  { %v5174_v12 = vadd.f32 %v11284_v55, %v13690_v49  ;;  %v4538_v44 = vpop.f32.mrb[85].mxu0 }
 0x3a6   :  { %v5552_v18 = vpack.c.bf16 %v5481_v38, %v5480_v52  ;;  %v5172_v45 = vadd.f32 %v13690_v49, %v4538_v44  ;;  %v11285_v56 = vpop.f32.mrb[86].mxu0  ;;  %v14074_v38 = vpop.f32.mrb[56].mxu1 }
 0x3a7   :  { %v5350_v25 = vmax.f32 %v5174_v12, 0.0  ;;  %v5175_v14 = vadd.f32 %v11285_v56, %v13690_v49  ;;  %v4541_v53 = vpop.f32.mrb[87].mxu0  ;;  %v5686_v57 = vld [vmem:[#allocation2 + $0xa0] sm:$0xff]  ;;  %14980 = vst [vmem:[#allocation14_spill] sm:$0xff] %v14074_v38  ;;  %v14076_v49 = vpop.f32.mrb[57].mxu1 }
 0x3a8   :  { %5597 = vst.msk [vmem:[#allocation2 + $0xa8] sm:$0xff] %vm5528_vm3, %v5552_v18  ;;  %v5348_v3 = vmax.f32 %v5172_v45, 0.0  ;;  %v5173_v19 = vadd.f32 %v14070_v60, %v4541_v53  ;;  %11413 = vmatmul.mubr.msk.bf16.gmra.mrb[116].mxu1 %vm5528_vm3, %v5686_v57  ;;  %14981 = vst [vmem:[#allocation15_spill] sm:$0xff] %v14076_v49  ;;  %v14078_v44 = vpop.f32.mrb[58].mxu1 }
 0x3a9   :  { %v5351_v52 = vmax.f32 %v5175_v14, 0.0  ;;  %14982 = vst [vmem:[#allocation16_spill] sm:$0xff] %v14078_v44  ;;  %v14080_v56 = vpop.f32.mrb[59].mxu1 }
 0x3aa   :  { %v5482_v55 = vmax.f32 %v5348_v3, %v5350_v25  ;;  %v5349_v12 = vmax.f32 %v5173_v19, 0.0  ;;  %14983 = vst [vmem:[#allocation17_spill] sm:$0xff] %v14080_v56  ;;  %v14088_v56 = vpop.f32.mrb[60].mxu1 }
 0x3ab   :  { %14984 = vst [vmem:[#allocation18_spill] sm:$0xff] %v14088_v56 }
 0x3ac   :  { %v5483_v18 = vmax.f32 %v5349_v12, %v5351_v52  ;;  %v11288_v45 = vpop.f32.mrb[88].mxu0 }
 0x3ad   :  { %v5178_v31 = vadd.f32 %v14070_v60, %v11288_v45  ;;  %v4554_v41 = vpop.f32.mrb[89].mxu0 }
 0x3ae   :  { %v5553_v30 = vpack.c.bf16 %v5483_v18, %v5482_v55  ;;  %v5176_v53 = vadd.f32 %v14070_v60, %v4554_v41  ;;  %v11289_v57 = vpop.f32.mrb[90].mxu0  ;;  %v14090_v18 = vpop.f32.mrb[61].mxu1 }
 0x3af   :  { %v5354_v14 = vmax.f32 %v5178_v31, 0.0  ;;  %v5179_v38 = vadd.f32 %v14070_v60, %v11289_v57  ;;  %v4557_v25 = vpop.f32.mrb[91].mxu0  ;;  %v5687_v3 = vld [vmem:[#allocation2 + $0xa8] sm:$0xff]  ;;  %14985 = vst [vmem:[#allocation19_spill] sm:$0xff] %v14090_v18  ;;  %v14092_v41 = vpop.f32.mrb[62].mxu1 }
 0x3b0   :  { %5598 = vst.msk [vmem:[#allocation2 + $0xb0] sm:$0xff] %vm5528_vm3, %v5553_v30  ;;  %v5352_v19 = vmax.f32 %v5176_v53, 0.0  ;;  %v5177_v52 = vadd.f32 %v14070_v60, %v4557_v25  ;;  %11416 = vmatprep.mubr.msk.bf16.mxu1 %vm5528_vm3, %v5687_v3  ;;  %14986 = vst [vmem:[#allocation20_spill] sm:$0xff] %v14092_v41  ;;  %v14094_v44 = vpop.f32.mrb[63].mxu1 }
 0x3b1   :  { %v5355_v12 = vmax.f32 %v5179_v38, 0.0  ;;  %14987 = vst [vmem:[#allocation21_spill] sm:$0xff] %v14094_v44  ;;  %v14102_v44 = vpop.f32.mrb[64].mxu1 }
 0x3b2   :  { %v5484_v45 = vmax.f32 %v5352_v19, %v5354_v14  ;;  %v5353_v55 = vmax.f32 %v5177_v52, 0.0 }
 0x3b4   :  { %v5485_v31 = vmax.f32 %v5353_v55, %v5355_v12  ;;  %v11292_v57 = vpop.f32.mrb[92].mxu0 }
 0x3b5   :  { %v5182_v30 = vadd.f32 %v14070_v60, %v11292_v57  ;;  %v4570_v53 = vpop.f32.mrb[93].mxu0 }
 0x3b6   :  { %v5554_v49 = vpack.c.bf16 %v5485_v31, %v5484_v45  ;;  %v5180_v25 = vadd.f32 %v14070_v60, %v4570_v53  ;;  %v11293_v3 = vpop.f32.mrb[94].mxu0  ;;  %v14104_v31 = vpop.f32.mrb[65].mxu1 }
 0x3b7   :  { %v5358_v38 = vmax.f32 %v5182_v30, 0.0  ;;  %v5183_v56 = vadd.f32 %v14070_v60, %v11293_v3  ;;  %v4573_v14 = vpop.f32.mrb[95].mxu0  ;;  %v5688_v19 = vld [vmem:[#allocation2 + $0xb0] sm:$0xff]  ;;  %v14106_v53 = vpop.f32.mrb[66].mxu1 }
 0x3b8   :  { %5599 = vst.msk [vmem:[#allocation2 + $0xb8] sm:$0xff] %vm5528_vm3, %v5554_v49  ;;  %v5356_v52 = vmax.f32 %v5180_v25, 0.0  ;;  %v5181_v12 = vadd.f32 %v14070_v60, %v4573_v14  ;;  %11417 = vmatmul.mubr.msk.bf16.gmra.mrb[120].mxu1 %vm5528_vm3, %v5688_v19  ;;  %v14108_v41 = vpop.f32.mrb[67].mxu1 }
 0x3b9   :  { %v5359_v55 = vmax.f32 %v5183_v56, 0.0  ;;  %14988 = vst [vmem:[#allocation22_spill] sm:$0xff] %v14108_v41 }
 0x3ba   :  { %v5486_v57 = vmax.f32 %v5356_v52, %v5358_v38  ;;  %v5357_v45 = vmax.f32 %v5181_v12, 0.0 }
 0x3bc   :  { %v5487_v30 = vmax.f32 %v5357_v45, %v5359_v55  ;;  %v11296_v3 = vpop.f32.mrb[96].mxu0 }
 0x3bd   :  { %v11842_v49 = vadd.f32 %v11296_v3, %v13801_v62  ;;  %v4586_v25 = vpop.f32.mrb[97].mxu0 }
 0x3be   :  { %v5555_v18 = vpack.c.bf16 %v5487_v30, %v5486_v57  ;;  %v11843_v14 = vadd.f32 %v4586_v25, %v13804_v1  ;;  %v11297_v19 = vpop.f32.mrb[98].mxu0  ;;  %v14119_v30 = vpop.f32.mrb[68].mxu1 }
 0x3bf   :  { %v5186_v56 = vadd.f32 %v14070_v60, %v11842_v49  ;;  %v11844_v38 = vadd.f32 %v11297_v19, %v13806_v2  ;;  %v4589_v52 = vpop.f32.mrb[99].mxu0  ;;  %v5689_v12 = vld [vmem:[#allocation2 + $0xb8] sm:$0xff]  ;;  %14989 = vst [vmem:[#allocation23_spill] sm:$0xff] %v14119_v30  ;;  %v14122_v49 = vpop.f32.mrb[69].mxu1 }
 0x3c0   :  { %5600 = vst.msk [vmem:[#allocation2 + $0xc0] sm:$0xff] %vm5528_vm3, %v5555_v18  ;;  %v5184_v55 = vadd.f32 %v14070_v60, %v11843_v14  ;;  %v11845_v45 = vadd.f32 %v4589_v52, %v13808_v5  ;;  %11420 = vmatprep.mubr.msk.bf16.mxu1 %vm5528_vm3, %v5689_v12  ;;  %14990 = vst [vmem:[#allocation24_spill] sm:$0xff] %v14122_v49  ;;  %v14124_v25 = vpop.f32.mrb[70].mxu1 }
 0x3c1   :  { %v5362_v62 = vmax.f32 %v5186_v56, 0.0  ;;  %v5187_v57 = vadd.f32 %v14070_v60, %v11844_v38  ;;  %v14126_v41 = vpop.f32.mrb[71].mxu1 }
 0x3c2   :  { %v5360_v1 = vmax.f32 %v5184_v55, 0.0  ;;  %v5185_v3 = vadd.f32 %v14070_v60, %v11845_v45 }
 0x3c3   :  { %v5363_v2 = vmax.f32 %v5187_v57, 0.0 }
 0x3c4   :  { %v5488_v18 = vmax.f32 %v5360_v1, %v5362_v62  ;;  %v5361_v19 = vmax.f32 %v5185_v3, 0.0  ;;  %v11300_v14 = vpop.f32.mrb[100].mxu0 }
 0x3c5   :  { %v11846_v5 = vadd.f32 %v11300_v14, %v13823_v20  ;;  %v4602_v56 = vpop.f32.mrb[101].mxu0 }
 0x3c6   :  { %v5489_v52 = vmax.f32 %v5361_v19, %v5363_v2  ;;  %v11847_v38 = vadd.f32 %v4602_v56, %v13826_v23  ;;  %v11301_v12 = vpop.f32.mrb[102].mxu0  ;;  %v14136_v2 = vpop.f32.mrb[72].mxu1 }
 0x3c7   :  { %v5190_v55 = vadd.f32 %v14070_v60, %v11846_v5  ;;  %v11848_v45 = vadd.f32 %v11301_v12, %v13828_v24  ;;  %v4605_v49 = vpop.f32.mrb[103].mxu0  ;;  %v5690_v57 = vld [vmem:[#allocation2 + $0xc0] sm:$0xff]  ;;  %v14140_v24 = vpop.f32.mrb[73].mxu1 }
 0x3c8   :  { %v5556_v30 = vpack.c.bf16 %v5489_v52, %v5488_v18  ;;  %v5188_v62 = vadd.f32 %v14070_v60, %v11847_v38  ;;  %v11849_v1 = vadd.f32 %v4605_v49, %v13830_v27  ;;  %11421 = vmatmul.mubr.msk.bf16.gmra.mrb[124].mxu1 %vm5528_vm3, %v5690_v57  ;;  %v14142_v18 = vpop.f32.mrb[74].mxu1 }
 0x3c9   :  { %v5366_v3 = vmax.f32 %v5190_v55, 0.0  ;;  %v5191_v20 = vadd.f32 %v14070_v60, %v11848_v45  ;;  %v14144_v49 = vpop.f32.mrb[75].mxu1 }
 0x3ca   :  { %5601 = vst.msk [vmem:[#allocation2 + $0xc8] sm:$0xff] %vm5528_vm3, %v5556_v30  ;;  %v5364_v23 = vmax.f32 %v5188_v62, 0.0  ;;  %v5189_v19 = vadd.f32 %v14070_v60, %v11849_v1  ;;  %14991 = vst [vmem:[#allocation25_spill] sm:$0xff] %v14144_v49 }
 0x3cb   :  { %v5367_v14 = vmax.f32 %v5191_v20, 0.0 }
 0x3cc   :  { %v5490_v5 = vmax.f32 %v5364_v23, %v5366_v3  ;;  %v5365_v56 = vmax.f32 %v5189_v19, 0.0  ;;  %v11304_v27 = vpop.f32.mrb[104].mxu0 }
 0x3cd   :  { %v11850_v52 = vadd.f32 %v11304_v27, %v13845_v42  ;;  %v4618_v38 = vpop.f32.mrb[105].mxu0  ;;  %v14155_v42 = vpop.f32.mrb[76].mxu1 }
 0x3ce   :  { %v5491_v12 = vmax.f32 %v5365_v56, %v5367_v14  ;;  %v11851_v55 = vadd.f32 %v4618_v38, %v13851_v46  ;;  %v11305_v30 = vpop.f32.mrb[106].mxu0 }
 0x3cf   :  { %v5194_v45 = vadd.f32 %v14070_v60, %v11850_v52  ;;  %v11852_v57 = vadd.f32 %v11305_v30, %v13853_v47  ;;  %v4621_v62 = vpop.f32.mrb[107].mxu0  ;;  %v14161_v47 = vpop.f32.mrb[77].mxu1 }
 0x3d0   :  { %v5557_v1 = vpack.c.bf16 %v5491_v12, %v5490_v5  ;;  %v5192_v20 = vadd.f32 %v14070_v60, %v11851_v55  ;;  %v11853_v3 = vadd.f32 %v4621_v62, %v13855_v51  ;;  %v14163_v56 = vpop.f32.mrb[78].mxu1 }
 0x3d1   :  { %v5370_v23 = vmax.f32 %v5194_v45, 0.0  ;;  %v5195_v19 = vadd.f32 %v14070_v60, %v11852_v57  ;;  %v14153_v49 = vld [vmem:[#allocation2 + $0xc8] sm:$0xff]  ;;  %v14165_v38 = vpop.f32.mrb[79].mxu1 }
 0x3d2   :  { %14992 = vst [vmem:[#allocation26_spill] sm:$0xff] %v14153_v49  ;;  %5602 = vst.msk [vmem:[#allocation2 + $0xd0] sm:$0xff] %vm5528_vm3, %v5557_v1  ;;  %v5368_v46 = vmax.f32 %v5192_v20, 0.0  ;;  %v5193_v14 = vadd.f32 %v14070_v60, %v11853_v3  ;;  %11424 = vmatprep.mubr.msk.bf16.mxu1 %vm5528_vm3, %v14153_v49 }
 0x3d3   :  { %v5371_v5 = vmax.f32 %v5195_v19, 0.0 }
 0x3d4   :  { %v5492_v51 = vmax.f32 %v5368_v46, %v5370_v23  ;;  %v5369_v27 = vmax.f32 %v5193_v14, 0.0  ;;  %v11308_v52 = vpop.f32.mrb[108].mxu0 }
 0x3d5   :  { %v11854_v12 = vadd.f32 %v11308_v52, %v13870_v6  ;;  %v4634_v55 = vpop.f32.mrb[109].mxu0 }
 0x3d6   :  { %v5493_v30 = vmax.f32 %v5369_v27, %v5371_v5  ;;  %v11855_v45 = vadd.f32 %v4634_v55, %v13873_v9  ;;  %v11309_v57 = vpop.f32.mrb[110].mxu0 }
 0x3d7   :  { %v5198_v62 = vadd.f32 %v14070_v60, %v11854_v12  ;;  %v11856_v1 = vadd.f32 %v11309_v57, %v13875_v10  ;;  %v4637_v20 = vpop.f32.mrb[111].mxu0 }
 0x3d8   :  { %v5558_v3 = vpack.c.bf16 %v5493_v30, %v5492_v51  ;;  %v5196_v19 = vadd.f32 %v14070_v60, %v11855_v45  ;;  %v11857_v23 = vadd.f32 %v4637_v20, %v13877_v13 }
 0x3d9   :  { %v5374_v46 = vmax.f32 %v5198_v62, 0.0  ;;  %v5199_v14 = vadd.f32 %v14070_v60, %v11856_v1  ;;  %v14174_v49 = vld [vmem:[#allocation2 + $0xd0] sm:$0xff] }
 0x3da   :  { %5603 = vst.msk [vmem:[#allocation2 + $0xd8] sm:$0xff] %vm5528_vm3, %v5558_v3  ;;  %v5372_v6 = vmax.f32 %v5196_v19, 0.0  ;;  %v5197_v9 = vadd.f32 %v14070_v60, %v11857_v23  ;;  %11425 = vmatmul.mubr.msk.bf16.gmra.mrb[128].mxu1 %vm5528_vm3, %v14174_v49 }
 0x3db   :  { %v5375_v10 = vmax.f32 %v5199_v14, 0.0 }
 0x3dc   :  { %v5494_v5 = vmax.f32 %v5372_v6, %v5374_v46  ;;  %v5373_v51 = vmax.f32 %v5197_v9, 0.0  ;;  %v11312_v27 = vpop.f32.mrb[112].mxu0 }
 0x3dd   :  { %v11858_v52 = vadd.f32 %v11312_v27, %v13892_v32  ;;  %v4650_v13 = vpop.f32.mrb[113].mxu0 }
 0x3de   :  { %v5495_v12 = vmax.f32 %v5373_v51, %v5375_v10  ;;  %v11859_v55 = vadd.f32 %v4650_v13, %v13895_v35  ;;  %v11313_v30 = vpop.f32.mrb[114].mxu0 }
 0x3df   :  { %v5202_v45 = vadd.f32 %v14070_v60, %v11858_v52  ;;  %v11860_v57 = vadd.f32 %v11313_v30, %v13897_v36  ;;  %v4653_v62 = vpop.f32.mrb[115].mxu0 }
 0x3e0   :  { %v5559_v1 = vpack.c.bf16 %v5495_v12, %v5494_v5  ;;  %v5200_v20 = vadd.f32 %v14070_v60, %v11859_v55  ;;  %v11861_v3 = vadd.f32 %v4653_v62, %v13899_v39 }
 0x3e1   :  { %v5378_v19 = vmax.f32 %v5202_v45, 0.0  ;;  %v5203_v23 = vadd.f32 %v14070_v60, %v11860_v57  ;;  %v14187_v46 = vld [vmem:[#allocation2 + $0xd8] sm:$0xff] }
 0x3e2   :  { %5604 = vst.msk [vmem:[#allocation2 + $0xe0] sm:$0xff] %vm5528_vm3, %v5559_v1  ;;  %v5376_v32 = vmax.f32 %v5200_v20, 0.0  ;;  %v5201_v35 = vadd.f32 %v14070_v60, %v11861_v3  ;;  %11428 = vmatprep.mubr.msk.bf16.mxu1 %vm5528_vm3, %v14187_v46 }
 0x3e3   :  { %v5379_v36 = vmax.f32 %v5203_v23, 0.0 }
 0x3e4   :  { %v5496_v14 = vmax.f32 %v5376_v32, %v5378_v19  ;;  %v5377_v6 = vmax.f32 %v5201_v35, 0.0  ;;  %v11316_v9 = vpop.f32.mrb[116].mxu0 }
 0x3e5   :  { %v11862_v10 = vadd.f32 %v11316_v9, %v13914_v59  ;;  %v4666_v39 = vpop.f32.mrb[117].mxu0  ;;  %v12695_v59 = vmov 0  }
 0x3e6   :  { %v5497_v5 = vmax.f32 %v5377_v6, %v5379_v36  ;;  %v11863_v51 = vadd.f32 %v4666_v39, %v13917_v63  ;;  %v11317_v27 = vpop.f32.mrb[118].mxu0  ;;  %5529 = vst.msk [vmem:[#allocation2] sm:$0xff] %vm5528_vm3, %v12695_v59  ;;  %5531 = vst.msk [vmem:[#allocation2 + $0x168] sm:$0xff] %vm5528_vm3, %v12695_v59 }
 0x3e7   :  { %v5206_v52 = vadd.f32 %v14070_v60, %v11862_v10  ;;  %v11864_v13 = vadd.f32 %v11317_v27, %v13919_v0  ;;  %v4669_v12 = vpop.f32.mrb[119].mxu0 }
 0x3e8   :  { %v5560_v55 = vpack.c.bf16 %v5497_v5, %v5496_v14  ;;  %v5204_v30 = vadd.f32 %v14070_v60, %v11863_v51  ;;  %v11865_v45 = vadd.f32 %v4669_v12, %v13921_v7 }
 0x3e9   :  { %v5382_v57 = vmax.f32 %v5206_v52, 0.0  ;;  %v5207_v62 = vadd.f32 %v14070_v60, %v11864_v13  ;;  %v14200_v1 = vld [vmem:[#allocation2 + $0xe0] sm:$0xff] }
 0x3ea   :  { %5605 = vst.msk [vmem:[#allocation2 + $0xe8] sm:$0xff] %vm5528_vm3, %v5560_v55  ;;  %v5380_v63 = vmax.f32 %v5204_v30, 0.0  ;;  %v5205_v0 = vadd.f32 %v14070_v60, %v11865_v45  ;;  %11429 = vmatmul.mubr.msk.bf16.gmra.mrb[132].mxu1 %vm5528_vm3, %v14200_v1 }
 0x3eb   :  { %v5383_v20 = vmax.f32 %v5207_v62, 0.0 }
 0x3ec   :  { %v5498_v7 = vmax.f32 %v5380_v63, %v5382_v57  ;;  %v5381_v3 = vmax.f32 %v5205_v0, 0.0  ;;  %v11320_v19 = vpop.f32.mrb[120].mxu0 }
 0x3ed   :  { %v11866_v23 = vadd.f32 %v11320_v19, %v13936_v29  ;;  %v4682_v32 = vpop.f32.mrb[121].mxu0 }
 0x3ee   :  { %v5499_v35 = vmax.f32 %v5381_v3, %v5383_v20  ;;  %v11867_v36 = vadd.f32 %v4682_v32, %v13939_v33  ;;  %v11321_v14 = vpop.f32.mrb[122].mxu0 }
 0x3ef   :  { %v5210_v6 = vadd.f32 %v14070_v60, %v11866_v23  ;;  %v11868_v9 = vadd.f32 %v11321_v14, %v13941_v34  ;;  %v4685_v10 = vpop.f32.mrb[123].mxu0  ;;  %v14224_v34 = vld [vmem:[%s14960_s3 + $0x10] sm:$0xff]  }
 0x3f0   :  { %v5561_v39 = vpack.c.bf16 %v5499_v35, %v5498_v7  ;;  %v5208_v5 = vadd.f32 %v14070_v60, %v11867_v36  ;;  %v11869_v51 = vadd.f32 %v4685_v10, %v13943_v40  ;;  %11554 = vmatprep.subr.bf16.mxu1 %v14224_v34 }
 0x3f1   :  { %v5386_v27 = vmax.f32 %v5210_v6, 0.0  ;;  %v5211_v52 = vadd.f32 %v14070_v60, %v11868_v9  ;;  %v14215_v13 = vld [vmem:[#allocation2 + $0xe8] sm:$0xff] }
 0x3f2   :  { %5606 = vst.msk [vmem:[#allocation2 + $0xf0] sm:$0xff] %vm5528_vm3, %v5561_v39  ;;  %v5384_v29 = vmax.f32 %v5208_v5, 0.0  ;;  %v5209_v33 = vadd.f32 %v14070_v60, %v11869_v51  ;;  %11432 = vmatprep.mubr.msk.bf16.mxu1 %vm5528_vm3, %v14215_v13 }
 0x3f3   :  { %v5387_v12 = vmax.f32 %v5211_v52, 0.0 }
 0x3f4   :  { %v5500_v40 = vmax.f32 %v5384_v29, %v5386_v27  ;;  %v5385_v55 = vmax.f32 %v5209_v33, 0.0  ;;  %v11324_v30 = vpop.f32.mrb[124].mxu0 }
 0x3f5   :  { %v11870_v45 = vadd.f32 %v11324_v30, %v13958_v61  ;;  %v4698_v57 = vpop.f32.mrb[125].mxu0 }
 0x3f6   :  { %v5501_v62 = vmax.f32 %v5385_v55, %v5387_v12  ;;  %v11871_v59 = vadd.f32 %v4698_v57, %v13961_v8  ;;  %v11325_v63 = vpop.f32.mrb[126].mxu0 }
 0x3f7   :  { %v5214_v0 = vadd.f32 %v14070_v60, %v11870_v45  ;;  %v11872_v20 = vadd.f32 %v11325_v63, %v13963_v11  ;;  %v4701_v7 = vpop.f32.mrb[127].mxu0 }
 0x3f8   :  { %v5562_v3 = vpack.c.bf16 %v5501_v62, %v5500_v40  ;;  %v5212_v19 = vadd.f32 %v14070_v60, %v11871_v59  ;;  %v11873_v23 = vadd.f32 %v4701_v7, %v13965_v15 }
 0x3f9   :  { %v5390_v32 = vmax.f32 %v5214_v0, 0.0  ;;  %v5215_v35 = vadd.f32 %v14070_v60, %v11872_v20  ;;  %v14234_v36 = vld [vmem:[#allocation2 + $0xf0] sm:$0xff] }
 0x3fa   :  { %5607 = vst.msk [vmem:[#allocation2 + $0xf8] sm:$0xff] %vm5528_vm3, %v5562_v3  ;;  %v5388_v61 = vmax.f32 %v5212_v19, 0.0  ;;  %v5213_v8 = vadd.f32 %v14070_v60, %v11873_v23  ;;  %11433 = vmatmul.mubr.msk.bf16.gmra.mrb[136].mxu1 %vm5528_vm3, %v14234_v36 }
 0x3fb   :  { %v5391_v11 = vmax.f32 %v5215_v35, 0.0 }
 0x3fc   :  { %v5502_v14 = vmax.f32 %v5388_v61, %v5390_v32  ;;  %v5389_v6 = vmax.f32 %v5213_v8, 0.0  ;;  %v11328_v9 = vpop.f32.mrb[128].mxu0 }
 0x3fd   :  { %v11874_v10 = vadd.f32 %v11328_v9, %v13980_v43  ;;  %v4714_v15 = vpop.f32.mrb[129].mxu0 }
 0x3fe   :  { %v5503_v39 = vmax.f32 %v5389_v6, %v5391_v11  ;;  %v11875_v5 = vadd.f32 %v4714_v15, %v13983_v48  ;;  %v11329_v51 = vpop.f32.mrb[130].mxu0 }
 0x3ff   :  { %v5218_v27 = vadd.f32 %v14070_v60, %v11874_v10  ;;  %v11876_v52 = vadd.f32 %v11329_v51, %v13985_v50  ;;  %v4717_v29 = vpop.f32.mrb[131].mxu0 }
 0x400   :  { %v5563_v33 = vpack.c.bf16 %v5503_v39, %v5502_v14  ;;  %v5216_v12 = vadd.f32 %v14070_v60, %v11875_v5  ;;  %v11877_v40 = vadd.f32 %v4717_v29, %v13987_v54 }
 0x401   :  { %v5394_v55 = vmax.f32 %v5218_v27, 0.0  ;;  %v5219_v30 = vadd.f32 %v14070_v60, %v11876_v52  ;;  %v14247_v45 = vld [vmem:[#allocation2 + $0xf8] sm:$0xff] }
 0x402   :  { %5608 = vst.msk [vmem:[#allocation2 + $0x100] sm:$0xff] %vm5528_vm3, %v5563_v33  ;;  %v5392_v43 = vmax.f32 %v5216_v12, 0.0  ;;  %v5217_v48 = vadd.f32 %v14070_v60, %v11877_v40  ;;  %11436 = vmatprep.mubr.msk.bf16.mxu1 %vm5528_vm3, %v14247_v45 }
 0x403   :  { %v5395_v50 = vmax.f32 %v5219_v30, 0.0 }
 0x404   :  { %v5504_v57 = vmax.f32 %v5392_v43, %v5394_v55  ;;  %v5393_v62 = vmax.f32 %v5217_v48, 0.0  ;;  %v11332_v59 = vpop.f32.mrb[132].mxu0 }
 0x405   :  { %v11878_v63 = vadd.f32 %v11332_v59, %v13999_v21  ;;  %v4730_v54 = vpop.f32.mrb[133].mxu0 }
 0x406   :  { %v5505_v0 = vmax.f32 %v5393_v62, %v5395_v50  ;;  %v11879_v20 = vadd.f32 %v4730_v54, %v14001_v26  ;;  %v11333_v7 = vpop.f32.mrb[134].mxu0 }
 0x407   :  { %v5222_v3 = vadd.f32 %v14070_v60, %v11878_v63  ;;  %v11880_v19 = vadd.f32 %v11333_v7, %v14003_v28  ;;  %v4733_v23 = vpop.f32.mrb[135].mxu0  ;;  %v14993_v63 = vld [vmem:[#allocation3_spill] sm:$0xff]  ;;  %v14994_v7 = vld [vmem:[#allocation4_spill] sm:$0xff] }
 0x408   :  { %v5564_v32 = vpack.c.bf16 %v5505_v0, %v5504_v57  ;;  %v5220_v35 = vadd.f32 %v14070_v60, %v11879_v20  ;;  %v11881_v61 = vadd.f32 %v4733_v23, %v14005_v37 }
 0x409   :  { %v5398_v8 = vmax.f32 %v5222_v3, 0.0  ;;  %v5223_v11 = vadd.f32 %v14070_v60, %v11880_v19  ;;  %v14260_v14 = vld [vmem:[#allocation2 + $0x100] sm:$0xff] }
 0x40a   :  { %5609 = vst.msk [vmem:[#allocation2 + $0x108] sm:$0xff] %vm5528_vm3, %v5564_v32  ;;  %v5396_v21 = vmax.f32 %v5220_v35, 0.0  ;;  %v5221_v26 = vadd.f32 %v14070_v60, %v11881_v61  ;;  %11437 = vmatmul.mubr.msk.bf16.gmra.mrb[140].mxu1 %vm5528_vm3, %v14260_v14  ;;  %v14995_v35 = vld [vmem:[#allocation5_spill] sm:$0xff] }
 0x40b   :  { %v5399_v28 = vmax.f32 %v5223_v11, 0.0 }
 0x40c   :  { %v5506_v6 = vmax.f32 %v5396_v21, %v5398_v8  ;;  %v5397_v9 = vmax.f32 %v5221_v26, 0.0  ;;  %v11336_v10 = vpop.f32.mrb[136].mxu0 }
 0x40d   :  { %v11882_v15 = vadd.f32 %v11336_v10, %v14013_v4  ;;  %v4746_v37 = vpop.f32.mrb[137].mxu0 }
 0x40e   :  { %v5507_v39 = vmax.f32 %v5397_v9, %v5399_v28  ;;  %v11883_v5 = vadd.f32 %v4746_v37, %v14015_v16  ;;  %v11337_v51 = vpop.f32.mrb[138].mxu0 }
 0x40f   :  { %v5226_v27 = vadd.f32 %v14070_v60, %v11882_v15  ;;  %v11884_v52 = vadd.f32 %v11337_v51, %v14017_v17  ;;  %v4749_v29 = vpop.f32.mrb[139].mxu0  ;;  %v14996_v15 = vld [vmem:[#allocation6_spill] sm:$0xff]  ;;  %v14997_v51 = vld [vmem:[#allocation7_spill] sm:$0xff] }
 0x410   :  { %v5565_v33 = vpack.c.bf16 %v5507_v39, %v5506_v6  ;;  %v5224_v12 = vadd.f32 %v14070_v60, %v11883_v5  ;;  %v11885_v40 = vadd.f32 %v4749_v29, %v14019_v22 }
 0x411   :  { %v5402_v55 = vmax.f32 %v5226_v27, 0.0  ;;  %v5227_v30 = vadd.f32 %v14070_v60, %v11884_v52  ;;  %v14273_v43 = vld [vmem:[#allocation2 + $0x108] sm:$0xff] }
 0x412   :  { %5610 = vst.msk [vmem:[#allocation2 + $0x110] sm:$0xff] %vm5528_vm3, %v5565_v33  ;;  %v5400_v4 = vmax.f32 %v5224_v12, 0.0  ;;  %v5225_v16 = vadd.f32 %v14070_v60, %v11885_v40  ;;  %11440 = vmatprep.mubr.msk.bf16.mxu1 %vm5528_vm3, %v14273_v43  ;;  %v14998_v33 = vld [vmem:[#allocation8_spill] sm:$0xff] }
 0x413   :  { %v5403_v17 = vmax.f32 %v5227_v30, 0.0 }
 0x414   :  { %v5508_v48 = vmax.f32 %v5400_v4, %v5402_v55  ;;  %v5401_v50 = vmax.f32 %v5225_v16, 0.0  ;;  %v11340_v57 = vpop.f32.mrb[140].mxu0  ;;  %v14999_v4 = vld [vmem:[#allocation9_spill] sm:$0xff] }
 0x415   :  { %v11886_v62 = vadd.f32 %v11340_v57, %v14027_v58  ;;  %v4762_v22 = vpop.f32.mrb[141].mxu0 }
 0x416   :  { %v5509_v59 = vmax.f32 %v5401_v50, %v5403_v17  ;;  %v11887_v54 = vadd.f32 %v4762_v22, %v14993_v63  ;;  %v11341_v0 = vpop.f32.mrb[142].mxu0 }
 0x417   :  { %v5230_v20 = vadd.f32 %v14070_v60, %v11886_v62  ;;  %v11888_v3 = vadd.f32 %v11341_v0, %v14994_v7  ;;  %v4765_v19 = vpop.f32.mrb[143].mxu0  ;;  %v15000_v0 = vld [vmem:[#allocation10_spill] sm:$0xff] }
 0x418   :  { %v5566_v23 = vpack.c.bf16 %v5509_v59, %v5508_v48  ;;  %v5228_v32 = vadd.f32 %v14070_v60, %v11887_v54  ;;  %v11889_v61 = vadd.f32 %v4765_v19, %v14995_v35  ;;  %v15001_v19 = vld [vmem:[#allocation11_spill] sm:$0xff] }
 0x419   :  { %v5406_v8 = vmax.f32 %v5230_v20, 0.0  ;;  %v5231_v11 = vadd.f32 %v14070_v60, %v11888_v3  ;;  %v14286_v21 = vld [vmem:[#allocation2 + $0x110] sm:$0xff] }
 0x41a   :  { %5611 = vst.msk [vmem:[#allocation2 + $0x118] sm:$0xff] %vm5528_vm3, %v5566_v23  ;;  %v5404_v58 = vmax.f32 %v5228_v32, 0.0  ;;  %v5229_v26 = vadd.f32 %v14070_v60, %v11889_v61  ;;  %11441 = vmatmul.mubr.msk.bf16.gmra.mrb[144].mxu1 %vm5528_vm3, %v14286_v21  ;;  %v15002_v61 = vld [vmem:[#allocation12_spill] sm:$0xff] }
 0x41b   :  { %v5407_v28 = vmax.f32 %v5231_v11, 0.0 }
 0x41c   :  { %v5510_v6 = vmax.f32 %v5404_v58, %v5406_v8  ;;  %v5405_v9 = vmax.f32 %v5229_v26, 0.0  ;;  %v11344_v10 = vpop.f32.mrb[144].mxu0 }
 0x41d   :  { %v11890_v37 = vadd.f32 %v11344_v10, %v14996_v15  ;;  %v4778_v39 = vpop.f32.mrb[145].mxu0 }
 0x41e   :  { %v5511_v5 = vmax.f32 %v5405_v9, %v5407_v28  ;;  %v11891_v27 = vadd.f32 %v4778_v39, %v14997_v51  ;;  %v11345_v52 = vpop.f32.mrb[146].mxu0  ;;  %v15003_v28 = vld [vmem:[#allocation13_spill] sm:$0xff] }
 0x41f   :  { %v5234_v29 = vadd.f32 %v14070_v60, %v11890_v37  ;;  %v11892_v12 = vadd.f32 %v11345_v52, %v14998_v33  ;;  %v4781_v40 = vpop.f32.mrb[147].mxu0 }
 0x420   :  { %v5567_v55 = vpack.c.bf16 %v5511_v5, %v5510_v6  ;;  %v5232_v30 = vadd.f32 %v14070_v60, %v11891_v27  ;;  %v11893_v16 = vadd.f32 %v4781_v40, %v14999_v4 }
 0x421   :  { %v5410_v17 = vmax.f32 %v5234_v29, 0.0  ;;  %v5235_v48 = vadd.f32 %v14070_v60, %v11892_v12  ;;  %v14299_v50 = vld [vmem:[#allocation2 + $0x118] sm:$0xff]  ;;  %v15004_v29 = vld [vmem:[#allocation14_spill] sm:$0xff] }
 0x422   :  { %5612 = vst.msk [vmem:[#allocation2 + $0x120] sm:$0xff] %vm5528_vm3, %v5567_v55  ;;  %v5408_v57 = vmax.f32 %v5232_v30, 0.0  ;;  %v5233_v62 = vadd.f32 %v14070_v60, %v11893_v16  ;;  %11444 = vmatprep.mubr.msk.bf16.mxu1 %vm5528_vm3, %v14299_v50  ;;  %v15005_v55 = vld [vmem:[#allocation15_spill] sm:$0xff] }
 0x423   :  { %v5411_v22 = vmax.f32 %v5235_v48, 0.0 }
 0x424   :  { %v5512_v59 = vmax.f32 %v5408_v57, %v5410_v17  ;;  %v5409_v63 = vmax.f32 %v5233_v62, 0.0  ;;  %v11348_v54 = vpop.f32.mrb[148].mxu0  ;;  %v15006_v17 = vld [vmem:[#allocation16_spill] sm:$0xff] }
 0x425   :  { %v11894_v20 = vadd.f32 %v11348_v54, %v15000_v0  ;;  %v4794_v7 = vpop.f32.mrb[149].mxu0 }
 0x426   :  { %v5513_v3 = vmax.f32 %v5409_v63, %v5411_v22  ;;  %v11895_v23 = vadd.f32 %v4794_v7, %v15001_v19  ;;  %v11349_v32 = vpop.f32.mrb[150].mxu0 }
 0x427   :  { %v5238_v35 = vadd.f32 %v14070_v60, %v11894_v20  ;;  %v11896_v8 = vadd.f32 %v11349_v32, %v15002_v61  ;;  %v4797_v11 = vpop.f32.mrb[151].mxu0  ;;  %v15008_v61 = vld [vmem:[#allocation18_spill] sm:$0xff] }
 0x428   :  { %v5568_v58 = vpack.c.bf16 %v5513_v3, %v5512_v59  ;;  %v5236_v26 = vadd.f32 %v14070_v60, %v11895_v23  ;;  %v11897_v6 = vadd.f32 %v4797_v11, %v15003_v28  ;;  %v15007_v59 = vld [vmem:[#allocation17_spill] sm:$0xff] }
 0x429   :  { %v5414_v9 = vmax.f32 %v5238_v35, 0.0  ;;  %v5239_v10 = vadd.f32 %v14070_v60, %v11896_v8  ;;  %v14312_v15 = vld [vmem:[#allocation2 + $0x120] sm:$0xff] }
 0x42a   :  { %5613 = vst.msk [vmem:[#allocation2 + $0x128] sm:$0xff] %vm5528_vm3, %v5568_v58  ;;  %v5412_v37 = vmax.f32 %v5236_v26, 0.0  ;;  %v5237_v39 = vadd.f32 %v14070_v60, %v11897_v6  ;;  %11445 = vmatmul.mubr.msk.bf16.gmra.mrb[148].mxu1 %vm5528_vm3, %v14312_v15  ;;  %v15009_v26 = vld [vmem:[#allocation19_spill] sm:$0xff] }
 0x42b   :  { %v5415_v5 = vmax.f32 %v5239_v10, 0.0  ;;  %v15010_v10 = vld [vmem:[#allocation20_spill] sm:$0xff] }
 0x42c   :  { %v5514_v51 = vmax.f32 %v5412_v37, %v5414_v9  ;;  %v5413_v27 = vmax.f32 %v5237_v39, 0.0  ;;  %v11352_v52 = vpop.f32.mrb[152].mxu0 }
 0x42d   :  { %v11898_v33 = vadd.f32 %v11352_v52, %v15004_v29  ;;  %v4810_v12 = vpop.f32.mrb[153].mxu0 }
 0x42e   :  { %v5515_v40 = vmax.f32 %v5413_v27, %v5415_v5  ;;  %v11899_v30 = vadd.f32 %v4810_v12, %v15005_v55  ;;  %v11353_v4 = vpop.f32.mrb[154].mxu0  ;;  %v15011_v27 = vld [vmem:[#allocation21_spill] sm:$0xff] }
 0x42f   :  { %v5242_v16 = vadd.f32 %v14070_v60, %v11898_v33  ;;  %v11900_v48 = vadd.f32 %v11353_v4, %v15006_v17  ;;  %v4813_v57 = vpop.f32.mrb[155].mxu0 }
 0x430   :  { %v5569_v62 = vpack.c.bf16 %v5515_v40, %v5514_v51  ;;  %v5240_v22 = vadd.f32 %v14070_v60, %v11899_v30  ;;  %v11901_v63 = vadd.f32 %v4813_v57, %v15007_v59 }
 0x431   :  { %v5418_v54 = vmax.f32 %v5242_v16, 0.0  ;;  %v5243_v0 = vadd.f32 %v14070_v60, %v11900_v48  ;;  %v14325_v20 = vld [vmem:[#allocation2 + $0x128] sm:$0xff] }
 0x432   :  { %5614 = vst.msk [vmem:[#allocation2 + $0x130] sm:$0xff] %vm5528_vm3, %v5569_v62  ;;  %v5416_v7 = vmax.f32 %v5240_v22, 0.0  ;;  %v5241_v3 = vadd.f32 %v14070_v60, %v11901_v63  ;;  %11448 = vmatprep.mubr.msk.bf16.mxu1 %vm5528_vm3, %v14325_v20 }
 0x433   :  { %v5419_v19 = vmax.f32 %v5243_v0, 0.0 }
 0x434   :  { %v5516_v23 = vmax.f32 %v5416_v7, %v5418_v54  ;;  %v5417_v32 = vmax.f32 %v5241_v3, 0.0  ;;  %v11356_v35 = vpop.f32.mrb[156].mxu0 }
 0x435   :  { %v11902_v8 = vadd.f32 %v11356_v35, %v15008_v61  ;;  %v4826_v11 = vpop.f32.mrb[157].mxu0 }
 0x436   :  { %v5517_v58 = vmax.f32 %v5417_v32, %v5419_v19  ;;  %v11903_v28 = vadd.f32 %v4826_v11, %v15009_v26  ;;  %v11357_v6 = vpop.f32.mrb[158].mxu0  ;;  %v15012_v19 = vld [vmem:[#allocation22_spill] sm:$0xff]  ;;  %v15013_v26 = vld [vmem:[#allocation23_spill] sm:$0xff] }
 0x437   :  { %v5246_v9 = vadd.f32 %v14070_v60, %v11902_v8  ;;  %v11904_v37 = vadd.f32 %v11357_v6, %v15010_v10  ;;  %v4829_v39 = vpop.f32.mrb[159].mxu0  ;;  %v15014_v10 = vld [vmem:[#allocation24_spill] sm:$0xff] }
 0x438   :  { %v5570_v5 = vpack.c.bf16 %v5517_v58, %v5516_v23  ;;  %v5244_v51 = vadd.f32 %v14070_v60, %v11903_v28  ;;  %v11905_v52 = vadd.f32 %v4829_v39, %v15011_v27 }
 0x439   :  { %v5422_v29 = vmax.f32 %v5246_v9, 0.0  ;;  %v5247_v33 = vadd.f32 %v14070_v60, %v11904_v37  ;;  %v14338_v12 = vld [vmem:[#allocation2 + $0x130] sm:$0xff] }
 0x43a   :  { %5615 = vst.msk [vmem:[#allocation2 + $0x138] sm:$0xff] %vm5528_vm3, %v5570_v5  ;;  %v5420_v40 = vmax.f32 %v5244_v51, 0.0  ;;  %v5245_v55 = vadd.f32 %v14070_v60, %v11905_v52  ;;  %11449 = vmatmul.mubr.msk.bf16.gmra.mrb[152].mxu1 %vm5528_vm3, %v14338_v12 }
 0x43b   :  { %v5423_v30 = vmax.f32 %v5247_v33, 0.0 }
 0x43c   :  { %v5518_v4 = vmax.f32 %v5420_v40, %v5422_v29  ;;  %v5421_v16 = vmax.f32 %v5245_v55, 0.0  ;;  %v11360_v17 = vpop.f32.mrb[160].mxu0 }
 0x43d   :  { %v11906_v48 = vadd.f32 %v11360_v17, %v14102_v44  ;;  %v4842_v57 = vpop.f32.mrb[161].mxu0 }
 0x43e   :  { %v5519_v62 = vmax.f32 %v5421_v16, %v5423_v30  ;;  %v11907_v22 = vadd.f32 %v4842_v57, %v14104_v31  ;;  %v11361_v59 = vpop.f32.mrb[162].mxu0 }
 0x43f   :  { %v5250_v63 = vadd.f32 %v14070_v60, %v11906_v48  ;;  %v11908_v54 = vadd.f32 %v11361_v59, %v14106_v53  ;;  %v4845_v0 = vpop.f32.mrb[163].mxu0 }
 0x440   :  { %v5571_v7 = vpack.c.bf16 %v5519_v62, %v5518_v4  ;;  %v5248_v3 = vadd.f32 %v14070_v60, %v11907_v22  ;;  %v11909_v23 = vadd.f32 %v4845_v0, %v15012_v19 }
 0x441   :  { %v5426_v32 = vmax.f32 %v5250_v63, 0.0  ;;  %v5251_v35 = vadd.f32 %v14070_v60, %v11908_v54  ;;  %v14351_v61 = vld [vmem:[#allocation2 + $0x138] sm:$0xff] }
 0x442   :  { %5616 = vst.msk [vmem:[#allocation2 + $0x140] sm:$0xff] %vm5528_vm3, %v5571_v7  ;;  %v5424_v44 = vmax.f32 %v5248_v3, 0.0  ;;  %v5249_v31 = vadd.f32 %v14070_v60, %v11909_v23  ;;  %11452 = vmatprep.mubr.msk.bf16.mxu1 %vm5528_vm3, %v14351_v61  ;;  %v15015_v23 = vld [vmem:[#allocation25_spill] sm:$0xff] }
 0x443   :  { %v5427_v53 = vmax.f32 %v5251_v35, 0.0 }
 0x444   :  { %v5520_v8 = vmax.f32 %v5424_v44, %v5426_v32  ;;  %v5425_v11 = vmax.f32 %v5249_v31, 0.0  ;;  %v11364_v58 = vpop.f32.mrb[164].mxu0 }
 0x445   :  { %v11910_v28 = vadd.f32 %v11364_v58, %v15013_v26  ;;  %v4858_v6 = vpop.f32.mrb[165].mxu0 }
 0x446   :  { %v5521_v9 = vmax.f32 %v5425_v11, %v5427_v53  ;;  %v11911_v37 = vadd.f32 %v4858_v6, %v15014_v10  ;;  %v11365_v39 = vpop.f32.mrb[166].mxu0 }
 0x447   :  { %v5254_v5 = vadd.f32 %v14070_v60, %v11910_v28  ;;  %v11912_v51 = vadd.f32 %v11365_v39, %v14124_v25  ;;  %v4861_v27 = vpop.f32.mrb[167].mxu0 }
 0x448   :  { %v5572_v52 = vpack.c.bf16 %v5521_v9, %v5520_v8  ;;  %v5252_v29 = vadd.f32 %v14070_v60, %v11911_v37  ;;  %v11913_v33 = vadd.f32 %v4861_v27, %v14126_v41 }
 0x449   :  { %v5430_v40 = vmax.f32 %v5254_v5, 0.0  ;;  %v5255_v55 = vadd.f32 %v14070_v60, %v11912_v51  ;;  %v14364_v30 = vld [vmem:[#allocation2 + $0x140] sm:$0xff] }
 0x44a   :  { %5617 = vst.msk [vmem:[#allocation2 + $0x148] sm:$0xff] %vm5528_vm3, %v5572_v52  ;;  %v5428_v4 = vmax.f32 %v5252_v29, 0.0  ;;  %v5253_v16 = vadd.f32 %v14070_v60, %v11913_v33  ;;  %11453 = vmatmul.mubr.msk.bf16.gmra.mrb[156].mxu1 %vm5528_vm3, %v14364_v30 }
 0x44b   :  { %v5431_v25 = vmax.f32 %v5255_v55, 0.0 }
 0x44c   :  { %v5522_v17 = vmax.f32 %v5428_v4, %v5430_v40  ;;  %v5429_v48 = vmax.f32 %v5253_v16, 0.0  ;;  %v11368_v57 = vpop.f32.mrb[168].mxu0 }
 0x44d   :  { %v11914_v62 = vadd.f32 %v11368_v57, %v14136_v2  ;;  %v4874_v41 = vpop.f32.mrb[169].mxu0  ;;  %v14412_v57 = vld [vmem:[#allocation2 + $0x18] sm:$0xff] }
 0x44e   :  { %v5523_v22 = vmax.f32 %v5429_v48, %v5431_v25  ;;  %v11915_v59 = vadd.f32 %v4874_v41, %v14140_v24  ;;  %v11369_v63 = vpop.f32.mrb[170].mxu0  ;;  %v14407_v48 = vld [vmem:[#allocation2 + $0x10] sm:$0xff]  ;;  %v14420_v41 = vld [vmem:[#allocation2 + $0x28] sm:$0xff] }
 0x44f   :  { %v5258_v54 = vadd.f32 %v14070_v60, %v11914_v62  ;;  %v11916_v0 = vadd.f32 %v11369_v63, %v14142_v18  ;;  %v4877_v7 = vpop.f32.mrb[171].mxu0  ;;  %v14416_v62 = vld [vmem:[#allocation2 + $0x20] sm:$0xff]  ;;  %v14436_v63 = vld [vmem:[#allocation2 + $0x48] sm:$0xff] }
 0x450   :  { %v5573_v3 = vpack.c.bf16 %v5523_v22, %v5522_v17  ;;  %v5256_v19 = vadd.f32 %v14070_v60, %v11915_v59  ;;  %v11917_v32 = vadd.f32 %v4877_v7, %v15015_v23  ;;  %v14424_v22 = vld [vmem:[#allocation2 + $0x30] sm:$0xff]  ;;  %v14432_v59 = vld [vmem:[#allocation2 + $0x40] sm:$0xff]  ;;  %v5636_v23 = vld [vmem:[#allocation2 + $0x78] sm:$0xff] }
 0x451   :  { %v5434_v35 = vmax.f32 %v5258_v54, 0.0  ;;  %v5259_v44 = vadd.f32 %v14070_v60, %v11916_v0  ;;  %v14377_v31 = vld [vmem:[#allocation2 + $0x148] sm:$0xff]  ;;  %v14440_v54 = vld [vmem:[#allocation2 + $0x50] sm:$0xff]  ;;  %v14444_v0 = vld [vmem:[#allocation2 + $0x58] sm:$0xff] }
 0x452   :  { %5618 = vst.msk [vmem:[#allocation2 + $0x150] sm:$0xff] %vm5528_vm3, %v5573_v3  ;;  %v5432_v2 = vmax.f32 %v5256_v19, 0.0  ;;  %v5257_v24 = vadd.f32 %v14070_v60, %v11917_v32  ;;  %11456 = vmatprep.mubr.msk.bf16.mxu1 %vm5528_vm3, %v14377_v31  ;;  %v14448_v7 = vld [vmem:[#allocation2 + $0x60] sm:$0xff]  ;;  %v14452_v3 = vld [vmem:[#allocation2 + $0x68] sm:$0xff]  ;;  %v5635_v19 = vld [vmem:[#allocation2 + $0x70] sm:$0xff] }
 0x453   :  { %v5435_v18 = vmax.f32 %v5259_v44, 0.0  ;;  %v5637_v32 = vld [vmem:[#allocation2 + $0x80] sm:$0xff]  ;;  %v5639_v44 = vld [vmem:[#allocation2 + $0x90] sm:$0xff] }
 0x454   :  { %v5524_v53 = vmax.f32 %v5432_v2, %v5434_v35  ;;  %v5433_v8 = vmax.f32 %v5257_v24, 0.0  ;;  %v11372_v11 = vpop.f32.mrb[172].mxu0  ;;  %v5638_v35 = vld [vmem:[#allocation2 + $0x88] sm:$0xff]  ;;  %v5640_v2 = vld [vmem:[#allocation2 + $0x98] sm:$0xff]  ;;  %v5641_v24 = vld [vmem:[#allocation2 + $0xa0] sm:$0xff] }
 0x455   :  { %v11918_v58 = vadd.f32 %v11372_v11, %v14155_v42  ;;  %v4890_v26 = vpop.f32.mrb[173].mxu0  ;;  %v5645_v11 = vld [vmem:[#allocation2 + $0xc0] sm:$0xff] }
 0x456   :  { %v5525_v28 = vmax.f32 %v5433_v8, %v5435_v18  ;;  %v11919_v6 = vadd.f32 %v4890_v26, %v14161_v47  ;;  %v11373_v9 = vpop.f32.mrb[174].mxu0  ;;  %v5642_v18 = vld [vmem:[#allocation2 + $0xa8] sm:$0xff]  ;;  %v5644_v8 = vld [vmem:[#allocation2 + $0xb8] sm:$0xff]  ;;  %v12696_v26 = vmov 0.0  }
 0x457   :  { %v5262_v10 = vadd.f32 %v14070_v60, %v11918_v58  ;;  %v11920_v37 = vadd.f32 %v11373_v9, %v14163_v56  ;;  %v4893_v39 = vpop.f32.mrb[175].mxu0  ;;  %v15016_v58 = vld [vmem:[#allocation26_spill] sm:$0xff]  ;;  %v6787_v9 = vld [vmem:[#allocation2 + $0xe0] sm:$0xff] }
 0x458   :  { %v5574_v5 = vpack.c.bf16 %v5525_v28, %v5524_v53  ;;  %v5260_v51 = vadd.f32 %v14070_v60, %v11919_v6  ;;  %v11921_v27 = vadd.f32 %v4893_v39, %v14165_v38  ;;  %v5621_v38 = vld [vmem:[#allocation2] sm:$0xff]  ;;  %v5643_v53 = vld [vmem:[#allocation2 + $0xb0] sm:$0xff]  ;;  %v6786_v6 = vld [vmem:[#allocation2 + $0xd8] sm:$0xff] }
 0x459   :  { %v5438_v52 = vmax.f32 %v5262_v10, 0.0  ;;  %v5263_v29 = vadd.f32 %v14070_v60, %v11920_v37  ;;  %v14390_v33 = vld [vmem:[#allocation2 + $0x150] sm:$0xff] }
 0x45a   :  { %5619 = vst.msk [vmem:[#allocation2 + $0x158] sm:$0xff] %vm5528_vm3, %v5574_v5  ;;  %v5436_v42 = vmax.f32 %v5260_v51, 0.0  ;;  %v5261_v47 = vadd.f32 %v14070_v60, %v11921_v27  ;;  %11457 = vmatmul.mubr.msk.bf16.gmra.mrb[160].mxu1 %vm5528_vm3, %v14390_v33  ;;  %v5622_v60 = vld [vmem:[#allocation2 + $0x8] sm:$0xff]  ;;  %v6785_v28 = vld [vmem:[#allocation2 + $0xd0] sm:$0xff] }
 0x45b   :  { %v5439_v56 = vmax.f32 %v5263_v29, 0.0 }
 0x45c   :  { %v5526_v40 = vmax.f32 %v5436_v42, %v5438_v52  ;;  %v5437_v55 = vmax.f32 %v5261_v47, 0.0 }
 0x45e   :  { %v5527_v4 = vmax.f32 %v5437_v55, %v5439_v56 }
 0x460   :  { %v5575_v16 = vpack.c.bf16 %v5527_v4, %v5526_v40 }
 0x461   :  { %v14396_v25 = vld [vmem:[#allocation2 + $0x158] sm:$0xff] }
 0x462   :  { %5620 = vst.msk [vmem:[#allocation2 + $0x160] sm:$0xff] %vm5528_vm3, %v5575_v16  ;;  %11460 = vmatprep.mubr.msk.bf16.mxu1 %vm5528_vm3, %v14396_v25 }
 0x469   :  { %v14401_v17 = vld [vmem:[#allocation2 + $0x160] sm:$0xff] }
 0x46a   :  { %11461 = vmatmul.mubr.msk.bf16.gmra.mrb[164].mxu1 %vm5528_vm3, %v14401_v17 }
 0x46b   :  { %11466 = vmatprep.mubr.msk.bf16.mxu1 %vm5528_vm3, %v5621_v38 }
 0x472   :  { %11467 = vmatmul.mubr.msk.bf16.vlgmr.msra.gmra.mrb[80].mxu1 %vm5528_vm3, %v5622_v60 }
 0x473   :  { %11470 = vmatprep.mubr.msk.bf16.mxu1 %vm5528_vm3, %v14407_v48  ;;  %11555 = vmatpush3.bf16.msra.mxu1 %v14224_v34  ;;  %v14428_v34 = vld [vmem:[#allocation2 + $0x38] sm:$0xff] }
 0x474   :  { %11644 = vmatprep.subr.bf16.mxu1 %v12696_v26 }
 0x47a   :  { %11471 = vmatmul.mubr.msk.bf16.gmra.mrb[84].mxu1 %vm5528_vm3, %v14412_v57 }
 0x47b   :  { %11474 = vmatprep.mubr.msk.bf16.mxu1 %vm5528_vm3, %v14416_v62 }
 0x482   :  { %11475 = vmatmul.mubr.msk.bf16.gmra.mrb[88].mxu1 %vm5528_vm3, %v14420_v41 }
 0x483   :  { %11478 = vmatprep.mubr.msk.bf16.mxu1 %vm5528_vm3, %v14424_v22 }
 0x48a   :  { %11479 = vmatmul.mubr.msk.bf16.gmra.mrb[92].mxu1 %vm5528_vm3, %v14428_v34 }
 0x48b   :  { %11482 = vmatprep.mubr.msk.bf16.mxu1 %vm5528_vm3, %v14432_v59 }
 0x492   :  { %11483 = vmatmul.mubr.msk.bf16.gmra.mrb[96].mxu1 %vm5528_vm3, %v14436_v63 }
 0x493   :  { %11486 = vmatprep.mubr.msk.bf16.mxu1 %vm5528_vm3, %v14440_v54 }
 0x49a   :  { %11487 = vmatmul.mubr.msk.bf16.gmra.mrb[100].mxu1 %vm5528_vm3, %v14444_v0 }
 0x49b   :  { %11490 = vmatprep.mubr.msk.bf16.mxu1 %vm5528_vm3, %v14448_v7 }
 0x4a2   :  { %11491 = vmatmul.mubr.msk.bf16.gmra.mrb[104].mxu1 %vm5528_vm3, %v14452_v3 }
 0x4a3   :  { %11494 = vmatprep.mubr.msk.bf16.mxu1 %vm5528_vm3, %v5635_v19 }
 0x4aa   :  { %11495 = vmatmul.mubr.msk.bf16.gmra.mrb[108].mxu1 %vm5528_vm3, %v5636_v23 }
 0x4ab   :  { %11498 = vmatprep.mubr.msk.bf16.mxu1 %vm5528_vm3, %v5637_v32 }
 0x4b2   :  { %11499 = vmatmul.mubr.msk.bf16.gmra.mrb[112].mxu1 %vm5528_vm3, %v5638_v35 }
 0x4b3   :  { %11502 = vmatprep.mubr.msk.bf16.mxu1 %vm5528_vm3, %v5639_v44 }
 0x4ba   :  { %11503 = vmatmul.mubr.msk.bf16.gmra.mrb[116].mxu1 %vm5528_vm3, %v5640_v2 }
 0x4bb   :  { %11506 = vmatprep.mubr.msk.bf16.mxu1 %vm5528_vm3, %v5641_v24 }
 0x4c2   :  { %11507 = vmatmul.mubr.msk.bf16.gmra.mrb[120].mxu1 %vm5528_vm3, %v5642_v18 }
 0x4c3   :  { %11510 = vmatprep.mubr.msk.bf16.mxu1 %vm5528_vm3, %v5643_v53 }
 0x4ca   :  { %11511 = vmatmul.mubr.msk.bf16.gmra.mrb[124].mxu1 %vm5528_vm3, %v5644_v8 }
 0x4cb   :  { %11514 = vmatprep.mubr.msk.bf16.mxu1 %vm5528_vm3, %v5645_v11 }
 0x4d2   :  { %11515 = vmatmul.mubr.msk.bf16.gmra.mrb[128].mxu1 %vm5528_vm3, %v15016_v58 }
 0x4d3   :  { %11518 = vmatprep.mubr.msk.bf16.mxu1 %vm5528_vm3, %v14174_v49  ;;  %v12641_v49 = vld [vmem:[%s14962_s5 + $0x10] sm:$0xff]  }
 0x4da   :  { %11519 = vmatmul.mubr.msk.bf16.gmra.mrb[132].mxu1 %vm5528_vm3, %v14187_v46  ;;  %v12642_v46 = vld [vmem:[%s14962_s5 + $0x18] sm:$0xff]  }
 0x4db   :  { %11522 = vmatprep.mubr.msk.bf16.mxu1 %vm5528_vm3, %v14200_v1  ;;  %v6784_v1 = vld [vmem:[#allocation2 + $0xc8] sm:$0xff] }
 0x4e2   :  { %11523 = vmatmul.mubr.msk.bf16.gmra.mrb[136].mxu1 %vm5528_vm3, %v14215_v13 }
 0x4e3   :  { %11526 = vmatprep.mubr.msk.bf16.mxu1 %vm5528_vm3, %v14234_v36 }
 0x4ea   :  { %11527 = vmatmul.mubr.msk.bf16.gmra.mrb[140].mxu1 %vm5528_vm3, %v14247_v45 }
 0x4eb   :  { %11530 = vmatprep.mubr.msk.bf16.mxu1 %vm5528_vm3, %v14260_v14 }
 0x4f2   :  { %11531 = vmatmul.mubr.msk.bf16.gmra.mrb[144].mxu1 %vm5528_vm3, %v14273_v43 }
 0x4f3   :  { %11534 = vmatprep.mubr.msk.bf16.mxu1 %vm5528_vm3, %v14286_v21 }
 0x4fa   :  { %11535 = vmatmul.mubr.msk.bf16.gmra.mrb[148].mxu1 %vm5528_vm3, %v14299_v50 }
 0x4fb   :  { %11538 = vmatprep.mubr.msk.bf16.mxu1 %vm5528_vm3, %v14312_v15 }
 0x502   :  { %11539 = vmatmul.mubr.msk.bf16.gmra.mrb[152].mxu1 %vm5528_vm3, %v14325_v20 }
 0x503   :  { %11542 = vmatprep.mubr.msk.bf16.mxu1 %vm5528_vm3, %v14338_v12 }
 0x50a   :  { %11543 = vmatmul.mubr.msk.bf16.gmra.mrb[156].mxu1 %vm5528_vm3, %v14351_v61 }
 0x50b   :  { %11546 = vmatprep.mubr.msk.bf16.mxu1 %vm5528_vm3, %v14364_v30 }
 0x512   :  { %11547 = vmatmul.mubr.msk.bf16.gmra.mrb[160].mxu1 %vm5528_vm3, %v14377_v31 }
 0x513   :  { %11550 = vmatprep.mubr.msk.bf16.mxu1 %vm5528_vm3, %v14390_v33 }
 0x51a   :  { %11551 = vmatmul.mubr.msk.bf16.gmra.mrb[164].mxu1 %vm5528_vm3, %v14396_v25 }
 0x51b   :  { %11556 = vmatprep.mubr.msk.bf16.mxu1 %vm5528_vm3, %v14407_v48 }
 0x522   :  { %11557 = vmatmul.mubr.msk.bf16.vlgmr.msra.gmra.mrb[80].mxu1 %vm5528_vm3, %v14412_v57  ;;  %v12643_v57 = vld [vmem:[%s14962_s5] sm:$0xff]  }
 0x523   :  { %11560 = vmatprep.mubr.msk.bf16.mxu1 %vm5528_vm3, %v14416_v62  ;;  %11645 = vmatpush3.bf16.msra.mxu1 %v12641_v49 }
 0x524   :  { %11646 = vmatprep.subr.bf16.mxu1 %v12696_v26 }
 0x527   :  { %11647 = vmatpush3.bf16.msra.mxu1 %v12642_v46 }
 0x528   :  { %11652 = vmatprep.subr.bf16.mxu1 %v12696_v26 }
 0x52a   :  { %11561 = vmatmul.mubr.msk.bf16.gmra.mrb[84].mxu1 %vm5528_vm3, %v14420_v41 }
 0x52b   :  { %11564 = vmatprep.mubr.msk.bf16.mxu1 %vm5528_vm3, %v14424_v22 }
 0x532   :  { %11565 = vmatmul.mubr.msk.bf16.gmra.mrb[88].mxu1 %vm5528_vm3, %v14428_v34 }
 0x533   :  { %11568 = vmatprep.mubr.msk.bf16.mxu1 %vm5528_vm3, %v14432_v59 }
 0x53a   :  { %11569 = vmatmul.mubr.msk.bf16.gmra.mrb[92].mxu1 %vm5528_vm3, %v14436_v63 }
 0x53b   :  { %11572 = vmatprep.mubr.msk.bf16.mxu1 %vm5528_vm3, %v14440_v54 }
 0x542   :  { %11573 = vmatmul.mubr.msk.bf16.gmra.mrb[96].mxu1 %vm5528_vm3, %v14444_v0 }
 0x543   :  { %11576 = vmatprep.mubr.msk.bf16.mxu1 %vm5528_vm3, %v14448_v7 }
 0x54a   :  { %11577 = vmatmul.mubr.msk.bf16.gmra.mrb[100].mxu1 %vm5528_vm3, %v14452_v3  ;;  %v12644_v3 = vld [vmem:[%s14962_s5 + $0x8] sm:$0xff]  }
 0x54b   :  { %11580 = vmatprep.mubr.msk.bf16.mxu1 %vm5528_vm3, %v5635_v19 }
 0x552   :  { %11581 = vmatmul.mubr.msk.bf16.gmra.mrb[104].mxu1 %vm5528_vm3, %v5636_v23 }
 0x553   :  { %11584 = vmatprep.mubr.msk.bf16.mxu1 %vm5528_vm3, %v5637_v32 }
 0x55a   :  { %11585 = vmatmul.mubr.msk.bf16.gmra.mrb[108].mxu1 %vm5528_vm3, %v5638_v35 }
 0x55b   :  { %11588 = vmatprep.mubr.msk.bf16.mxu1 %vm5528_vm3, %v5639_v44 }
 0x562   :  { %11589 = vmatmul.mubr.msk.bf16.gmra.mrb[112].mxu1 %vm5528_vm3, %v5640_v2 }
 0x563   :  { %11592 = vmatprep.mubr.msk.bf16.mxu1 %vm5528_vm3, %v5641_v24  ;;  %v12645_v24 = vld [vmem:[%s14962_s5 + $0x20] sm:$0xff]  }
 0x56a   :  { %11593 = vmatmul.mubr.msk.bf16.gmra.mrb[116].mxu1 %vm5528_vm3, %v5642_v18 }
 0x56b   :  { %11596 = vmatprep.mubr.msk.bf16.mxu1 %vm5528_vm3, %v5643_v53 }
 0x572   :  { %11597 = vmatmul.mubr.msk.bf16.gmra.mrb[120].mxu1 %vm5528_vm3, %v5644_v8 }
 0x573   :  { %11600 = vmatprep.mubr.msk.bf16.mxu1 %vm5528_vm3, %v5645_v11 }
 0x57a   :  { %11601 = vmatmul.mubr.msk.bf16.gmra.mrb[124].mxu1 %vm5528_vm3, %v6784_v1 }
 0x57b   :  { %11604 = vmatprep.mubr.msk.bf16.mxu1 %vm5528_vm3, %v6785_v28 }
 0x582   :  { %11605 = vmatmul.mubr.msk.bf16.gmra.mrb[128].mxu1 %vm5528_vm3, %v6786_v6  ;;  %v12646_v6 = vld [vmem:[%s14962_s5 + $0x28] sm:$0xff]  }
 0x583   :  { %11608 = vmatprep.mubr.msk.bf16.mxu1 %vm5528_vm3, %v6787_v9 }
 0x58a   :  { %11609 = vmatmul.mubr.msk.bf16.gmra.mrb[132].mxu1 %vm5528_vm3, %v14215_v13  ;;  %v6804_v13 = vld [vmem:[#allocation2 + $0x168] sm:$0xff] }
 0x58b   :  { %11612 = vmatprep.mubr.msk.bf16.mxu1 %vm5528_vm3, %v14234_v36  ;;  %v14591_v36 = vld [vmem:[%s14963_s4] ss:$0 sm:$0xff] }
 0x592   :  { %11613 = vmatmul.mubr.msk.bf16.gmra.mrb[136].mxu1 %vm5528_vm3, %v14247_v45 }
 0x593   :  { %11616 = vmatprep.mubr.msk.bf16.mxu1 %vm5528_vm3, %v14260_v14 }
 0x59a   :  { %11617 = vmatmul.mubr.msk.bf16.gmra.mrb[140].mxu1 %vm5528_vm3, %v14273_v43 }
 0x59b   :  { %11620 = vmatprep.mubr.msk.bf16.mxu1 %vm5528_vm3, %v14286_v21 }
 0x5a2   :  { %11621 = vmatmul.mubr.msk.bf16.gmra.mrb[144].mxu1 %vm5528_vm3, %v14299_v50 }
 0x5a3   :  { %11624 = vmatprep.mubr.msk.bf16.mxu1 %vm5528_vm3, %v14312_v15 }
 0x5aa   :  { %11625 = vmatmul.mubr.msk.bf16.gmra.mrb[148].mxu1 %vm5528_vm3, %v14325_v20 }
 0x5ab   :  { %11628 = vmatprep.mubr.msk.bf16.mxu1 %vm5528_vm3, %v14338_v12 }
 0x5b2   :  { %11629 = vmatmul.mubr.msk.bf16.gmra.mrb[152].mxu1 %vm5528_vm3, %v14351_v61 }
 0x5b3   :  { %11632 = vmatprep.mubr.msk.bf16.mxu1 %vm5528_vm3, %v14364_v30 }
 0x5ba   :  { %11633 = vmatmul.mubr.msk.bf16.gmra.mrb[156].mxu1 %vm5528_vm3, %v14377_v31 }
 0x5bb   :  { %11636 = vmatprep.mubr.msk.bf16.mxu1 %vm5528_vm3, %v14390_v33 }
 0x5c2   :  { %11637 = vmatmul.mubr.msk.bf16.gmra.mrb[160].mxu1 %vm5528_vm3, %v14396_v25 }
 0x5c3   :  { %11640 = vmatprep.mubr.msk.bf16.mxu1 %vm5528_vm3, %v14401_v17 }
 0x5ca   :  { %11641 = vmatmul.mubr.msk.bf16.gmra.mrb[164].mxu1 %vm5528_vm3, %v6804_v13 }
 0x5cb   :  { %11648 = vmatprep.mubr.msk.bf16.mxu1 %vm12697_vm4, %v12696_v26 }
 0x5f5   :  { %v11558_v45 = vpop.f32.mrb[80].mxu1 }
 0x5f6   :  { %v7428_v14 = vadd.f32 %v11558_v45, %v14591_v36  ;;  %v6980_v43 = vpop.f32.mrb[81].mxu1 }
 0x5f7   :  { %v7426_v21 = vadd.f32 %v14591_v36, %v6980_v43  ;;  %v11559_v50 = vpop.f32.mrb[82].mxu1 }
 0x5f8   :  { %v7516_v15 = vmax.f32 %v7428_v14, 0.0  ;;  %v7429_v20 = vadd.f32 %v11559_v50, %v14591_v36  ;;  %v6983_v12 = vpop.f32.mrb[83].mxu1  ;;  %v12647_v50 = vld [vmem:[%s14962_s5 + $0x30] sm:$0xff]  }
 0x5f9   :  { %v7514_v61 = vmax.f32 %v7426_v21, 0.0  ;;  %v7427_v30 = vadd.f32 %v14591_v36, %v6983_v12 }
 0x5fa   :  { %v7517_v31 = vmax.f32 %v7429_v20, 0.0 }
 0x5fb   :  { %v7602_v10 = vmax.f32 %v7514_v61, %v7516_v15  ;;  %v7515_v37 = vmax.f32 %v7427_v30, 0.0 }
 0x5fd   :  { %v7603_v39 = vmax.f32 %v7515_v37, %v7517_v31  ;;  %v11562_v5 = vpop.f32.mrb[84].mxu1 }
 0x5fe   :  { %v7432_v51 = vadd.f32 %v11562_v5, %v14591_v36  ;;  %v6996_v27 = vpop.f32.mrb[85].mxu1  ;;  %v12648_v5 = vld [vmem:[%s14962_s5 + $0x38] sm:$0xff]  }
 0x5ff   :  { %v7646_v52 = vpack.c.bf16 %v7603_v39, %v7602_v10  ;;  %v7430_v29 = vadd.f32 %v14591_v36, %v6996_v27  ;;  %v11563_v33 = vpop.f32.mrb[86].mxu1 }
 0x600   :  { %v7520_v42 = vmax.f32 %v7432_v51, 0.0  ;;  %v7433_v47 = vadd.f32 %v11563_v33, %v14591_v36  ;;  %v6999_v56 = vpop.f32.mrb[87].mxu1 }
 0x601   :  { %v7518_v40 = vmax.f32 %v7430_v29, 0.0  ;;  %v7431_v55 = vadd.f32 %v14591_v36, %v6999_v56 }
 0x602   :  { %v7521_v4 = vmax.f32 %v7433_v47, 0.0  ;;  %v12649_v47 = vld [vmem:[%s14962_s5 + $0x40] sm:$0xff]  }
 0x603   :  { %v7604_v16 = vmax.f32 %v7518_v40, %v7520_v42  ;;  %v7519_v25 = vmax.f32 %v7431_v55, 0.0 }
 0x605   :  { %v7605_v38 = vmax.f32 %v7519_v25, %v7521_v4  ;;  %v11566_v17 = vpop.f32.mrb[88].mxu1 }
 0x606   :  { %v7436_v60 = vadd.f32 %v11566_v17, %v14591_v36  ;;  %v7012_v48 = vpop.f32.mrb[89].mxu1 }
 0x607   :  { %v7647_v62 = vpack.c.bf16 %v7605_v38, %v7604_v16  ;;  %v7434_v41 = vadd.f32 %v14591_v36, %v7012_v48  ;;  %v11567_v22 = vpop.f32.mrb[90].mxu1  ;;  %v12650_v48 = vld [vmem:[%s14962_s5 + $0x48] sm:$0xff]  }
 0x608   :  { %v7524_v34 = vmax.f32 %v7436_v60, 0.0  ;;  %v7437_v59 = vadd.f32 %v11567_v22, %v14591_v36  ;;  %v7015_v63 = vpop.f32.mrb[91].mxu1 }
 0x609   :  { %v7522_v54 = vmax.f32 %v7434_v41, 0.0  ;;  %v7435_v0 = vadd.f32 %v14591_v36, %v7015_v63  ;;  %11649 = vmatmul.mubr.msk.bf16.vlgmr.msra.gmra.mrb[168].mxu1 %vm7689_vm5, %v7647_v62  ;;  %v12651_v63 = vld [vmem:[%s14962_s5 + $0x50] sm:$0xff]  }
 0x60a   :  { %v7525_v7 = vmax.f32 %v7437_v59, 0.0  ;;  %11653 = vmatpush3.bf16.msra.mxu1 %v12643_v57  ;;  %11656 = vmatprep.mubr.msk.bf16.mxu1 %vm12697_vm4, %v12696_v26 }
 0x60b   :  { %v7606_v19 = vmax.f32 %v7522_v54, %v7524_v34  ;;  %v7523_v23 = vmax.f32 %v7435_v0, 0.0  ;;  %11654 = vmatprep.subr.bf16.mxu1 %v12696_v26 }
 0x60d   :  { %v7607_v32 = vmax.f32 %v7523_v23, %v7525_v7  ;;  %v11570_v35 = vpop.f32.mrb[92].mxu1 }
 0x60e   :  { %v7440_v44 = vadd.f32 %v11570_v35, %v14591_v36  ;;  %v7028_v2 = vpop.f32.mrb[93].mxu1  ;;  %11655 = vmatpush3.bf16.msra.mxu1 %v12644_v3 }
 0x60f   :  { %v7648_v18 = vpack.c.bf16 %v7607_v32, %v7606_v19  ;;  %v7438_v53 = vadd.f32 %v14591_v36, %v7028_v2  ;;  %v11571_v8 = vpop.f32.mrb[94].mxu1  ;;  %11660 = vmatprep.subr.bf16.mxu1 %v12696_v26  ;;  %v12652_v2 = vld [vmem:[%s14962_s5 + $0x58] sm:$0xff]  }
 0x610   :  { %v7528_v11 = vmax.f32 %v7440_v44, 0.0  ;;  %v7441_v58 = vadd.f32 %v11571_v8, %v14591_v36  ;;  %v7031_v49 = vpop.f32.mrb[95].mxu1 }
 0x611   :  { %v7526_v46 = vmax.f32 %v7438_v53, 0.0  ;;  %v7439_v1 = vadd.f32 %v14591_v36, %v7031_v49  ;;  %11657 = vmatmul.mubr.msk.bf16.vlgmr.msra.gmra.mrb[172].mxu1 %vm7689_vm5, %v7646_v52  ;;  %v12653_v49 = vld [vmem:[%s14962_s5 + $0x60] sm:$0xff]  }
 0x612   :  { %v7529_v28 = vmax.f32 %v7441_v58, 0.0  ;;  %11661 = vmatpush3.bf16.msra.mxu1 %v12645_v24  ;;  %11664 = vmatprep.mubr.msk.bf16.mxu1 %vm12697_vm4, %v12696_v26 }
 0x613   :  { %v7608_v9 = vmax.f32 %v7526_v46, %v7528_v11  ;;  %v7527_v13 = vmax.f32 %v7439_v1, 0.0  ;;  %11662 = vmatprep.subr.bf16.mxu1 %v12696_v26 }
 0x615   :  { %v7609_v45 = vmax.f32 %v7527_v13, %v7529_v28  ;;  %v11574_v14 = vpop.f32.mrb[96].mxu1 }
 0x616   :  { %v7444_v43 = vadd.f32 %v11574_v14, %v14591_v36  ;;  %v7044_v21 = vpop.f32.mrb[97].mxu1  ;;  %11663 = vmatpush3.bf16.msra.mxu1 %v12646_v6 }
 0x617   :  { %v7649_v15 = vpack.c.bf16 %v7609_v45, %v7608_v9  ;;  %v7442_v20 = vadd.f32 %v14591_v36, %v7044_v21  ;;  %v11575_v12 = vpop.f32.mrb[98].mxu1  ;;  %11668 = vmatprep.subr.bf16.mxu1 %v12696_v26  ;;  %v12654_v21 = vld [vmem:[%s14962_s5 + $0x68] sm:$0xff]  }
 0x618   :  { %v7532_v61 = vmax.f32 %v7444_v43, 0.0  ;;  %v7445_v30 = vadd.f32 %v11575_v12, %v14591_v36  ;;  %v7047_v31 = vpop.f32.mrb[99].mxu1 }
 0x619   :  { %v7530_v10 = vmax.f32 %v7442_v20, 0.0  ;;  %v7443_v37 = vadd.f32 %v14591_v36, %v7047_v31  ;;  %11665 = vmatmul.mubr.msk.bf16.vlgmr.msra.gmra.mrb[176].mxu1 %vm7689_vm5, %v7648_v18  ;;  %v12655_v31 = vld [vmem:[%s14962_s5 + $0x70] sm:$0xff]  }
 0x61a   :  { %v7533_v39 = vmax.f32 %v7445_v30, 0.0  ;;  %11669 = vmatpush3.bf16.msra.mxu1 %v12647_v50  ;;  %11672 = vmatprep.mubr.msk.bf16.mxu1 %vm12697_vm4, %v12696_v26 }
 0x61b   :  { %v7610_v51 = vmax.f32 %v7530_v10, %v7532_v61  ;;  %v7531_v27 = vmax.f32 %v7443_v37, 0.0  ;;  %11670 = vmatprep.subr.bf16.mxu1 %v12696_v26 }
 0x61d   :  { %v7611_v52 = vmax.f32 %v7531_v27, %v7533_v39  ;;  %v11578_v29 = vpop.f32.mrb[100].mxu1 }
 0x61e   :  { %v7448_v33 = vadd.f32 %v11578_v29, %v14591_v36  ;;  %v7060_v42 = vpop.f32.mrb[101].mxu1  ;;  %11671 = vmatpush3.bf16.msra.mxu1 %v12648_v5 }
 0x61f   :  { %v7650_v56 = vpack.c.bf16 %v7611_v52, %v7610_v51  ;;  %v7446_v40 = vadd.f32 %v14591_v36, %v7060_v42  ;;  %v11579_v55 = vpop.f32.mrb[102].mxu1  ;;  %11676 = vmatprep.subr.bf16.mxu1 %v12696_v26  ;;  %v12656_v42 = vld [vmem:[%s14962_s5 + $0x78] sm:$0xff]  }
 0x620   :  { %v7536_v4 = vmax.f32 %v7448_v33, 0.0  ;;  %v7449_v16 = vadd.f32 %v11579_v55, %v14591_v36  ;;  %v7063_v25 = vpop.f32.mrb[103].mxu1 }
 0x621   :  { %v7534_v38 = vmax.f32 %v7446_v40, 0.0  ;;  %v7447_v17 = vadd.f32 %v14591_v36, %v7063_v25  ;;  %11673 = vmatmul.mubr.msk.bf16.vlgmr.msra.gmra.mrb[180].mxu1 %vm7689_vm5, %v7649_v15  ;;  %v12657_v25 = vld [vmem:[%s14962_s5 + $0x80] sm:$0xff]  }
 0x622   :  { %v7537_v60 = vmax.f32 %v7449_v16, 0.0  ;;  %11677 = vmatpush3.bf16.msra.mxu1 %v12649_v47  ;;  %11680 = vmatprep.mubr.msk.bf16.mxu1 %vm12697_vm4, %v12696_v26 }
 0x623   :  { %v7612_v57 = vmax.f32 %v7534_v38, %v7536_v4  ;;  %v7535_v62 = vmax.f32 %v7447_v17, 0.0  ;;  %11678 = vmatprep.subr.bf16.mxu1 %v12696_v26 }
 0x625   :  { %v7613_v41 = vmax.f32 %v7535_v62, %v7537_v60  ;;  %v11582_v22 = vpop.f32.mrb[104].mxu1 }
 0x626   :  { %v7452_v34 = vadd.f32 %v11582_v22, %v14591_v36  ;;  %v7076_v59 = vpop.f32.mrb[105].mxu1  ;;  %11679 = vmatpush3.bf16.msra.mxu1 %v12650_v48 }
 0x627   :  { %v7651_v54 = vpack.c.bf16 %v7613_v41, %v7612_v57  ;;  %v7450_v0 = vadd.f32 %v14591_v36, %v7076_v59  ;;  %v11583_v7 = vpop.f32.mrb[106].mxu1  ;;  %11684 = vmatprep.subr.bf16.mxu1 %v12696_v26  ;;  %v12658_v59 = vld [vmem:[%s14962_s5 + $0x88] sm:$0xff]  }
 0x628   :  { %v7540_v3 = vmax.f32 %v7452_v34, 0.0  ;;  %v7453_v19 = vadd.f32 %v11583_v7, %v14591_v36  ;;  %v7079_v23 = vpop.f32.mrb[107].mxu1 }
 0x629   :  { %v7538_v32 = vmax.f32 %v7450_v0, 0.0  ;;  %v7451_v35 = vadd.f32 %v14591_v36, %v7079_v23  ;;  %11681 = vmatmul.mubr.msk.bf16.vlgmr.msra.gmra.mrb[184].mxu1 %vm7689_vm5, %v7650_v56  ;;  %v12659_v23 = vld [vmem:[%s14962_s5 + $0x90] sm:$0xff]  }
 0x62a   :  { %v7541_v44 = vmax.f32 %v7453_v19, 0.0  ;;  %11685 = vmatpush3.bf16.msra.mxu1 %v12651_v63  ;;  %11688 = vmatprep.mubr.msk.bf16.mxu1 %vm12697_vm4, %v12696_v26 }
 0x62b   :  { %v7614_v24 = vmax.f32 %v7538_v32, %v7540_v3  ;;  %v7539_v18 = vmax.f32 %v7451_v35, 0.0  ;;  %11686 = vmatprep.subr.bf16.mxu1 %v12696_v26 }
 0x62d   :  { %v7615_v53 = vmax.f32 %v7539_v18, %v7541_v44  ;;  %v11586_v8 = vpop.f32.mrb[108].mxu1 }
 0x62e   :  { %v7456_v11 = vadd.f32 %v11586_v8, %v14591_v36  ;;  %v7092_v58 = vpop.f32.mrb[109].mxu1  ;;  %11687 = vmatpush3.bf16.msra.mxu1 %v12652_v2 }
 0x62f   :  { %v7652_v46 = vpack.c.bf16 %v7615_v53, %v7614_v24  ;;  %v7454_v1 = vadd.f32 %v14591_v36, %v7092_v58  ;;  %v11587_v28 = vpop.f32.mrb[110].mxu1  ;;  %11692 = vmatprep.subr.bf16.mxu1 %v12696_v26  ;;  %v12660_v58 = vld [vmem:[%s14962_s5 + $0x98] sm:$0xff]  }
 0x630   :  { %v7544_v6 = vmax.f32 %v7456_v11, 0.0  ;;  %v7457_v9 = vadd.f32 %v11587_v28, %v14591_v36  ;;  %v7095_v13 = vpop.f32.mrb[111].mxu1 }
 0x631   :  { %v7542_v45 = vmax.f32 %v7454_v1, 0.0  ;;  %v7455_v14 = vadd.f32 %v14591_v36, %v7095_v13  ;;  %11689 = vmatmul.mubr.msk.bf16.vlgmr.msra.gmra.mrb[188].mxu1 %vm7689_vm5, %v7651_v54  ;;  %v12661_v13 = vld [vmem:[%s14962_s5 + $0xa0] sm:$0xff]  }
 0x632   :  { %v7545_v43 = vmax.f32 %v7457_v9, 0.0  ;;  %11693 = vmatpush3.bf16.msra.mxu1 %v12653_v49  ;;  %11696 = vmatprep.mubr.msk.bf16.mxu1 %vm12697_vm4, %v12696_v26 }
 0x633   :  { %v7616_v50 = vmax.f32 %v7542_v45, %v7544_v6  ;;  %v7543_v15 = vmax.f32 %v7455_v14, 0.0  ;;  %11694 = vmatprep.subr.bf16.mxu1 %v12696_v26 }
 0x635   :  { %v7617_v20 = vmax.f32 %v7543_v15, %v7545_v43  ;;  %v11590_v12 = vpop.f32.mrb[112].mxu1 }
 0x636   :  { %v7460_v61 = vadd.f32 %v11590_v12, %v14591_v36  ;;  %v7108_v30 = vpop.f32.mrb[113].mxu1  ;;  %11695 = vmatpush3.bf16.msra.mxu1 %v12654_v21 }
 0x637   :  { %v7653_v10 = vpack.c.bf16 %v7617_v20, %v7616_v50  ;;  %v7458_v37 = vadd.f32 %v14591_v36, %v7108_v30  ;;  %v11591_v39 = vpop.f32.mrb[114].mxu1  ;;  %11700 = vmatprep.subr.bf16.mxu1 %v12696_v26  ;;  %v12662_v30 = vld [vmem:[%s14962_s5 + $0xa8] sm:$0xff]  }
 0x638   :  { %v7548_v5 = vmax.f32 %v7460_v61, 0.0  ;;  %v7461_v51 = vadd.f32 %v11591_v39, %v14591_v36  ;;  %v7111_v27 = vpop.f32.mrb[115].mxu1 }
 0x639   :  { %v7546_v52 = vmax.f32 %v7458_v37, 0.0  ;;  %v7459_v29 = vadd.f32 %v14591_v36, %v7111_v27  ;;  %11697 = vmatmul.mubr.msk.bf16.vlgmr.msra.gmra.mrb[192].mxu1 %vm7689_vm5, %v7652_v46  ;;  %v12663_v27 = vld [vmem:[%s14962_s5 + $0xb0] sm:$0xff]  }
 0x63a   :  { %v7549_v33 = vmax.f32 %v7461_v51, 0.0  ;;  %11701 = vmatpush3.bf16.msra.mxu1 %v12655_v31  ;;  %11704 = vmatprep.mubr.msk.bf16.mxu1 %vm12697_vm4, %v12696_v26 }
 0x63b   :  { %v7618_v47 = vmax.f32 %v7546_v52, %v7548_v5  ;;  %v7547_v56 = vmax.f32 %v7459_v29, 0.0  ;;  %11702 = vmatprep.subr.bf16.mxu1 %v12696_v26 }
 0x63d   :  { %v7619_v40 = vmax.f32 %v7547_v56, %v7549_v33  ;;  %v11594_v55 = vpop.f32.mrb[116].mxu1 }
 0x63e   :  { %v7464_v4 = vadd.f32 %v11594_v55, %v14591_v36  ;;  %v7124_v16 = vpop.f32.mrb[117].mxu1  ;;  %11703 = vmatpush3.bf16.msra.mxu1 %v12656_v42 }
 0x63f   :  { %v7654_v38 = vpack.c.bf16 %v7619_v40, %v7618_v47  ;;  %v7462_v17 = vadd.f32 %v14591_v36, %v7124_v16  ;;  %v11595_v60 = vpop.f32.mrb[118].mxu1  ;;  %11708 = vmatprep.subr.bf16.mxu1 %v12696_v26  ;;  %v12664_v16 = vld [vmem:[%s14962_s5 + $0xb8] sm:$0xff]  }
 0x640   :  { %v7552_v48 = vmax.f32 %v7464_v4, 0.0  ;;  %v7465_v57 = vadd.f32 %v11595_v60, %v14591_v36  ;;  %v7127_v62 = vpop.f32.mrb[119].mxu1 }
 0x641   :  { %v7550_v41 = vmax.f32 %v7462_v17, 0.0  ;;  %v7463_v22 = vadd.f32 %v14591_v36, %v7127_v62  ;;  %11705 = vmatmul.mubr.msk.bf16.vlgmr.msra.gmra.mrb[196].mxu1 %vm7689_vm5, %v7653_v10  ;;  %v12665_v62 = vld [vmem:[%s14962_s5 + $0xc0] sm:$0xff]  }
 0x642   :  { %v7553_v34 = vmax.f32 %v7465_v57, 0.0  ;;  %11709 = vmatpush3.bf16.msra.mxu1 %v12657_v25  ;;  %11712 = vmatprep.mubr.msk.bf16.mxu1 %vm12697_vm4, %v12696_v26 }
 0x643   :  { %v7620_v63 = vmax.f32 %v7550_v41, %v7552_v48  ;;  %v7551_v54 = vmax.f32 %v7463_v22, 0.0  ;;  %11710 = vmatprep.subr.bf16.mxu1 %v12696_v26 }
 0x645   :  { %v7621_v0 = vmax.f32 %v7551_v54, %v7553_v34  ;;  %v11598_v7 = vpop.f32.mrb[120].mxu1 }
 0x646   :  { %v7468_v3 = vadd.f32 %v11598_v7, %v14591_v36  ;;  %v7140_v19 = vpop.f32.mrb[121].mxu1  ;;  %11711 = vmatpush3.bf16.msra.mxu1 %v12658_v59 }
 0x647   :  { %v7655_v32 = vpack.c.bf16 %v7621_v0, %v7620_v63  ;;  %v7466_v35 = vadd.f32 %v14591_v36, %v7140_v19  ;;  %v11599_v44 = vpop.f32.mrb[122].mxu1  ;;  %11716 = vmatprep.subr.bf16.mxu1 %v12696_v26  ;;  %v12666_v19 = vld [vmem:[%s14962_s5 + $0xc8] sm:$0xff]  }
 0x648   :  { %v7556_v2 = vmax.f32 %v7468_v3, 0.0  ;;  %v7469_v24 = vadd.f32 %v11599_v44, %v14591_v36  ;;  %v7143_v18 = vpop.f32.mrb[123].mxu1 }
 0x649   :  { %v7554_v53 = vmax.f32 %v7466_v35, 0.0  ;;  %v7467_v8 = vadd.f32 %v14591_v36, %v7143_v18  ;;  %11713 = vmatmul.mubr.msk.bf16.vlgmr.msra.gmra.mrb[200].mxu1 %vm7689_vm5, %v7654_v38  ;;  %v12667_v18 = vld [vmem:[%s14962_s5 + $0xd0] sm:$0xff]  }
 0x64a   :  { %v7557_v11 = vmax.f32 %v7469_v24, 0.0  ;;  %11717 = vmatpush3.bf16.msra.mxu1 %v12659_v23  ;;  %11720 = vmatprep.mubr.msk.bf16.mxu1 %vm12697_vm4, %v12696_v26 }
 0x64b   :  { %v7622_v49 = vmax.f32 %v7554_v53, %v7556_v2  ;;  %v7555_v46 = vmax.f32 %v7467_v8, 0.0  ;;  %11718 = vmatprep.subr.bf16.mxu1 %v12696_v26 }
 0x64d   :  { %v7623_v1 = vmax.f32 %v7555_v46, %v7557_v11  ;;  %v11602_v28 = vpop.f32.mrb[124].mxu1 }
 0x64e   :  { %v7472_v6 = vadd.f32 %v11602_v28, %v14591_v36  ;;  %v7156_v9 = vpop.f32.mrb[125].mxu1  ;;  %11719 = vmatpush3.bf16.msra.mxu1 %v12660_v58 }
 0x64f   :  { %v7656_v45 = vpack.c.bf16 %v7623_v1, %v7622_v49  ;;  %v7470_v14 = vadd.f32 %v14591_v36, %v7156_v9  ;;  %v11603_v43 = vpop.f32.mrb[126].mxu1  ;;  %11724 = vmatprep.subr.bf16.mxu1 %v12696_v26  ;;  %v12668_v9 = vld [vmem:[%s14962_s5 + $0xd8] sm:$0xff]  }
 0x650   :  { %v7560_v21 = vmax.f32 %v7472_v6, 0.0  ;;  %v7473_v50 = vadd.f32 %v11603_v43, %v14591_v36  ;;  %v7159_v15 = vpop.f32.mrb[127].mxu1 }
 0x651   :  { %v7558_v20 = vmax.f32 %v7470_v14, 0.0  ;;  %v7471_v12 = vadd.f32 %v14591_v36, %v7159_v15  ;;  %11721 = vmatmul.mubr.msk.bf16.vlgmr.msra.gmra.mrb[204].mxu1 %vm7689_vm5, %v7655_v32  ;;  %v12669_v15 = vld [vmem:[%s14962_s5 + $0xe0] sm:$0xff]  }
 0x652   :  { %v7561_v61 = vmax.f32 %v7473_v50, 0.0  ;;  %11725 = vmatpush3.bf16.msra.mxu1 %v12661_v13  ;;  %11728 = vmatprep.mubr.msk.bf16.mxu1 %vm12697_vm4, %v12696_v26 }
 0x653   :  { %v7624_v31 = vmax.f32 %v7558_v20, %v7560_v21  ;;  %v7559_v10 = vmax.f32 %v7471_v12, 0.0  ;;  %11726 = vmatprep.subr.bf16.mxu1 %v12696_v26 }
 0x655   :  { %v7625_v37 = vmax.f32 %v7559_v10, %v7561_v61  ;;  %v11606_v39 = vpop.f32.mrb[128].mxu1 }
 0x656   :  { %v7476_v5 = vadd.f32 %v11606_v39, %v14591_v36  ;;  %v7172_v51 = vpop.f32.mrb[129].mxu1  ;;  %11727 = vmatpush3.bf16.msra.mxu1 %v12662_v30 }
 0x657   :  { %v7657_v52 = vpack.c.bf16 %v7625_v37, %v7624_v31  ;;  %v7474_v29 = vadd.f32 %v14591_v36, %v7172_v51  ;;  %v11607_v33 = vpop.f32.mrb[130].mxu1  ;;  %11732 = vmatprep.subr.bf16.mxu1 %v12696_v26  ;;  %v12670_v51 = vld [vmem:[%s14962_s5 + $0xe8] sm:$0xff]  }
 0x658   :  { %v7564_v42 = vmax.f32 %v7476_v5, 0.0  ;;  %v7477_v47 = vadd.f32 %v11607_v33, %v14591_v36  ;;  %v7175_v56 = vpop.f32.mrb[131].mxu1 }
 0x659   :  { %v7562_v40 = vmax.f32 %v7474_v29, 0.0  ;;  %v7475_v55 = vadd.f32 %v14591_v36, %v7175_v56  ;;  %11729 = vmatmul.mubr.msk.bf16.vlgmr.msra.gmra.mrb[208].mxu1 %vm7689_vm5, %v7656_v45  ;;  %v12671_v56 = vld [vmem:[%s14962_s5 + $0xf0] sm:$0xff]  }
 0x65a   :  { %v7565_v4 = vmax.f32 %v7477_v47, 0.0  ;;  %11733 = vmatpush3.bf16.msra.mxu1 %v12663_v27  ;;  %11736 = vmatprep.mubr.msk.bf16.mxu1 %vm12697_vm4, %v12696_v26 }
 0x65b   :  { %v7626_v25 = vmax.f32 %v7562_v40, %v7564_v42  ;;  %v7563_v38 = vmax.f32 %v7475_v55, 0.0  ;;  %11734 = vmatprep.subr.bf16.mxu1 %v12696_v26 }
 0x65d   :  { %v7627_v17 = vmax.f32 %v7563_v38, %v7565_v4  ;;  %v11610_v60 = vpop.f32.mrb[132].mxu1 }
 0x65e   :  { %v7480_v48 = vadd.f32 %v11610_v60, %v14591_v36  ;;  %v7188_v57 = vpop.f32.mrb[133].mxu1  ;;  %11735 = vmatpush3.bf16.msra.mxu1 %v12664_v16 }
 0x65f   :  { %v7658_v41 = vpack.c.bf16 %v7627_v17, %v7626_v25  ;;  %v7478_v22 = vadd.f32 %v14591_v36, %v7188_v57  ;;  %v11611_v34 = vpop.f32.mrb[134].mxu1  ;;  %11740 = vmatprep.subr.bf16.mxu1 %v12696_v26  ;;  %v12672_v57 = vld [vmem:[%s14962_s5 + $0xf8] sm:$0xff]  }
 0x660   :  { %v7568_v59 = vmax.f32 %v7480_v48, 0.0  ;;  %v7481_v63 = vadd.f32 %v11611_v34, %v14591_v36  ;;  %v7191_v54 = vpop.f32.mrb[135].mxu1 }
 0x661   :  { %v7566_v0 = vmax.f32 %v7478_v22, 0.0  ;;  %v7479_v7 = vadd.f32 %v14591_v36, %v7191_v54  ;;  %11737 = vmatmul.mubr.msk.bf16.vlgmr.msra.gmra.mrb[212].mxu1 %vm7689_vm5, %v7657_v52  ;;  %v12673_v54 = vld [vmem:[%s14962_s5 + $0x100] sm:$0xff]  }
 0x662   :  { %v7569_v3 = vmax.f32 %v7481_v63, 0.0  ;;  %11741 = vmatpush3.bf16.msra.mxu1 %v12665_v62  ;;  %11744 = vmatprep.mubr.msk.bf16.mxu1 %vm12697_vm4, %v12696_v26 }
 0x663   :  { %v7628_v23 = vmax.f32 %v7566_v0, %v7568_v59  ;;  %v7567_v32 = vmax.f32 %v7479_v7, 0.0  ;;  %11742 = vmatprep.subr.bf16.mxu1 %v12696_v26 }
 0x665   :  { %v7629_v35 = vmax.f32 %v7567_v32, %v7569_v3  ;;  %v11614_v44 = vpop.f32.mrb[136].mxu1 }
 0x666   :  { %v7484_v2 = vadd.f32 %v11614_v44, %v14591_v36  ;;  %v7204_v24 = vpop.f32.mrb[137].mxu1  ;;  %11743 = vmatpush3.bf16.msra.mxu1 %v12666_v19 }
 0x667   :  { %v7659_v53 = vpack.c.bf16 %v7629_v35, %v7628_v23  ;;  %v7482_v8 = vadd.f32 %v14591_v36, %v7204_v24  ;;  %v11615_v11 = vpop.f32.mrb[138].mxu1  ;;  %11748 = vmatprep.subr.bf16.mxu1 %v12696_v26  ;;  %v12674_v24 = vld [vmem:[%s14962_s5 + $0x108] sm:$0xff]  }
 0x668   :  { %v7572_v58 = vmax.f32 %v7484_v2, 0.0  ;;  %v7485_v49 = vadd.f32 %v11615_v11, %v14591_v36  ;;  %v7207_v46 = vpop.f32.mrb[139].mxu1 }
 0x669   :  { %v7570_v1 = vmax.f32 %v7482_v8, 0.0  ;;  %v7483_v28 = vadd.f32 %v14591_v36, %v7207_v46  ;;  %11745 = vmatmul.mubr.msk.bf16.vlgmr.msra.gmra.mrb[216].mxu1 %vm7689_vm5, %v7658_v41  ;;  %v12675_v46 = vld [vmem:[%s14962_s5 + $0x110] sm:$0xff]  }
 0x66a   :  { %v7573_v6 = vmax.f32 %v7485_v49, 0.0  ;;  %11749 = vmatpush3.bf16.msra.mxu1 %v12667_v18  ;;  %11752 = vmatprep.mubr.msk.bf16.mxu1 %vm12697_vm4, %v12696_v26 }
 0x66b   :  { %v7630_v13 = vmax.f32 %v7570_v1, %v7572_v58  ;;  %v7571_v45 = vmax.f32 %v7483_v28, 0.0  ;;  %11750 = vmatprep.subr.bf16.mxu1 %v12696_v26 }
 0x66d   :  { %v7631_v14 = vmax.f32 %v7571_v45, %v7573_v6  ;;  %v11618_v43 = vpop.f32.mrb[140].mxu1 }
 0x66e   :  { %v7488_v21 = vadd.f32 %v11618_v43, %v14591_v36  ;;  %v7220_v50 = vpop.f32.mrb[141].mxu1  ;;  %11751 = vmatpush3.bf16.msra.mxu1 %v12668_v9 }
 0x66f   :  { %v7660_v20 = vpack.c.bf16 %v7631_v14, %v7630_v13  ;;  %v7486_v12 = vadd.f32 %v14591_v36, %v7220_v50  ;;  %v11619_v61 = vpop.f32.mrb[142].mxu1  ;;  %11756 = vmatprep.subr.bf16.mxu1 %v12696_v26  ;;  %v12676_v50 = vld [vmem:[%s14962_s5 + $0x118] sm:$0xff]  }
 0x670   :  { %v7576_v30 = vmax.f32 %v7488_v21, 0.0  ;;  %v7489_v31 = vadd.f32 %v11619_v61, %v14591_v36  ;;  %v7223_v10 = vpop.f32.mrb[143].mxu1 }
 0x671   :  { %v7574_v37 = vmax.f32 %v7486_v12, 0.0  ;;  %v7487_v39 = vadd.f32 %v14591_v36, %v7223_v10  ;;  %11753 = vmatmul.mubr.msk.bf16.vlgmr.msra.gmra.mrb[220].mxu1 %vm7689_vm5, %v7659_v53  ;;  %v12677_v10 = vld [vmem:[%s14962_s5 + $0x120] sm:$0xff]  }
 0x672   :  { %v7577_v5 = vmax.f32 %v7489_v31, 0.0  ;;  %11757 = vmatpush3.bf16.msra.mxu1 %v12669_v15  ;;  %11760 = vmatprep.mubr.msk.bf16.mxu1 %vm12697_vm4, %v12696_v26 }
 0x673   :  { %v7632_v27 = vmax.f32 %v7574_v37, %v7576_v30  ;;  %v7575_v52 = vmax.f32 %v7487_v39, 0.0  ;;  %11758 = vmatprep.subr.bf16.mxu1 %v12696_v26 }
 0x675   :  { %v7633_v29 = vmax.f32 %v7575_v52, %v7577_v5  ;;  %v11622_v33 = vpop.f32.mrb[144].mxu1 }
 0x676   :  { %v7492_v42 = vadd.f32 %v11622_v33, %v14591_v36  ;;  %v7236_v47 = vpop.f32.mrb[145].mxu1  ;;  %11759 = vmatpush3.bf16.msra.mxu1 %v12670_v51 }
 0x677   :  { %v7661_v40 = vpack.c.bf16 %v7633_v29, %v7632_v27  ;;  %v7490_v55 = vadd.f32 %v14591_v36, %v7236_v47  ;;  %v11623_v4 = vpop.f32.mrb[146].mxu1  ;;  %11764 = vmatprep.subr.bf16.mxu1 %v12696_v26  ;;  %v12678_v47 = vld [vmem:[%s14962_s5 + $0x128] sm:$0xff]  }
 0x678   :  { %v7580_v16 = vmax.f32 %v7492_v42, 0.0  ;;  %v7493_v25 = vadd.f32 %v11623_v4, %v14591_v36  ;;  %v7239_v38 = vpop.f32.mrb[147].mxu1 }
 0x679   :  { %v7578_v17 = vmax.f32 %v7490_v55, 0.0  ;;  %v7491_v60 = vadd.f32 %v14591_v36, %v7239_v38  ;;  %11761 = vmatmul.mubr.msk.bf16.vlgmr.msra.gmra.mrb[224].mxu1 %vm7689_vm5, %v7660_v20  ;;  %v12679_v38 = vld [vmem:[%s14962_s5 + $0x130] sm:$0xff]  }
 0x67a   :  { %v7581_v48 = vmax.f32 %v7493_v25, 0.0  ;;  %11765 = vmatpush3.bf16.msra.mxu1 %v12671_v56  ;;  %11768 = vmatprep.mubr.msk.bf16.mxu1 %vm12697_vm4, %v12696_v26 }
 0x67b   :  { %v7634_v62 = vmax.f32 %v7578_v17, %v7580_v16  ;;  %v7579_v41 = vmax.f32 %v7491_v60, 0.0  ;;  %11766 = vmatprep.subr.bf16.mxu1 %v12696_v26 }
 0x67d   :  { %v7635_v22 = vmax.f32 %v7579_v41, %v7581_v48  ;;  %v11626_v34 = vpop.f32.mrb[148].mxu1 }
 0x67e   :  { %v7496_v59 = vadd.f32 %v11626_v34, %v14591_v36  ;;  %v7252_v63 = vpop.f32.mrb[149].mxu1  ;;  %11767 = vmatpush3.bf16.msra.mxu1 %v12672_v57 }
 0x67f   :  { %v7662_v0 = vpack.c.bf16 %v7635_v22, %v7634_v62  ;;  %v7494_v7 = vadd.f32 %v14591_v36, %v7252_v63  ;;  %v11627_v3 = vpop.f32.mrb[150].mxu1  ;;  %11772 = vmatprep.subr.bf16.mxu1 %v12696_v26  ;;  %v12680_v63 = vld [vmem:[%s14962_s5 + $0x138] sm:$0xff]  }
 0x680   :  { %v7584_v19 = vmax.f32 %v7496_v59, 0.0  ;;  %v7497_v23 = vadd.f32 %v11627_v3, %v14591_v36  ;;  %v7255_v32 = vpop.f32.mrb[151].mxu1 }
 0x681   :  { %v7582_v35 = vmax.f32 %v7494_v7, 0.0  ;;  %v7495_v44 = vadd.f32 %v14591_v36, %v7255_v32  ;;  %11769 = vmatmul.mubr.msk.bf16.vlgmr.msra.gmra.mrb[228].mxu1 %vm7689_vm5, %v7661_v40  ;;  %v12681_v32 = vld [vmem:[%s14962_s5 + $0x140] sm:$0xff]  }
 0x682   :  { %v7585_v2 = vmax.f32 %v7497_v23, 0.0  ;;  %11773 = vmatpush3.bf16.msra.mxu1 %v12673_v54  ;;  %11776 = vmatprep.mubr.msk.bf16.mxu1 %vm12697_vm4, %v12696_v26 }
 0x683   :  { %v7636_v18 = vmax.f32 %v7582_v35, %v7584_v19  ;;  %v7583_v53 = vmax.f32 %v7495_v44, 0.0  ;;  %11774 = vmatprep.subr.bf16.mxu1 %v12696_v26 }
 0x685   :  { %v7637_v8 = vmax.f32 %v7583_v53, %v7585_v2  ;;  %v11630_v11 = vpop.f32.mrb[152].mxu1 }
 0x686   :  { %v7500_v58 = vadd.f32 %v11630_v11, %v14591_v36  ;;  %v7268_v49 = vpop.f32.mrb[153].mxu1  ;;  %11775 = vmatpush3.bf16.msra.mxu1 %v12674_v24 }
 0x687   :  { %v7663_v1 = vpack.c.bf16 %v7637_v8, %v7636_v18  ;;  %v7498_v28 = vadd.f32 %v14591_v36, %v7268_v49  ;;  %v11631_v6 = vpop.f32.mrb[154].mxu1  ;;  %11780 = vmatprep.subr.bf16.mxu1 %v12696_v26  ;;  %v12682_v49 = vld [vmem:[%s14962_s5 + $0x148] sm:$0xff]  }
 0x688   :  { %v7588_v9 = vmax.f32 %v7500_v58, 0.0  ;;  %v7501_v13 = vadd.f32 %v11631_v6, %v14591_v36  ;;  %v7271_v45 = vpop.f32.mrb[155].mxu1 }
 0x689   :  { %v7586_v14 = vmax.f32 %v7498_v28, 0.0  ;;  %v7499_v43 = vadd.f32 %v14591_v36, %v7271_v45  ;;  %11777 = vmatmul.mubr.msk.bf16.vlgmr.msra.gmra.mrb[232].mxu1 %vm7689_vm5, %v7662_v0 }
 0x68a   :  { %v7589_v21 = vmax.f32 %v7501_v13, 0.0  ;;  %11781 = vmatpush3.bf16.msra.mxu1 %v12675_v46  ;;  %11784 = vmatprep.mubr.msk.bf16.mxu1 %vm12697_vm4, %v12696_v26 }
 0x68b   :  { %v7638_v15 = vmax.f32 %v7586_v14, %v7588_v9  ;;  %v7587_v20 = vmax.f32 %v7499_v43, 0.0  ;;  %11782 = vmatprep.subr.bf16.mxu1 %v12696_v26  ;;  %v12684_v9 = vld [vmem:[%s14962_s5 + $0x158] sm:$0xff]  }
 0x68d   :  { %v7639_v12 = vmax.f32 %v7587_v20, %v7589_v21  ;;  %v11634_v61 = vpop.f32.mrb[156].mxu1 }
 0x68e   :  { %v7504_v30 = vadd.f32 %v11634_v61, %v14591_v36  ;;  %v7284_v31 = vpop.f32.mrb[157].mxu1  ;;  %11783 = vmatpush3.bf16.msra.mxu1 %v12676_v50 }
 0x68f   :  { %v7664_v37 = vpack.c.bf16 %v7639_v12, %v7638_v15  ;;  %v7502_v39 = vadd.f32 %v14591_v36, %v7284_v31  ;;  %v11635_v5 = vpop.f32.mrb[158].mxu1  ;;  %11788 = vmatprep.subr.bf16.mxu1 %v12696_v26 }
 0x690   :  { %v7592_v51 = vmax.f32 %v7504_v30, 0.0  ;;  %v7505_v27 = vadd.f32 %v11635_v5, %v14591_v36  ;;  %v7287_v52 = vpop.f32.mrb[159].mxu1 }
 0x691   :  { %v7590_v29 = vmax.f32 %v7502_v39, 0.0  ;;  %v7503_v33 = vadd.f32 %v14591_v36, %v7287_v52  ;;  %11785 = vmatmul.mubr.msk.bf16.vlgmr.msra.gmra.mrb[236].mxu1 %vm7689_vm5, %v7663_v1  ;;  %v12685_v39 = vld [vmem:[%s14964_s7] sm:$0xff]  }
 0x692   :  { %v7593_v42 = vmax.f32 %v7505_v27, 0.0  ;;  %11789 = vmatpush3.bf16.msra.mxu1 %v12677_v10  ;;  %11792 = vmatprep.mubr.msk.bf16.mxu1 %vm12697_vm4, %v12696_v26  ;;  %v12686_v27 = vld [vmem:[%s14964_s7 + $0x8] sm:$0xff]  }
 0x693   :  { %v7640_v56 = vmax.f32 %v7590_v29, %v7592_v51  ;;  %v7591_v40 = vmax.f32 %v7503_v33, 0.0  ;;  %11790 = vmatprep.subr.bf16.mxu1 %v12696_v26 }
 0x695   :  { %v7641_v55 = vmax.f32 %v7591_v40, %v7593_v42  ;;  %v11638_v4 = vpop.f32.mrb[160].mxu1 }
 0x696   :  { %v7508_v16 = vadd.f32 %v11638_v4, %v14591_v36  ;;  %v7300_v25 = vpop.f32.mrb[161].mxu1  ;;  %11791 = vmatpush3.bf16.msra.mxu1 %v12678_v47  ;;  %v12687_v47 = vld [vmem:[%s14964_s7 + $0x10] sm:$0xff]  }
 0x697   :  { %v7665_v17 = vpack.c.bf16 %v7641_v55, %v7640_v56  ;;  %v7506_v60 = vadd.f32 %v14591_v36, %v7300_v25  ;;  %v11639_v48 = vpop.f32.mrb[162].mxu1  ;;  %11796 = vmatprep.subr.bf16.mxu1 %v12696_v26  ;;  %v12688_v55 = vld [vmem:[%s14964_s7 + $0x18] sm:$0xff]  }
 0x698   :  { %v7596_v57 = vmax.f32 %v7508_v16, 0.0  ;;  %v7509_v62 = vadd.f32 %v11639_v48, %v14591_v36  ;;  %v7303_v41 = vpop.f32.mrb[163].mxu1 }
 0x699   :  { %v7594_v22 = vmax.f32 %v7506_v60, 0.0  ;;  %v7507_v34 = vadd.f32 %v14591_v36, %v7303_v41  ;;  %11793 = vmatmul.mubr.msk.bf16.vlgmr.msra.gmra.mrb[240].mxu1 %vm7689_vm5, %v7664_v37 }
 0x69a   :  { %v7597_v59 = vmax.f32 %v7509_v62, 0.0  ;;  %11797 = vmatpush3.bf16.msra.mxu1 %v12679_v38  ;;  %11800 = vmatprep.mubr.msk.bf16.mxu1 %vm12697_vm4, %v12696_v26 }
 0x69b   :  { %v7642_v54 = vmax.f32 %v7594_v22, %v7596_v57  ;;  %v7595_v0 = vmax.f32 %v7507_v34, 0.0  ;;  %11798 = vmatprep.subr.bf16.mxu1 %v12696_v26  ;;  %v12690_v57 = vld [vmem:[%s14964_s7 + $0x28] sm:$0xff]  }
 0x69d   :  { %v7643_v7 = vmax.f32 %v7595_v0, %v7597_v59  ;;  %v11642_v3 = vpop.f32.mrb[164].mxu1  ;;  %v12691_v59 = vld [vmem:[%s14964_s7 + $0x30] sm:$0xff]   ;;  %v12692_v0 = vld [vmem:[%s14964_s7 + $0x38] sm:$0xff]  }
 0x69e   :  { %v7512_v19 = vadd.f32 %v11642_v3, %v14591_v36  ;;  %v7316_v23 = vpop.f32.mrb[165].mxu1  ;;  %11799 = vmatpush3.bf16.msra.mxu1 %v12680_v63 }
 0x69f   :  { %v7666_v35 = vpack.c.bf16 %v7643_v7, %v7642_v54  ;;  %v7510_v44 = vadd.f32 %v14591_v36, %v7316_v23  ;;  %v11643_v2 = vpop.f32.mrb[166].mxu1  ;;  %11804 = vmatprep.subr.bf16.mxu1 %v12696_v26 }
 0x6a0   :  { %v7600_v24 = vmax.f32 %v7512_v19, 0.0  ;;  %v7513_v18 = vadd.f32 %v11643_v2, %v14591_v36  ;;  %v7319_v53 = vpop.f32.mrb[167].mxu1 }
 0x6a1   :  { %v7598_v8 = vmax.f32 %v7510_v44, 0.0  ;;  %v7511_v11 = vadd.f32 %v14591_v36, %v7319_v53  ;;  %11801 = vmatmul.mubr.msk.bf16.vlgmr.msra.gmra.mrb[244].mxu1 %vm7689_vm5, %v7665_v17  ;;  %v12683_v36 = vld [vmem:[%s14962_s5 + $0x150] sm:$0xff]   ;;  %v12689_v17 = vld [vmem:[%s14964_s7 + $0x20] sm:$0xff]  }
 0x6a2   :  { %v7601_v58 = vmax.f32 %v7513_v18, 0.0  ;;  %11805 = vmatpush3.bf16.msra.mxu1 %v12681_v32  ;;  %11808 = vmatprep.mubr.msk.bf16.mxu1 %vm12697_vm4, %v12696_v26 }
 0x6a3   :  { %v7644_v46 = vmax.f32 %v7598_v8, %v7600_v24  ;;  %v7599_v1 = vmax.f32 %v7511_v11, 0.0  ;;  %11806 = vmatprep.subr.bf16.mxu1 %v12696_v26 }
 0x6a5   :  { %v7645_v28 = vmax.f32 %v7599_v1, %v7601_v58 }
 0x6a6   :  { %11807 = vmatpush3.bf16.msra.mxu1 %v12682_v49 }
 0x6a7   :  { %v7667_v6 = vpack.c.bf16 %v7645_v28, %v7644_v46  ;;  %11812 = vmatprep.subr.bf16.mxu1 %v12696_v26 }
 0x6a9   :  { %11809 = vmatmul.mubr.msk.bf16.vlgmr.msra.gmra.mrb[248].mxu1 %vm7689_vm5, %v7666_v35 }
 0x6aa   :  { %11813 = vmatpush3.bf16.msra.mxu1 %v12683_v36  ;;  %11816 = vmatprep.mubr.msk.bf16.mxu1 %vm12697_vm4, %v12696_v26 }
 0x6ab   :  { %11814 = vmatprep.subr.bf16.mxu1 %v12696_v26 }
 0x6ae   :  { %11815 = vmatpush3.bf16.msra.mxu1 %v12684_v9 }
 0x6af   :  { %11820 = vmatprep.subr.bf16.mxu1 %v12696_v26 }
 0x6b1   :  { %11817 = vmatmul.mubr.msk.bf16.vlgmr.msra.gmra.mrb[252].mxu1 %vm7689_vm5, %v7667_v6 }
 0x6b2   :  { %11836 = vmatprep.mubr.msk.bf16.mxu1 %vm12697_vm4, %v12696_v26  ;;  %11821 = vmatpush3.bf16.msra.mxu1 %v12685_v39 }
 0x6b3   :  { %11822 = vmatprep.subr.bf16.mxu1 %v12696_v26 }
 0x6b6   :  { %11823 = vmatpush3.bf16.msra.mxu1 %v12686_v27 }
 0x6b7   :  { %11824 = vmatprep.subr.bf16.mxu1 %v12696_v26 }
 0x6ba   :  { %11825 = vmatpush3.bf16.msra.mxu1 %v12687_v47 }
 0x6bb   :  { %11826 = vmatprep.subr.bf16.mxu1 %v12696_v26 }
 0x6be   :  { %11827 = vmatpush3.bf16.msra.mxu1 %v12688_v55 }
 0x6bf   :  { %11828 = vmatprep.subr.bf16.mxu1 %v12696_v26 }
 0x6c2   :  { %11829 = vmatpush3.bf16.msra.mxu1 %v12689_v17 }
 0x6c3   :  { %11830 = vmatprep.subr.bf16.mxu1 %v12696_v26 }
 0x6c6   :  { %11831 = vmatpush3.bf16.msra.mxu1 %v12690_v57 }
 0x6c7   :  { %11832 = vmatprep.subr.bf16.mxu1 %v12696_v26 }
 0x6ca   :  { %11833 = vmatpush3.bf16.msra.mxu1 %v12691_v59 }
 0x6cb   :  { %11834 = vmatprep.subr.bf16.mxu1 %v12696_v26 }
 0x6ce   :  { %11835 = vmatpush3.bf16.msra.mxu1 %v12692_v0 }
 0x6dc   :  { %v7727_v13 = vpop.f32.mrb[168].mxu1 }
 0x6dd   :  { %v11650_v45 = vpop.f32.mrb[169].mxu1 }
 0x6de   :  { %v7730_v14 = vpop.f32.mrb[170].mxu1 }
 0x6df   :  { %v11651_v43 = vpop.f32.mrb[171].mxu1 }
 0x6e4   :  { %v7783_v21 = vpop.f32.mrb[172].mxu1 }
 0x6e5   :  { %v7784_v50 = vadd.f32 %v7783_v21, %v7727_v13  ;;  %v11658_v15 = vpop.f32.mrb[173].mxu1 }
 0x6e6   :  { %v7786_v20 = vpop.f32.mrb[174].mxu1 }
 0x6e7   :  { %v7787_v12 = vadd.f32 %v7786_v20, %v7730_v14  ;;  %v11659_v61 = vpop.f32.mrb[175].mxu1 }
 0x6ec   :  { %v7844_v30 = vpop.f32.mrb[176].mxu1 }
 0x6ed   :  { %v7851_v31 = vadd.f32 %v7844_v30, %v7784_v50  ;;  %v11666_v10 = vpop.f32.mrb[177].mxu1 }
 0x6ee   :  { %v7847_v37 = vpop.f32.mrb[178].mxu1 }
 0x6ef   :  { %v7852_v5 = vadd.f32 %v7847_v37, %v7787_v12  ;;  %v11667_v51 = vpop.f32.mrb[179].mxu1 }
 0x6f4   :  { %v7907_v52 = vpop.f32.mrb[180].mxu1 }
 0x6f5   :  { %v7914_v29 = vadd.f32 %v7907_v52, %v7851_v31  ;;  %v11674_v33 = vpop.f32.mrb[181].mxu1 }
 0x6f6   :  { %v7910_v42 = vpop.f32.mrb[182].mxu1 }
 0x6f7   :  { %v7915_v56 = vadd.f32 %v7910_v42, %v7852_v5  ;;  %v11675_v40 = vpop.f32.mrb[183].mxu1 }
 0x6fc   :  { %v7970_v4 = vpop.f32.mrb[184].mxu1 }
 0x6fd   :  { %v7977_v16 = vadd.f32 %v7970_v4, %v7914_v29  ;;  %v11682_v25 = vpop.f32.mrb[185].mxu1 }
 0x6fe   :  { %v7973_v38 = vpop.f32.mrb[186].mxu1 }
 0x6ff   :  { %v7978_v60 = vadd.f32 %v7973_v38, %v7915_v56  ;;  %v11683_v48 = vpop.f32.mrb[187].mxu1 }
 0x704   :  { %v8033_v62 = vpop.f32.mrb[188].mxu1 }
 0x705   :  { %v8040_v41 = vadd.f32 %v8033_v62, %v7977_v16  ;;  %v11690_v22 = vpop.f32.mrb[189].mxu1 }
 0x706   :  { %v8036_v34 = vpop.f32.mrb[190].mxu1 }
 0x707   :  { %v8041_v63 = vadd.f32 %v8036_v34, %v7978_v60  ;;  %v11691_v54 = vpop.f32.mrb[191].mxu1 }
 0x70c   :  { %v8096_v7 = vpop.f32.mrb[192].mxu1 }
 0x70d   :  { %v8103_v3 = vadd.f32 %v8096_v7, %v8040_v41  ;;  %v11698_v19 = vpop.f32.mrb[193].mxu1 }
 0x70e   :  { %v8099_v23 = vpop.f32.mrb[194].mxu1 }
 0x70f   :  { %v8104_v32 = vadd.f32 %v8099_v23, %v8041_v63  ;;  %v11699_v35 = vpop.f32.mrb[195].mxu1 }
 0x714   :  { %v8159_v44 = vpop.f32.mrb[196].mxu1 }
 0x715   :  { %v8166_v2 = vadd.f32 %v8159_v44, %v8103_v3  ;;  %v11706_v24 = vpop.f32.mrb[197].mxu1 }
 0x716   :  { %v8162_v18 = vpop.f32.mrb[198].mxu1 }
 0x717   :  { %v8167_v53 = vadd.f32 %v8162_v18, %v8104_v32  ;;  %v11707_v8 = vpop.f32.mrb[199].mxu1 }
 0x71c   :  { %v8222_v11 = vpop.f32.mrb[200].mxu1 }
 0x71d   :  { %v8229_v58 = vadd.f32 %v8222_v11, %v8166_v2  ;;  %v11714_v26 = vpop.f32.mrb[201].mxu1 }
 0x71e   :  { %v8225_v49 = vpop.f32.mrb[202].mxu1 }
 0x71f   :  { %v8230_v46 = vadd.f32 %v8225_v49, %v8167_v53  ;;  %v11715_v1 = vpop.f32.mrb[203].mxu1 }
 0x724   :  { %v8285_v28 = vpop.f32.mrb[204].mxu1 }
 0x725   :  { %v8292_v36 = vadd.f32 %v8285_v28, %v8229_v58  ;;  %v11722_v6 = vpop.f32.mrb[205].mxu1 }
 0x726   :  { %v8288_v9 = vpop.f32.mrb[206].mxu1 }
 0x727   :  { %v8293_v13 = vadd.f32 %v8288_v9, %v8230_v46  ;;  %v11723_v45 = vpop.f32.mrb[207].mxu1 }
 0x72c   :  { %v8348_v14 = vpop.f32.mrb[208].mxu1 }
 0x72d   :  { %v8355_v43 = vadd.f32 %v8348_v14, %v8292_v36  ;;  %v11730_v21 = vpop.f32.mrb[209].mxu1 }
 0x72e   :  { %v8351_v50 = vpop.f32.mrb[210].mxu1 }
 0x72f   :  { %v8356_v15 = vadd.f32 %v8351_v50, %v8293_v13  ;;  %v11731_v20 = vpop.f32.mrb[211].mxu1  ;;  %v10353_v50 = vld [vmem:[%s14965_s6] ss:$0 sm:$0xff] }
 0x734   :  { %v8411_v12 = vpop.f32.mrb[212].mxu1 }
 0x735   :  { %v8418_v61 = vadd.f32 %v8411_v12, %v8355_v43  ;;  %v11738_v30 = vpop.f32.mrb[213].mxu1 }
 0x736   :  { %v8414_v31 = vpop.f32.mrb[214].mxu1 }
 0x737   :  { %v8419_v10 = vadd.f32 %v8414_v31, %v8356_v15  ;;  %v11739_v37 = vpop.f32.mrb[215].mxu1 }
 0x73c   :  { %v8474_v39 = vpop.f32.mrb[216].mxu1 }
 0x73d   :  { %v8481_v5 = vadd.f32 %v8474_v39, %v8418_v61  ;;  %v11746_v51 = vpop.f32.mrb[217].mxu1 }
 0x73e   :  { %v8477_v27 = vpop.f32.mrb[218].mxu1  ;;  %v10354_v51 = vld [vmem:[%s14966_s8] ss:$0 sm:$0xff] }
 0x73f   :  { %v8482_v52 = vadd.f32 %v8477_v27, %v8419_v10  ;;  %v11747_v29 = vpop.f32.mrb[219].mxu1 }
 0x744   :  { %v8537_v33 = vpop.f32.mrb[220].mxu1 }
 0x745   :  { %v8544_v42 = vadd.f32 %v8537_v33, %v8481_v5  ;;  %v11754_v47 = vpop.f32.mrb[221].mxu1 }
 0x746   :  { %v8540_v56 = vpop.f32.mrb[222].mxu1 }
 0x747   :  { %v8545_v40 = vadd.f32 %v8540_v56, %v8482_v52  ;;  %v11755_v55 = vpop.f32.mrb[223].mxu1 }
 0x74c   :  { %v8600_v4 = vpop.f32.mrb[224].mxu1 }
 0x74d   :  { %v8607_v16 = vadd.f32 %v8600_v4, %v8544_v42  ;;  %v11762_v25 = vpop.f32.mrb[225].mxu1 }
 0x74e   :  { %v8603_v38 = vpop.f32.mrb[226].mxu1 }
 0x74f   :  { %v8608_v17 = vadd.f32 %v8603_v38, %v8545_v40  ;;  %v11763_v60 = vpop.f32.mrb[227].mxu1 }
 0x754   :  { %v8663_v48 = vpop.f32.mrb[228].mxu1 }
 0x755   :  { %v8670_v57 = vadd.f32 %v8663_v48, %v8607_v16  ;;  %v11770_v62 = vpop.f32.mrb[229].mxu1 }
 0x756   :  { %v8666_v41 = vpop.f32.mrb[230].mxu1 }
 0x757   :  { %v8671_v22 = vadd.f32 %v8666_v41, %v8608_v17  ;;  %v11771_v34 = vpop.f32.mrb[231].mxu1 }
 0x75c   :  { %v8726_v59 = vpop.f32.mrb[232].mxu1 }
 0x75d   :  { %v8733_v63 = vadd.f32 %v8726_v59, %v8670_v57  ;;  %v11778_v54 = vpop.f32.mrb[233].mxu1 }
 0x75e   :  { %v8729_v0 = vpop.f32.mrb[234].mxu1 }
 0x75f   :  { %v8734_v7 = vadd.f32 %v8729_v0, %v8671_v22  ;;  %v11779_v3 = vpop.f32.mrb[235].mxu1 }
 0x764   :  { %v8789_v19 = vpop.f32.mrb[236].mxu1 }
 0x765   :  { %v8796_v23 = vadd.f32 %v8789_v19, %v8733_v63  ;;  %v11786_v32 = vpop.f32.mrb[237].mxu1 }
 0x766   :  { %v8792_v35 = vpop.f32.mrb[238].mxu1 }
 0x767   :  { %v8797_v44 = vadd.f32 %v8792_v35, %v8734_v7  ;;  %v11787_v2 = vpop.f32.mrb[239].mxu1 }
 0x76c   :  { %v8852_v24 = vpop.f32.mrb[240].mxu1 }
 0x76d   :  { %v8859_v18 = vadd.f32 %v8852_v24, %v8796_v23  ;;  %v11794_v53 = vpop.f32.mrb[241].mxu1 }
 0x76e   :  { %v8855_v8 = vpop.f32.mrb[242].mxu1 }
 0x76f   :  { %v8860_v11 = vadd.f32 %v8855_v8, %v8797_v44  ;;  %v11795_v58 = vpop.f32.mrb[243].mxu1 }
 0x774   :  { %v8915_v26 = vpop.f32.mrb[244].mxu1 }
 0x775   :  { %v8922_v49 = vadd.f32 %v8915_v26, %v8859_v18  ;;  %v11802_v46 = vpop.f32.mrb[245].mxu1 }
 0x776   :  { %v8918_v1 = vpop.f32.mrb[246].mxu1 }
 0x777   :  { %v8923_v28 = vadd.f32 %v8918_v1, %v8860_v11  ;;  %v11803_v36 = vpop.f32.mrb[247].mxu1 }
 0x77c   :  { %v8978_v6 = vpop.f32.mrb[248].mxu1 }
 0x77d   :  { %v8985_v9 = vadd.f32 %v8978_v6, %v8922_v49  ;;  %v11810_v13 = vpop.f32.mrb[249].mxu1 }
 0x77e   :  { %v8981_v45 = vpop.f32.mrb[250].mxu1 }
 0x77f   :  { %v8986_v14 = vadd.f32 %v8981_v45, %v8923_v28  ;;  %v11811_v43 = vpop.f32.mrb[251].mxu1 }
 0x784   :  { %v9041_v21 = vpop.f32.mrb[252].mxu1 }
 0x785   :  { %v9048_v15 = vadd.f32 %v9041_v21, %v8985_v9  ;;  %v11818_v20 = vpop.f32.mrb[253].mxu1 }
 0x786   :  { %v9044_v12 = vpop.f32.mrb[254].mxu1 }
 0x787   :  { %v9057_v61 = vadd.f32 %v10353_v50, %v9048_v15  ;;  %v9049_v30 = vadd.f32 %v9044_v12, %v8986_v14  ;;  %v11819_v31 = vpop.f32.mrb[255].mxu1 }
 0x789   :  { %v9058_v10 = vadd.f32 %v10353_v50, %v9049_v30  ;;  %v9059_v37 = vmax.f32 %v9057_v61, 0.0 }
 0x78b   :  { %v9060_v39 = vmax.f32 %v9058_v10, 0.0 }
 0x78d   :  { %v9061_v5 = vpack.c.bf16 %v9060_v39, %v9059_v37 }
 0x78f   :  { %11837 = vmatmul.mubr.bf16.vlgmr.msra.gmra.mrb[0].mxu1 %v9061_v5 }
 0x862   :  { %v9167_v27 = vpop.f32.mrb[0].mxu1 }
 0x863   :  { %v9168_v52 = vadd.f32 %v10354_v51, %v9167_v27  ;;  %v11838_v29 = vpop.f32.mrb[1].mxu1 }
 0x864   :  { %v9170_v33 = vpop.f32.mrb[2].mxu1 }
 0x865   :  { %9174 = vst [vmem:[%s14967_s9] sm:$0xff] %v9168_v52  ;;  %v9171_v42 = vadd.f32 %v10354_v51, %v9170_v33  ;;  %v11839_v47 = vpop.f32.mrb[3].mxu1 }
 0x867   :  { %9175 = vst [vmem:[%s14967_s9 + $0x8] sm:$0xff] %v9171_v42 }

</bundles_post_ra>
